<compile_context>
chip_gen: v7x
topology: tpu7x:2x2x1
jax: 0.10.0
libtpu: 0.0.40
codegen_flags: <defaults>
</compile_context>

<pallas_src>
import functools

import jax
import jax.numpy as jnp
from jax.experimental import pallas as pl
from jax.experimental.pallas import tpu as pltpu


def _round_up(x, m):
    return ((x + m - 1) // m) * m


# ----------------------------------------------------------------------------
# Pallas kernel: direct (stride-1) conv + folded-BN bias + swish for one
# (th x Wout_p) output row band and one Cout tile.  All K*K taps are reduced
# in-kernel, so the output block is written exactly once.
# ----------------------------------------------------------------------------
def _direct_conv_kernel(x_ref, w_ref, b_ref, o_ref, *, kk, th, wout_p):
    # x_ref: (1, Hp, Wp, Cin)     bf16 whole padded image (VMEM-resident across hb/j)
    # w_ref: (kk, kk, Cin, tn)    bf16 BN-scale-folded weights (resident across n/hb)
    # b_ref: (1, tn)              f32 folded BN bias
    # o_ref: (1, th, wout_p, tn)  bf16 output row band
    hb = pl.program_id(2)
    cin = x_ref.shape[-1]
    tn = o_ref.shape[-1]
    m = th * wout_p
    row0 = pl.multiple_of(hb * th, th)

    acc = jnp.zeros((m, tn), jnp.float32)
    for dy in range(kk):
        for dx in range(kk):
            # (th, wout_p, cin) window; wout_p % 8 == 0 and cin is the full
            # minor dim, so the collapse to (m, cin) is tile-aligned.
            xs = x_ref[0, pl.ds(row0 + dy, th), dx:dx + wout_p, :]
            acc += jnp.dot(xs.reshape(m, cin), w_ref[dy, dx],
                           preferred_element_type=jnp.float32)

    y = acc + b_ref[...]
    # swish(y) = y * sigmoid(y); stable form (exp of a non-positive argument),
    # reciprocal stays on the otherwise-idle EUP slot.
    e = jnp.exp(-jnp.abs(y))
    sig = pl.reciprocal(1.0 + e, approx=True)
    sig = jnp.where(y >= 0.0, sig, 1.0 - sig)
    o_ref[...] = (y * sig).reshape(1, th, wout_p, tn).astype(o_ref.dtype)


# ----------------------------------------------------------------------------
# Fused stride-1 conv + BN + swish on an NHWC bf16 input.
# ----------------------------------------------------------------------------
def _fused_conv_bn_swish_nhwc(x_nhwc, w_kkio, bias, *, kernel_size):
    """x_nhwc: (N, H, W, Cin) bf16.  w_kkio: (K, K, Cin, Cout) f32 (BN scale
    folded).  bias: (Cout,) f32.  Returns (N, Hout, Wout, Cout) bf16."""
    N, H, W, Cin = x_nhwc.shape
    K = kernel_size
    Cout = w_kkio.shape[-1]
    pad = K // 2
    Hout = H + 2 * pad - K + 1
    Wout = W + 2 * pad - K + 1

    # Lane/sublane-friendly padding of the output extent (garbage rows/cols are
    # computed over zero padding and sliced off below).  This also guarantees
    # the GEMM row tile never collapses for odd spatial sizes.
    Wout_p = _round_up(Wout, 8)
    Hout_p = _round_up(Hout, 8)
    Coutp = _round_up(Cout, 128)

    # Cout tile: weights for a tile stay VMEM-resident for the whole j-sweep.
    if Coutp <= 512:
        tn = Coutp
    elif Coutp % 512 == 0:
        tn = 512
    elif Coutp % 256 == 0:
        tn = 256
    else:
        tn = 128
    J = Coutp // tn

    # Row-band height: target ~1024 GEMM rows per grid step (amortizes the
    # ~0.35us per-step overhead) while dividing the padded output height.
    cap = min(Hout_p, max(1, 1024 // Wout_p))
    th = 1
    for d in range(1, cap + 1):
        if Hout_p % d == 0:
            th = d
    # Make sure there are >= 2 grid blocks so both v7x TensorCores get work.
    if J * N * (Hout_p // th) < 2 and th > 1:
        for d in range(th - 1, 0, -1):
            if Hout_p % d == 0:
                th = d
                break
    HB = Hout_p // th

    # Padded input: image placed at offset (pad, pad); extra bottom/right zero
    # rows/cols cover the Hout_p/Wout_p over-compute.
    Hp = Hout_p + K - 1
    Wp = Wout_p + K - 1
    x_prep = jnp.pad(
        x_nhwc, ((0, 0), (pad, Hp - H - pad), (pad, Wp - W - pad), (0, 0)))
    w_prep = jnp.pad(w_kkio, ((0, 0), (0, 0), (0, 0), (0, Coutp - Cout))
                     ).astype(jnp.bfloat16)
    b_prep = jnp.pad(bias.astype(jnp.float32),
                     (0, Coutp - Cout)).reshape(1, Coutp)

    grid = (J, N, HB)
    kern = functools.partial(_direct_conv_kernel, kk=K, th=th, wout_p=Wout_p)

    # VMEM budget: double-buffered blocks + in-kernel f32 accumulator/slices.
    xb = Hp * Wp * Cin * 2
    wb = K * K * Cin * tn * 2
    ob = th * Wout_p * tn * 2
    scratch = th * Wout_p * (tn * 4 + Cin * 4)
    vmem_limit = int(min(max(2 * (xb + wb + ob) + scratch + (4 << 20), 32 << 20),
                         128 << 20))
    # TODO(synk): for very large spatial extents (e.g. 608x608x32 stem layers)
    # the whole-image-resident block exceeds v7x's 64 MiB VMEM; stream row
    # bands with a halo via manual make_async_copy in that regime.

    flops = 2 * N * Hout_p * Wout_p * K * K * Cin * Coutp
    bytes_accessed = (J * N * xb + K * K * Cin * Coutp * 2 + Coutp * 4
                      + N * Hout_p * Wout_p * Coutp * 2)

    out = pl.pallas_call(
        kern,
        out_shape=jax.ShapeDtypeStruct((N, Hout_p, Wout_p, Coutp), jnp.bfloat16),
        grid_spec=pltpu.PrefetchScalarGridSpec(
            num_scalar_prefetch=0,
            grid=grid,
            in_specs=[
                # Whole padded image: block index constant in j/hb -> DMA'd once
                # per (j, n) and held in VMEM.
                pl.BlockSpec((1, Hp, Wp, Cin), lambda j, n, hb: (n, 0, 0, 0)),
                # Folded weights for Cout tile j: resident across n/hb.
                pl.BlockSpec((K, K, Cin, tn), lambda j, n, hb: (0, 0, 0, j)),
                pl.BlockSpec((1, tn), lambda j, n, hb: (0, j)),
            ],
            out_specs=pl.BlockSpec((1, th, Wout_p, tn),
                                   lambda j, n, hb: (n, hb, 0, j)),
        ),
        compiler_params=pltpu.CompilerParams(
            dimension_semantics=("parallel", "parallel", "parallel"),
            vmem_limit_bytes=vmem_limit,
        ),
        cost_estimate=pl.CostEstimate(
            flops=flops,
            transcendentals=N * Hout_p * Wout_p * Coutp,
            bytes_accessed=bytes_accessed),
    )(x_prep, w_prep, b_prep)

    return out[:, :Hout, :Wout, :Cout]


# ----------------------------------------------------------------------------
# Public wrapper: NCHW in / NCHW out (PyTorch Conv block semantics).
# ----------------------------------------------------------------------------
@functools.partial(jax.jit, static_argnames=("kernel_size", "stride", "eps"))
def conv_bn_swish(x_nchw, weight, gamma, beta, running_mean, running_var,
                  *, kernel_size, stride=1, eps=1e-5):
    """Equivalent of Conv.forward (eval mode) for an NCHW input.

    weight: (Cout, Cin, K, K) PyTorch Conv2d layout, bias=False.
    gamma, beta, running_mean, running_var: (Cout,).
    Returns NCHW float32 output.
    """
    N, Cin, H, W = x_nchw.shape
    K = kernel_size

    # Fold inference BatchNorm into a per-output-channel scale (-> weights) and bias.
    inv_std = gamma.astype(jnp.float32) / jnp.sqrt(
        running_var.astype(jnp.float32) + eps)
    bias = beta.astype(jnp.float32) - running_mean.astype(jnp.float32) * inv_std

    # (Cout, Cin, K, K) -> (K, K, Cin, Cout), BN scale folded in.
    w_kkio = jnp.transpose(weight.astype(jnp.float32), (2, 3, 1, 0)) * inv_std

    # NCHW -> NHWC bf16 (MXU operands; accumulation stays f32 in-kernel).
    x_nhwc = jnp.transpose(x_nchw, (0, 2, 3, 1)).astype(jnp.bfloat16)

    if stride == 1:
        out_nhwc = _fused_conv_bn_swish_nhwc(x_nhwc, w_kkio, bias,
                                             kernel_size=K)
    else:
        # TODO(synk): stride>1 (Darknet downsample convs) falls back to a
        # wrapper-level im2col (K^2-amplified HBM tensor) feeding the same
        # kernel as a 1x1 conv; a halo-DMA row-band kernel would remove the
        # amplification for strided convs too.
        pad = K // 2
        xp = jnp.pad(x_nhwc, ((0, 0), (pad, pad), (pad, pad), (0, 0)))
        Hout = (H + 2 * pad - K) // stride + 1
        Wout = (W + 2 * pad - K) // stride + 1
        cols = []
        for dy in range(K):
            for dx in range(K):
                cols.append(xp[:, dy:dy + (Hout - 1) * stride + 1:stride,
                               dx:dx + (Wout - 1) * stride + 1:stride, :])
        x_eff = jnp.concatenate(cols, axis=-1)          # (N, Hout, Wout, K*K*Cin)
        w_eff = w_kkio.reshape(1, 1, K * K * Cin, -1)
        out_nhwc = _fused_conv_bn_swish_nhwc(x_eff, w_eff, bias, kernel_size=1)

    # TODO(synk): when chaining Conv blocks, keep activations NHWC/bf16 and skip
    # this transpose; NCHW f32 is only produced to match the PyTorch interface.
    out = jnp.transpose(out_nhwc, (0, 3, 1, 2))
    return out.astype(jnp.float32)


# ----------------------------------------------------------------------------
# Reference (pure JAX, f32) for a sanity check
# ----------------------------------------------------------------------------
def _reference(x_nchw, weight, gamma, beta, running_mean, running_var,
               *, kernel_size, stride=1, eps=1e-5):
    pad = kernel_size // 2
    y = jax.lax.conv_general_dilated(
        x_nchw.astype(jnp.float32), weight.astype(jnp.float32),
        window_strides=(stride, stride),
        padding=((pad, pad), (pad, pad)),
        dimension_numbers=("NCHW", "OIHW", "NCHW"))
    s = (gamma / jnp.sqrt(running_var + eps)).reshape(1, -1, 1, 1)
    b = (beta - running_mean * gamma / jnp.sqrt(running_var + eps)).reshape(1, -1, 1, 1)
    y = y * s + b
    return y * jax.nn.sigmoid(y)


if __name__ == "__main__":
    key = jax.random.PRNGKey(0)
    k_x, k_w = jax.random.split(key, 2)

    # Shapes consistent with Conv(in_channels=4, out_channels=8, kernel_size=3)
    N, Cin, H, W = 2, 4, 16, 16
    Cout, K, stride = 8, 3, 1

    x = jax.random.normal(k_x, (N, Cin, H, W), dtype=jnp.float32)

    # Deterministic synthetic parameters (no checkpoint loading).
    fan_in = Cin * K * K
    weight = jax.random.normal(k_w, (Cout, Cin, K, K), dtype=jnp.float32) / jnp.sqrt(fan_in)
    gamma = 1.0 + 0.1 * jnp.arange(Cout, dtype=jnp.float32)
    beta = 0.05 * jnp.arange(Cout, dtype=jnp.float32)
    running_mean = 0.01 * jnp.arange(Cout, dtype=jnp.float32)
    running_var = 1.0 + 0.02 * jnp.arange(Cout, dtype=jnp.float32)

    out = conv_bn_swish(x, weight, gamma, beta, running_mean, running_var,
                        kernel_size=K, stride=stride)
    out = jax.block_until_ready(out)

    ref = _reference(x, weight, gamma, beta, running_mean, running_var,
                     kernel_size=K, stride=stride)
    assert out.shape == (N, Cout, H, W), out.shape
    # bf16 MXU operands + bf16 output + approx reciprocal -> loosened tolerance.
    assert jnp.allclose(out, ref, atol=8e-2, rtol=8e-2), \
        float(jnp.max(jnp.abs(out - ref)))

    print("KERNEL_OK")
</pallas_src>

<mosaic_0001>
module attributes {stable_mosaic.version = 11 : i64} {
  func.func @_direct_conv_kernel(%arg0: i32, %arg1: i32, %arg2: i32, %arg3: memref<1x18x18x4xbf16, #tpu.memory_space<vmem>>, %arg4: memref<3x3x4x128xbf16, #tpu.memory_space<vmem>>, %arg5: memref<1x128xf32, #tpu.memory_space<vmem>>, %arg6: memref<1x16x16x128xbf16, #tpu.memory_space<vmem>>) attributes {dimension_semantics = [#tpu.dimension_semantics<parallel>, #tpu.dimension_semantics<parallel>, #tpu.dimension_semantics<parallel>], iteration_bounds = array<i64: 1, 2, 1>, scalar_prefetch = 0 : i64, scratch_operands = 0 : i64, tpu.core_type = #tpu.core_type<tc>, window_params = [{transform_indices = @transform_0, window_bounds = array<i64: 1, 18, 18, 4>}, {transform_indices = @transform_1, window_bounds = array<i64: 3, 3, 4, 128>}, {transform_indices = @transform_2, window_bounds = array<i64: 1, 128>}, {transform_indices = @transform_3, window_bounds = array<i64: 1, 16, 16, 128>}]} {
    %c16_i32 = arith.constant 16 : i32
    %0 = arith.muli %arg2, %c16_i32 : i32
    %1 = tpu.assume_multiple %0, 16 : i32
    %cst = arith.constant 0.000000e+00 : f32
    %2 = vector.broadcast %cst : f32 to vector<256x128xf32>
    %c0_i32 = arith.constant 0 : i32
    %3 = arith.addi %1, %c0_i32 : i32
    %c0 = arith.constant 0 : index
    %4 = arith.index_cast %3 : i32 to index
    %c0_0 = arith.constant 0 : index
    %c0_1 = arith.constant 0 : index
    %5 = vector.load %arg3[%c0, %4, %c0_0, %c0_1] : memref<1x18x18x4xbf16, #tpu.memory_space<vmem>>, vector<1x16x16x4xbf16>
    %6 = vector.shape_cast %5 : vector<1x16x16x4xbf16> to vector<16x16x4xbf16>
    %7 = vector.shape_cast %6 : vector<16x16x4xbf16> to vector<256x4xbf16>
    %c0_2 = arith.constant 0 : index
    %c0_3 = arith.constant 0 : index
    %c0_4 = arith.constant 0 : index
    %c0_5 = arith.constant 0 : index
    %8 = vector.load %arg4[%c0_2, %c0_3, %c0_4, %c0_5] : memref<3x3x4x128xbf16, #tpu.memory_space<vmem>>, vector<1x1x4x128xbf16>
    %9 = vector.shape_cast %8 : vector<1x1x4x128xbf16> to vector<4x128xbf16>
    %cst_6 = arith.constant dense<0.000000e+00> : vector<256x128xf32>
    %10 = tpu.matmul %7, %9, %cst_6 {dimension_numbers = #tpu.dot_dimension_numbers<[1], [0], [0], [1], [0, 0, 1, 1], [], []>} : vector<256x4xbf16>, vector<4x128xbf16>, vector<256x128xf32> -> vector<256x128xf32>
    %11 = arith.addf %2, %10 : vector<256x128xf32>
    %c0_i32_7 = arith.constant 0 : i32
    %12 = arith.addi %1, %c0_i32_7 : i32
    %c0_8 = arith.constant 0 : index
    %13 = arith.index_cast %12 : i32 to index
    %c1 = arith.constant 1 : index
    %c0_9 = arith.constant 0 : index
    %14 = vector.load %arg3[%c0_8, %13, %c1, %c0_9] : memref<1x18x18x4xbf16, #tpu.memory_space<vmem>>, vector<1x16x16x4xbf16>
    %15 = vector.shape_cast %14 : vector<1x16x16x4xbf16> to vector<16x16x4xbf16>
    %16 = vector.shape_cast %15 : vector<16x16x4xbf16> to vector<256x4xbf16>
    %c0_10 = arith.constant 0 : index
    %c1_11 = arith.constant 1 : index
    %c0_12 = arith.constant 0 : index
    %c0_13 = arith.constant 0 : index
    %17 = vector.load %arg4[%c0_10, %c1_11, %c0_12, %c0_13] : memref<3x3x4x128xbf16, #tpu.memory_space<vmem>>, vector<1x1x4x128xbf16>
    %18 = vector.shape_cast %17 : vector<1x1x4x128xbf16> to vector<4x128xbf16>
    %cst_14 = arith.constant dense<0.000000e+00> : vector<256x128xf32>
    %19 = tpu.matmul %16, %18, %cst_14 {dimension_numbers = #tpu.dot_dimension_numbers<[1], [0], [0], [1], [0, 0, 1, 1], [], []>} : vector<256x4xbf16>, vector<4x128xbf16>, vector<256x128xf32> -> vector<256x128xf32>
    %20 = arith.addf %11, %19 : vector<256x128xf32>
    %c0_i32_15 = arith.constant 0 : i32
    %21 = arith.addi %1, %c0_i32_15 : i32
    %c0_16 = arith.constant 0 : index
    %22 = arith.index_cast %21 : i32 to index
    %c2 = arith.constant 2 : index
    %c0_17 = arith.constant 0 : index
    %23 = vector.load %arg3[%c0_16, %22, %c2, %c0_17] : memref<1x18x18x4xbf16, #tpu.memory_space<vmem>>, vector<1x16x16x4xbf16>
    %24 = vector.shape_cast %23 : vector<1x16x16x4xbf16> to vector<16x16x4xbf16>
    %25 = vector.shape_cast %24 : vector<16x16x4xbf16> to vector<256x4xbf16>
    %c0_18 = arith.constant 0 : index
    %c2_19 = arith.constant 2 : index
    %c0_20 = arith.constant 0 : index
    %c0_21 = arith.constant 0 : index
    %26 = vector.load %arg4[%c0_18, %c2_19, %c0_20, %c0_21] : memref<3x3x4x128xbf16, #tpu.memory_space<vmem>>, vector<1x1x4x128xbf16>
    %27 = vector.shape_cast %26 : vector<1x1x4x128xbf16> to vector<4x128xbf16>
    %cst_22 = arith.constant dense<0.000000e+00> : vector<256x128xf32>
    %28 = tpu.matmul %25, %27, %cst_22 {dimension_numbers = #tpu.dot_dimension_numbers<[1], [0], [0], [1], [0, 0, 1, 1], [], []>} : vector<256x4xbf16>, vector<4x128xbf16>, vector<256x128xf32> -> vector<256x128xf32>
    %29 = arith.addf %20, %28 : vector<256x128xf32>
    %c1_i32 = arith.constant 1 : i32
    %30 = arith.addi %1, %c1_i32 : i32
    %c0_23 = arith.constant 0 : index
    %31 = arith.index_cast %30 : i32 to index
    %c0_24 = arith.constant 0 : index
    %c0_25 = arith.constant 0 : index
    %32 = vector.load %arg3[%c0_23, %31, %c0_24, %c0_25] : memref<1x18x18x4xbf16, #tpu.memory_space<vmem>>, vector<1x16x16x4xbf16>
    %33 = vector.shape_cast %32 : vector<1x16x16x4xbf16> to vector<16x16x4xbf16>
    %34 = vector.shape_cast %33 : vector<16x16x4xbf16> to vector<256x4xbf16>
    %c1_26 = arith.constant 1 : index
    %c0_27 = arith.constant 0 : index
    %c0_28 = arith.constant 0 : index
    %c0_29 = arith.constant 0 : index
    %35 = vector.load %arg4[%c1_26, %c0_27, %c0_28, %c0_29] : memref<3x3x4x128xbf16, #tpu.memory_space<vmem>>, vector<1x1x4x128xbf16>
    %36 = vector.shape_cast %35 : vector<1x1x4x128xbf16> to vector<4x128xbf16>
    %cst_30 = arith.constant dense<0.000000e+00> : vector<256x128xf32>
    %37 = tpu.matmul %34, %36, %cst_30 {dimension_numbers = #tpu.dot_dimension_numbers<[1], [0], [0], [1], [0, 0, 1, 1], [], []>} : vector<256x4xbf16>, vector<4x128xbf16>, vector<256x128xf32> -> vector<256x128xf32>
    %38 = arith.addf %29, %37 : vector<256x128xf32>
    %c1_i32_31 = arith.constant 1 : i32
    %39 = arith.addi %1, %c1_i32_31 : i32
    %c0_32 = arith.constant 0 : index
    %40 = arith.index_cast %39 : i32 to index
    %c1_33 = arith.constant 1 : index
    %c0_34 = arith.constant 0 : index
    %41 = vector.load %arg3[%c0_32, %40, %c1_33, %c0_34] : memref<1x18x18x4xbf16, #tpu.memory_space<vmem>>, vector<1x16x16x4xbf16>
    %42 = vector.shape_cast %41 : vector<1x16x16x4xbf16> to vector<16x16x4xbf16>
    %43 = vector.shape_cast %42 : vector<16x16x4xbf16> to vector<256x4xbf16>
    %c1_35 = arith.constant 1 : index
    %c1_36 = arith.constant 1 : index
    %c0_37 = arith.constant 0 : index
    %c0_38 = arith.constant 0 : index
    %44 = vector.load %arg4[%c1_35, %c1_36, %c0_37, %c0_38] : memref<3x3x4x128xbf16, #tpu.memory_space<vmem>>, vector<1x1x4x128xbf16>
    %45 = vector.shape_cast %44 : vector<1x1x4x128xbf16> to vector<4x128xbf16>
    %cst_39 = arith.constant dense<0.000000e+00> : vector<256x128xf32>
    %46 = tpu.matmul %43, %45, %cst_39 {dimension_numbers = #tpu.dot_dimension_numbers<[1], [0], [0], [1], [0, 0, 1, 1], [], []>} : vector<256x4xbf16>, vector<4x128xbf16>, vector<256x128xf32> -> vector<256x128xf32>
    %47 = arith.addf %38, %46 : vector<256x128xf32>
    %c1_i32_40 = arith.constant 1 : i32
    %48 = arith.addi %1, %c1_i32_40 : i32
    %c0_41 = arith.constant 0 : index
    %49 = arith.index_cast %48 : i32 to index
    %c2_42 = arith.constant 2 : index
    %c0_43 = arith.constant 0 : index
    %50 = vector.load %arg3[%c0_41, %49, %c2_42, %c0_43] : memref<1x18x18x4xbf16, #tpu.memory_space<vmem>>, vector<1x16x16x4xbf16>
    %51 = vector.shape_cast %50 : vector<1x16x16x4xbf16> to vector<16x16x4xbf16>
    %52 = vector.shape_cast %51 : vector<16x16x4xbf16> to vector<256x4xbf16>
    %c1_44 = arith.constant 1 : index
    %c2_45 = arith.constant 2 : index
    %c0_46 = arith.constant 0 : index
    %c0_47 = arith.constant 0 : index
    %53 = vector.load %arg4[%c1_44, %c2_45, %c0_46, %c0_47] : memref<3x3x4x128xbf16, #tpu.memory_space<vmem>>, vector<1x1x4x128xbf16>
    %54 = vector.shape_cast %53 : vector<1x1x4x128xbf16> to vector<4x128xbf16>
    %cst_48 = arith.constant dense<0.000000e+00> : vector<256x128xf32>
    %55 = tpu.matmul %52, %54, %cst_48 {dimension_numbers = #tpu.dot_dimension_numbers<[1], [0], [0], [1], [0, 0, 1, 1], [], []>} : vector<256x4xbf16>, vector<4x128xbf16>, vector<256x128xf32> -> vector<256x128xf32>
    %56 = arith.addf %47, %55 : vector<256x128xf32>
    %c2_i32 = arith.constant 2 : i32
    %57 = arith.addi %1, %c2_i32 : i32
    %c0_49 = arith.constant 0 : index
    %58 = arith.index_cast %57 : i32 to index
    %c0_50 = arith.constant 0 : index
    %c0_51 = arith.constant 0 : index
    %59 = vector.load %arg3[%c0_49, %58, %c0_50, %c0_51] : memref<1x18x18x4xbf16, #tpu.memory_space<vmem>>, vector<1x16x16x4xbf16>
    %60 = vector.shape_cast %59 : vector<1x16x16x4xbf16> to vector<16x16x4xbf16>
    %61 = vector.shape_cast %60 : vector<16x16x4xbf16> to vector<256x4xbf16>
    %c2_52 = arith.constant 2 : index
    %c0_53 = arith.constant 0 : index
    %c0_54 = arith.constant 0 : index
    %c0_55 = arith.constant 0 : index
    %62 = vector.load %arg4[%c2_52, %c0_53, %c0_54, %c0_55] : memref<3x3x4x128xbf16, #tpu.memory_space<vmem>>, vector<1x1x4x128xbf16>
    %63 = vector.shape_cast %62 : vector<1x1x4x128xbf16> to vector<4x128xbf16>
    %cst_56 = arith.constant dense<0.000000e+00> : vector<256x128xf32>
    %64 = tpu.matmul %61, %63, %cst_56 {dimension_numbers = #tpu.dot_dimension_numbers<[1], [0], [0], [1], [0, 0, 1, 1], [], []>} : vector<256x4xbf16>, vector<4x128xbf16>, vector<256x128xf32> -> vector<256x128xf32>
    %65 = arith.addf %56, %64 : vector<256x128xf32>
    %c2_i32_57 = arith.constant 2 : i32
    %66 = arith.addi %1, %c2_i32_57 : i32
    %c0_58 = arith.constant 0 : index
    %67 = arith.index_cast %66 : i32 to index
    %c1_59 = arith.constant 1 : index
    %c0_60 = arith.constant 0 : index
    %68 = vector.load %arg3[%c0_58, %67, %c1_59, %c0_60] : memref<1x18x18x4xbf16, #tpu.memory_space<vmem>>, vector<1x16x16x4xbf16>
    %69 = vector.shape_cast %68 : vector<1x16x16x4xbf16> to vector<16x16x4xbf16>
    %70 = vector.shape_cast %69 : vector<16x16x4xbf16> to vector<256x4xbf16>
    %c2_61 = arith.constant 2 : index
    %c1_62 = arith.constant 1 : index
    %c0_63 = arith.constant 0 : index
    %c0_64 = arith.constant 0 : index
    %71 = vector.load %arg4[%c2_61, %c1_62, %c0_63, %c0_64] : memref<3x3x4x128xbf16, #tpu.memory_space<vmem>>, vector<1x1x4x128xbf16>
    %72 = vector.shape_cast %71 : vector<1x1x4x128xbf16> to vector<4x128xbf16>
    %cst_65 = arith.constant dense<0.000000e+00> : vector<256x128xf32>
    %73 = tpu.matmul %70, %72, %cst_65 {dimension_numbers = #tpu.dot_dimension_numbers<[1], [0], [0], [1], [0, 0, 1, 1], [], []>} : vector<256x4xbf16>, vector<4x128xbf16>, vector<256x128xf32> -> vector<256x128xf32>
    %74 = arith.addf %65, %73 : vector<256x128xf32>
    %c2_i32_66 = arith.constant 2 : i32
    %75 = arith.addi %1, %c2_i32_66 : i32
    %c0_67 = arith.constant 0 : index
    %76 = arith.index_cast %75 : i32 to index
    %c2_68 = arith.constant 2 : index
    %c0_69 = arith.constant 0 : index
    %77 = vector.load %arg3[%c0_67, %76, %c2_68, %c0_69] : memref<1x18x18x4xbf16, #tpu.memory_space<vmem>>, vector<1x16x16x4xbf16>
    %78 = vector.shape_cast %77 : vector<1x16x16x4xbf16> to vector<16x16x4xbf16>
    %79 = vector.shape_cast %78 : vector<16x16x4xbf16> to vector<256x4xbf16>
    %c2_70 = arith.constant 2 : index
    %c2_71 = arith.constant 2 : index
    %c0_72 = arith.constant 0 : index
    %c0_73 = arith.constant 0 : index
    %80 = vector.load %arg4[%c2_70, %c2_71, %c0_72, %c0_73] : memref<3x3x4x128xbf16, #tpu.memory_space<vmem>>, vector<1x1x4x128xbf16>
    %81 = vector.shape_cast %80 : vector<1x1x4x128xbf16> to vector<4x128xbf16>
    %cst_74 = arith.constant dense<0.000000e+00> : vector<256x128xf32>
    %82 = tpu.matmul %79, %81, %cst_74 {dimension_numbers = #tpu.dot_dimension_numbers<[1], [0], [0], [1], [0, 0, 1, 1], [], []>} : vector<256x4xbf16>, vector<4x128xbf16>, vector<256x128xf32> -> vector<256x128xf32>
    %83 = arith.addf %74, %82 : vector<256x128xf32>
    %c0_75 = arith.constant 0 : index
    %c0_76 = arith.constant 0 : index
    %84 = vector.load %arg5[%c0_75, %c0_76] : memref<1x128xf32, #tpu.memory_space<vmem>>, vector<1x128xf32>
    %85 = vector.broadcast %84 : vector<1x128xf32> to vector<256x128xf32>
    %86 = arith.addf %83, %85 : vector<256x128xf32>
    %87 = math.absf %86 : vector<256x128xf32>
    %cst_77 = arith.constant 0.000000e+00 : f32
    %88 = vector.broadcast %cst_77 : f32 to vector<256x128xf32>
    %89 = arith.subf %88, %87 : vector<256x128xf32>
    %90 = math.exp %89 : vector<256x128xf32>
    %cst_78 = arith.constant 1.000000e+00 : f32
    %91 = vector.broadcast %cst_78 : f32 to vector<256x128xf32>
    %92 = arith.addf %91, %90 : vector<256x128xf32>
    %93 = tpu.reciprocal %92 {approx = true} : vector<256x128xf32> -> vector<256x128xf32>
    %cst_79 = arith.constant 0.000000e+00 : f32
    %94 = vector.broadcast %cst_79 : f32 to vector<256x128xf32>
    %95 = arith.cmpf oge, %86, %94 : vector<256x128xf32>
    %cst_80 = arith.constant 1.000000e+00 : f32
    %96 = vector.broadcast %cst_80 : f32 to vector<256x128xf32>
    %97 = arith.subf %96, %93 : vector<256x128xf32>
    %98 = arith.select %95, %93, %97 : vector<256x128xi1>, vector<256x128xf32>
    %99 = arith.mulf %86, %98 : vector<256x128xf32>
    %100 = vector.shape_cast %99 : vector<256x128xf32> to vector<1x16x16x128xf32>
    %101 = arith.truncf %100 : vector<1x16x16x128xf32> to vector<1x16x16x128xbf16>
    %c0_81 = arith.constant 0 : index
    %c0_82 = arith.constant 0 : index
    %c0_83 = arith.constant 0 : index
    %c0_84 = arith.constant 0 : index
    %102 = vector.load %arg6[%c0_81, %c0_82, %c0_83, %c0_84] : memref<1x16x16x128xbf16, #tpu.memory_space<vmem>>, vector<1x16x16x128xbf16>
    tpu.vector_store %arg6[%c0_81, %c0_82, %c0_83, %c0_84], %101 {strides = array<i32>} : memref<1x16x16x128xbf16, #tpu.memory_space<vmem>>, vector<1x16x16x128xbf16>,
    return
  }
  func.func @transform_0(%arg0: i32, %arg1: i32, %arg2: i32) -> (i32, i32, i32, i32) {
    %c0_i32 = arith.constant 0 : i32
    %c0_i32_0 = arith.constant 0 : i32
    %c0_i32_1 = arith.constant 0 : i32
    %c0_i32_2 = arith.constant 0 : i32
    return %arg1, %c0_i32, %c0_i32_0, %c0_i32_1 : i32, i32, i32, i32
  }
  func.func @transform_1(%arg0: i32, %arg1: i32, %arg2: i32) -> (i32, i32, i32, i32) {
    %c0_i32 = arith.constant 0 : i32
    %c0_i32_0 = arith.constant 0 : i32
    %c0_i32_1 = arith.constant 0 : i32
    %c0_i32_2 = arith.constant 0 : i32
    return %c0_i32, %c0_i32_0, %c0_i32_1, %arg0 : i32, i32, i32, i32
  }
  func.func @transform_2(%arg0: i32, %arg1: i32, %arg2: i32) -> (i32, i32) {
    %c0_i32 = arith.constant 0 : i32
    %c0_i32_0 = arith.constant 0 : i32
    return %c0_i32, %arg0 : i32, i32
  }
  func.func @transform_3(%arg0: i32, %arg1: i32, %arg2: i32) -> (i32, i32, i32, i32) {
    %c0_i32 = arith.constant 0 : i32
    %c0_i32_0 = arith.constant 0 : i32
    return %arg1, %arg2, %c0_i32, %arg0 : i32, i32, i32, i32
  }
}

</mosaic_0001>

<bundles_post_ra>
// kernel: conv_bn_swish.1
= control target key start
LH: loop header
LB: loop body
LE: loop exit
PB: predicated region body
PF: predicated region fallthrough
CT: control target
= control target key end

     0   :  { %s7206_s12 = smov 0   ;;  %s7208_s13 = smov 0   ;;  %s9286_s0 = inlined_call_operand.vmem [shape: bf16[2,18,18,4], index: 0, kind: input, shape index: {}]   ;;  %s9287_s1 = inlined_call_operand.vmem [shape: bf16[3,3,4,128], index: 1, kind: input, shape index: {}]   ;;  %s9288_s2 = inlined_call_operand.vmem [shape: f32[1,128], index: 2, kind: input, shape index: {}]   ;;  %s9289_s3 = inlined_call_operand.vmem [shape: bf16[2,16,16,128], index: 3, kind: output, shape index: {}]  }
   0x1   :  { %s7210_s14 = smov 0  }
   0x2 LB: > { %s28_s15 = sadd.s32 1, %s7180_s13  ;;  %p5474_p0 = scmp.ge.s32.totalorder %s7184_s14, 1  ;;  %s7184_s14 = sphi %s7210_s14, %s13_s14   ;;  %s7180_s13 = sphi %s7208_s13, %s9358_s13   ;;  %s7176_s12 = sphi %s7206_s12, %s9357_s12  }
   0x3   : > { %p30_p1 = scmp.ge.s32.totalorder %s28_s15, 2  ;;  %p177_p2 = scmp.lt.s32.totalorder %s7184_s14, 3 }
   0x5   : > { %s9360_s15 = smov (%p30_p1, %s28_s15), 0  ;;  %p178_p3 = pnand %p5474_p0, %p177_p2 }
   0x7   : > { %181 = sbr.rel (%p178_p3) target bundleno = 650 (0x28a), region = 32 }
   0xe   : > { %v5478_v0 = vld [vmem:[%s9287_s1 + $0x2] sm:$0x3]  ;;  %vm782_vm0 = vcmask 1041408   ;;  %v5705_v1 = vld [vmem:[%s9287_s1 + $0x8] sm:$0x3]  ;;  %p216_p4 = scmp.lt.s32.totalorder %s7176_s12, 1 }
   0xf   : > { %6894 = vmatprep.subr.msk.bf16.mxu1 %vm782_vm0, %v5478_v0  ;;  %6898 = vmatprep.subr.msk.bf16.mxu0 %vm782_vm0, %v5705_v1  ;;  %v784_v2 = vsel %vm782_vm0, %v5478_v0, 0  ;;  %v7234_v3 = vsel %vm782_vm0, %v5705_v1, 0  ;;  %v279_v4 = vld [vmem:[%s9287_s1] sm:$0x3]  ;;  %v5770_v5 = vld [vmem:[%s9287_s1 + $0xa] sm:$0x3] }
  0x10   : > { %9303 = vst [vmem:[#allocation2_spill] sm:$0xff] %v7234_v3  ;;  %6331 = vmatpush3.bf16.msra.mxu1 %v784_v2  ;;  %6467 = vmatpush3.bf16.msra.mxu0 %v7234_v3  ;;  %s9362_s12 = smov (!%p216_p4, %s7176_s12), 1  ;;  %vm296_vm1 = vsmask.f32 3328  ;;  %vm297_vm2 = vsmask.f32 7440 }
  0x11   : > { %6895 = vmatprep.subr.msk.bf16.mxu1 %vm782_vm0, %v279_v4  ;;  %6900 = vmatprep.subr.msk.bf16.mxu0 %vm782_vm0, %v5770_v5  ;;  %s6904_s24 = smul.u32 216, %s9362_s12  ;;  %vm733_vm3 = vcmask 31744   ;;  %v7264_v17 = vsel %vm782_vm0, %v279_v4, 0  ;;  %v7270_v26 = vld [vmem:[%s9287_s1 + $0xc] sm:$0x3]  ;;  %vm7277_vm4 = vmor %vm296_vm1, %vm297_vm2  ;;  %v7283_v37 = vsel %vm782_vm0, %v5770_v5, 0 }
  0x12   : > { %v7287_v41 = vsel %vm782_vm0, %v7270_v26, 0  ;;  %vm1287_vm5 = vcmask 1042432   ;;  %vm1288_vm6 = vcmask 1046532   ;;  %s6049_s21 = sshll.u32 %s9362_s12, 7 }
  0x13   : > { %s7251_s27 = scalar_lea.vmem %s9286_s0, %s6904_s24  ;;  %vm7503_vm7 = vmor %vm1287_vm5, %vm1288_vm6  ;;  %s9045_s23 = scalar_lea.vmem %s9289_s3, %s6049_s21 }
  0x14   : > { %v247_v6 = vld [vmem:[%s7251_s27] sm:$0xf]  ;;  %v248_v7 = vld [vmem:[%s7251_s27 + $0x4] sm:$0xf]  ;;  %v280_v8 = vld [vmem:[%s7251_s27 + $0x8] sm:$0x1] }
  0x15   : > { %v300_v9 = vshrl.u32 %v247_v6, 16  ;;  %v303_v10 = vshll.u32 %v247_v6, 16  ;;  %v309_v11 = vshll.u32 %v248_v7, 16  ;;  %v313_v12 = vshrl.u32 %v248_v7, 16  ;;  %v5657_v13 = vld [vmem:[%s7251_s27 + $0xc] sm:$0xf] }
  0x16   : > { %v319_v14 = vshll.u32 %v280_v8, 16  ;;  %v7258_v15 = vld [vmem:[%s7251_s27 + $0x10] sm:$0xf]  ;;  %v7261_v16 = vld [vmem:[%s7251_s27 + $0x14] sm:$0x1]  ;;  %v2107_v23 = vshrl.u32 %v5657_v13, 16 }
  0x17   : > { %v302_v18 = vrot.slane %v300_v9, 4  ;;  %v305_v19 = vrot.slane %v303_v10, 5  ;;  %v311_v20 = vrot.slane %v309_v11, 5  ;;  %v315_v21 = vrot.slane %v313_v12, 4  ;;  %v249_v31 = vld [vmem:[%s7251_s27 + $0xc] sm:$0xf] }
  0x18   : > { %v321_v22 = vrot.slane %v319_v14, 5  ;;  %v2110_v24 = vshll.u32 %v5657_v13, 16  ;;  %v2116_v25 = vshll.u32 %v7258_v15, 16  ;;  %v2120_v29 = vshrl.u32 %v7258_v15, 16  ;;  %v250_v36 = vld [vmem:[%s7251_s27 + $0x10] sm:$0xf] }
  0x19   : > { %v306_v27 = vor.u32 %v305_v19, %v302_v18  ;;  %v316_v28 = vor.u32 %v315_v21, %v311_v20  ;;  %v2126_v30 = vshll.u32 %v7261_v16, 16  ;;  %v2109_v33 = vrot.slane %v2107_v23, 4  ;;  %v281_v44 = vld [vmem:[%s7251_s27 + $0x14] sm:$0x1]  ;;  %v5660_v55 = vld [vmem:[%s7251_s27 + $0x18] sm:$0xf] }
  0x1a   : > { %v2112_v34 = vrot.slane %v2110_v24, 5  ;;  %v2118_v35 = vrot.slane %v2116_v25, 5  ;;  %v2122_v40 = vrot.slane %v2120_v29, 4  ;;  %v324_v45 = vshrl.u32 %v249_v31, 16  ;;  %v7296_v60 = vld [vmem:[%s7251_s27 + $0x1c] sm:$0xf] }
  0x1b   : > { %v307_v38 = vrot.slane %v306_v27, 4  ;;  %v317_v39 = vrot.slane %v316_v28, 4  ;;  %v2128_v43 = vrot.slane %v2126_v30, 5  ;;  %v327_v46 = vshll.u32 %v249_v31, 16  ;;  %v7304_v1 = vld [vmem:[%s7251_s27 + $0x20] sm:$0x1] }
  0x1c   : > { %v2113_v42 = vor.u32 %v2112_v34, %v2109_v33  ;;  %v2123_v49 = vor.u32 %v2122_v40, %v2118_v35  ;;  %v333_v50 = vshll.u32 %v250_v36, 16  ;;  %v326_v53 = vrot.slane %v324_v45, 4  ;;  %v251_v18 = vld [vmem:[%s7251_s27 + $0x18] sm:$0xf]  ;;  %v252_v23 = vld [vmem:[%s7251_s27 + $0x1c] sm:$0xf] }
  0x1d   : > { %v312_v47 = vsel %vm7277_vm4, %v307_v38, %v311_v20  ;;  %v322_v48 = vsel %vm7277_vm4, %v317_v39, %v321_v22  ;;  %v329_v54 = vrot.slane %v327_v46, 5  ;;  %v337_v58 = vshrl.u32 %v250_v36, 16  ;;  %v282_v31 = vld [vmem:[%s7251_s27 + $0x20] sm:$0x1]  ;;  %v5663_v40 = vld [vmem:[%s7251_s27 + $0x24] sm:$0xf] }
  0x1e   : > { %v5479_v51 = vcombine.low %v312_v47, %v322_v48  ;;  %v2114_v52 = vrot.slane %v2113_v42, 4  ;;  %v2124_v56 = vrot.slane %v2123_v49, 4  ;;  %v335_v57 = vrot.slane %v333_v50, 5  ;;  %v7327_v46 = vld [vmem:[%s7251_s27 + $0x28] sm:$0xf] }
  0x1f   : > { %v343_v59 = vshll.u32 %v281_v44, 16  ;;  %v2850_v62 = vrot.slane %v7258_v15, 5  ;;  %v2853_v63 = vrot.slane %v7261_v16, 5  ;;  %v330_v0 = vor.u32 %v329_v54, %v326_v53  ;;  %v7336_v54 = vld [vmem:[%s7251_s27 + $0x2c] sm:$0x1] }
  0x20   : > { %6332 = vmatprep.mubr.msk.bf16.mxu1 %vm733_vm3, %v5479_v51  ;;  %v2119_v61 = vsel %vm7277_vm4, %v2114_v52, %v2118_v35  ;;  %v2129_v2 = vsel %vm7277_vm4, %v2124_v56, %v2128_v43  ;;  %v339_v4 = vrot.slane %v337_v58, 4  ;;  %v2131_v6 = vshrl.u32 %v5660_v55, 16  ;;  %v5559_v51 = vld [vmem:[%s9287_s1 + $0x4] sm:$0x3]  ;;  %v7536_v16 = vld [vmem:[%s7251_s27 + $0x7c] sm:$0xf] }
  0x21   : > { %v345_v5 = vrot.slane %v343_v59, 5  ;;  %v5706_v7 = vcombine.low %v2119_v61, %v2129_v2  ;;  %v331_v8 = vrot.slane %v330_v0, 4  ;;  %v2134_v9 = vshll.u32 %v5660_v55, 16  ;;  %v253_v0 = vld [vmem:[%s7251_s27 + $0x24] sm:$0xf] }
  0x22   : > { %v2140_v10 = vshll.u32 %v7296_v60, 16  ;;  %v340_v11 = vor.u32 %v339_v4, %v335_v57  ;;  %v2133_v12 = vrot.slane %v2131_v6, 4  ;;  %v2144_v13 = vshrl.u32 %v7296_v60, 16 }
  0x23   : > { %v2150_v14 = vshll.u32 %v7304_v1, 16  ;;  %6468 = vmatprep.mubr.msk.bf16.mxu0 %vm733_vm3, %v5706_v7  ;;  %v336_v19 = vsel %vm7277_vm4, %v331_v8, %v335_v57  ;;  %v2136_v20 = vrot.slane %v2134_v9, 5  ;;  %v2857_v22 = vrot.slane %v7296_v60, 5  ;;  %v254_v7 = vld [vmem:[%s7251_s27 + $0x28] sm:$0xf] }
  0x24   : > { %v2142_v21 = vrot.slane %v2140_v10, 5  ;;  %v341_v24 = vrot.slane %v340_v11, 4  ;;  %v2146_v25 = vrot.slane %v2144_v13, 4  ;;  %v2860_v28 = vrot.slane %v7304_v1, 5  ;;  %v283_v13 = vld [vmem:[%s7251_s27 + $0x2c] sm:$0x1] }
  0x25   : > { %v2152_v27 = vrot.slane %v2150_v14, 5  ;;  %v2137_v29 = vor.u32 %v2136_v20, %v2133_v12  ;;  %v7320_v30 = vrot.slane %v2857_v22, 4  ;;  %v348_v33 = vshrl.u32 %v251_v18, 16 }
  0x26   : > { %v351_v34 = vshll.u32 %v251_v18, 16  ;;  %v346_v35 = vsel %vm7277_vm4, %v341_v24, %v345_v5  ;;  %v2147_v36 = vor.u32 %v2146_v25, %v2142_v21  ;;  %v357_v38 = vshll.u32 %v252_v23, 16  ;;  %v5666_v24 = vld [vmem:[%s7251_s27 + $0x30] sm:$0xf] }
  0x27   : > { %v361_v39 = vshrl.u32 %v252_v23, 16  ;;  %v5480_v42 = vcombine.low %v336_v19, %v346_v35  ;;  %v2138_v43 = vrot.slane %v2137_v29, 4  ;;  %v350_v44 = vrot.slane %v348_v33, 4  ;;  %v7356_v33 = vld [vmem:[%s7251_s27 + $0x34] sm:$0xf] }
  0x28   : > { %v353_v45 = vrot.slane %v351_v34, 5  ;;  %v2148_v47 = vrot.slane %v2147_v36, 4  ;;  %v359_v48 = vrot.slane %v357_v38, 5  ;;  %v367_v50 = vshll.u32 %v282_v31, 16 }
  0x29   : > { %v363_v49 = vrot.slane %v361_v39, 4  ;;  %6333 = vmatmul.mubr.msk.bf16.vlgmr.msra.gmra.mrb[0].mxu1 %vm733_vm3, %v5480_v42  ;;  %v2143_v52 = vsel %vm7277_vm4, %v2138_v43, %v2142_v21  ;;  %v2155_v55 = vshrl.u32 %v5663_v40, 16  ;;  %v2158_v56 = vshll.u32 %v5663_v40, 16  ;;  %v7364_v40 = vld [vmem:[%s7251_s27 + $0x38] sm:$0x1] }
  0x2a   : > { %v354_v53 = vor.u32 %v353_v45, %v350_v44  ;;  %6365 = vmatpush3.bf16.msra.mxu1 %v7264_v17  ;;  %v2153_v57 = vsel %vm7277_vm4, %v2148_v47, %v2152_v27  ;;  %v369_v59 = vrot.slane %v367_v50, 5  ;;  %v2164_v61 = vshll.u32 %v7327_v46, 16 }
  0x2b   : > { %v364_v58 = vor.u32 %v363_v49, %v359_v48  ;;  %v5707_v2 = vcombine.low %v2143_v52, %v2153_v57  ;;  %v2157_v5 = vrot.slane %v2155_v55, 4  ;;  %v2160_v6 = vrot.slane %v2158_v56, 5  ;;  %6896 = vmatprep.subr.msk.bf16.mxu1 %vm782_vm0, %v5559_v51  ;;  %v255_v52 = vld [vmem:[%s7251_s27 + $0x30] sm:$0xf] }
  0x2c   : > { %v355_v4 = vrot.slane %v354_v53, 4  ;;  %v2166_v9 = vrot.slane %v2164_v61, 5  ;;  %v2168_v17 = vshrl.u32 %v7327_v46, 16  ;;  %v2174_v10 = vshll.u32 %v7336_v54, 16 }
  0x2d   : > { %v365_v8 = vrot.slane %v364_v58, 4  ;;  %6469 = vmatmul.mubr.msk.bf16.vlgmr.msra.gmra.mrb[0].mxu0 %vm733_vm3, %v5707_v2  ;;  %v2161_v12 = vor.u32 %v2160_v6, %v2157_v5  ;;  %v372_v14 = vshrl.u32 %v253_v0, 16  ;;  %v375_v18 = vshll.u32 %v253_v0, 16  ;;  %v256_v58 = vld [vmem:[%s7251_s27 + $0x34] sm:$0xf] }
  0x2e   : > { %v360_v11 = vsel %vm7277_vm4, %v355_v4, %v359_v48  ;;  %6501 = vmatpush3.bf16.msra.mxu0 %v7283_v37  ;;  %v2170_v20 = vrot.slane %v2168_v17, 4  ;;  %v2176_v21 = vrot.slane %v2174_v10, 5  ;;  %v381_v23 = vshll.u32 %v254_v7, 16  ;;  %v284_v4 = vld [vmem:[%s7251_s27 + $0x38] sm:$0x1] }
  0x2f   : > { %v370_v19 = vsel %vm7277_vm4, %v365_v8, %v369_v59  ;;  %v2162_v27 = vrot.slane %v2161_v12, 4  ;;  %v374_v29 = vrot.slane %v372_v14, 4  ;;  %v377_v31 = vrot.slane %v375_v18, 5  ;;  %6901 = vmatprep.subr.msk.bf16.mxu0 %vm782_vm0, %v7270_v26  ;;  %v5669_v12 = vld [vmem:[%s7251_s27 + $0x3c] sm:$0xf] }
  0x30   : > { %v5481_v25 = vcombine.low %v360_v11, %v370_v19  ;;  %v2171_v34 = vor.u32 %v2170_v20, %v2166_v9  ;;  %v383_v35 = vrot.slane %v381_v23, 5  ;;  %v385_v37 = vshrl.u32 %v254_v7, 16  ;;  %v7381_v20 = vld [vmem:[%s7251_s27 + $0x40] sm:$0xf] }
  0x31   : > { %v391_v36 = vshll.u32 %v283_v13, 16  ;;  %v2167_v38 = vsel %vm7277_vm4, %v2162_v27, %v2166_v9  ;;  %v378_v39 = vor.u32 %v377_v31, %v374_v29  ;;  %v2179_v42 = vshrl.u32 %v5666_v24, 16 }
  0x32   : > { %6336 = vmatprep.mubr.msk.bf16.mxu1 %vm733_vm3, %v5481_v25  ;;  %v2182_v43 = vshll.u32 %v5666_v24, 16  ;;  %v2172_v44 = vrot.slane %v2171_v34, 4  ;;  %v387_v45 = vrot.slane %v385_v37, 4  ;;  %v2188_v26 = vshll.u32 %v7356_v33, 16  ;;  %v7386_v34 = vld [vmem:[%s7251_s27 + $0x44] sm:$0x1] }
  0x33   : > { %v393_v47 = vrot.slane %v391_v36, 5  ;;  %v379_v48 = vrot.slane %v378_v39, 4  ;;  %v2181_v49 = vrot.slane %v2179_v42, 4  ;;  %v2192_v51 = vshrl.u32 %v7356_v33, 16  ;;  %v257_v42 = vld [vmem:[%s7251_s27 + $0x3c] sm:$0xf] }
  0x34   : > { %v2184_v50 = vrot.slane %v2182_v43, 5  ;;  %v2177_v53 = vsel %vm7277_vm4, %v2172_v44, %v2176_v21  ;;  %v388_v55 = vor.u32 %v387_v45, %v383_v35  ;;  %v2190_v56 = vrot.slane %v2188_v26, 5  ;;  %v258_v26 = vld [vmem:[%s7251_s27 + $0x40] sm:$0xf] }
  0x35   : > { %v2198_v57 = vshll.u32 %v7364_v40, 16  ;;  %v5708_v59 = vcombine.low %v2167_v38, %v2177_v53  ;;  %v384_v61 = vsel %vm7277_vm4, %v379_v48, %v383_v35  ;;  %v2194_v2 = vrot.slane %v2192_v51, 4 }
  0x36   : > { %v2185_v0 = vor.u32 %v2184_v50, %v2181_v49  ;;  %v389_v5 = vrot.slane %v388_v55, 4  ;;  %v396_v7 = vshrl.u32 %v255_v52, 16  ;;  %v399_v8 = vshll.u32 %v255_v52, 16 }
  0x37   : > { %v2200_v6 = vrot.slane %v2198_v57, 5  ;;  %6472 = vmatprep.mubr.msk.bf16.mxu0 %vm733_vm3, %v5708_v59  ;;  %v2195_v17 = vor.u32 %v2194_v2, %v2190_v56  ;;  %v405_v10 = vshll.u32 %v256_v58, 16  ;;  %v409_v11 = vshrl.u32 %v256_v58, 16  ;;  %v5672_v2 = vld [vmem:[%s7251_s27 + $0x48] sm:$0xf] }
  0x38   : > { %v2186_v9 = vrot.slane %v2185_v0, 4  ;;  %v394_v13 = vsel %vm7277_vm4, %v389_v5, %v393_v47  ;;  %v398_v14 = vrot.slane %v396_v7, 4  ;;  %v401_v18 = vrot.slane %v399_v8, 5  ;;  %v7404_v8 = vld [vmem:[%s7251_s27 + $0x4c] sm:$0xf] }
  0x39   : > { %v415_v19 = vshll.u32 %v284_v4, 16  ;;  %v5482_v21 = vcombine.low %v384_v61, %v394_v13  ;;  %v2196_v24 = vrot.slane %v2195_v17, 4  ;;  %v407_v25 = vrot.slane %v405_v10, 5  ;;  %v285_v61 = vld [vmem:[%s7251_s27 + $0x44] sm:$0x1] }
  0x3a   : > { %v2191_v23 = vsel %vm7277_vm4, %v2186_v9, %v2190_v56  ;;  %v402_v27 = vor.u32 %v401_v18, %v398_v14  ;;  %v411_v29 = vrot.slane %v409_v11, 4  ;;  %v2203_v35 = vshrl.u32 %v5669_v12, 16 }
  0x3b   : > { %v417_v31 = vrot.slane %v415_v19, 5  ;;  %6337 = vmatmul.mubr.msk.bf16.gmra.mrb[4].mxu1 %vm733_vm3, %v5482_v21  ;;  %v2201_v37 = vsel %vm7277_vm4, %v2196_v24, %v2200_v6  ;;  %v2206_v36 = vshll.u32 %v5669_v12, 16  ;;  %v2212_v38 = vshll.u32 %v7381_v20, 16 }
  0x3c   : > { %v2216_v39 = vshrl.u32 %v7381_v20, 16  ;;  %v5709_v43 = vcombine.low %v2191_v23, %v2201_v37  ;;  %v403_v44 = vrot.slane %v402_v27, 4  ;;  %v412_v45 = vor.u32 %v411_v29, %v407_v25  ;;  %v7412_v23 = vld [vmem:[%s7251_s27 + $0x50] sm:$0x1]  ;;  %v7416_v27 = vld [vmem:[%s7251_s27 + $0x48] sm:$0xf] }
  0x3d   : > { %v2205_v47 = vrot.slane %v2203_v35, 4  ;;  %v2208_v48 = vrot.slane %v2206_v36, 5  ;;  %v2214_v49 = vrot.slane %v2212_v38, 5  ;;  %v2222_v51 = vshll.u32 %v7386_v34, 16  ;;  %v7419_v36 = vld [vmem:[%s7251_s27 + $0x4c] sm:$0xf] }
  0x3e   : > { %v2218_v50 = vrot.slane %v2216_v39, 4  ;;  %6473 = vmatmul.mubr.msk.bf16.gmra.mrb[4].mxu0 %vm733_vm3, %v5709_v43  ;;  %v408_v52 = vsel %vm7277_vm4, %v403_v44, %v407_v25  ;;  %v413_v53 = vrot.slane %v412_v45, 4  ;;  %v420_v55 = vshrl.u32 %v257_v42, 16 }
  0x3f   : > { %v423_v56 = vshll.u32 %v257_v42, 16  ;;  %v2209_v57 = vor.u32 %v2208_v48, %v2205_v47  ;;  %v2224_v59 = vrot.slane %v2222_v51, 5  ;;  %v429_v0 = vshll.u32 %v258_v26, 16 }
  0x40   : > { %v2219_v58 = vor.u32 %v2218_v50, %v2214_v49  ;;  %v418_v4 = vsel %vm7277_vm4, %v413_v53, %v417_v31  ;;  %v422_v5 = vrot.slane %v420_v55, 4  ;;  %v433_v7 = vshrl.u32 %v258_v26, 16  ;;  %v286_v26 = vld [vmem:[%s7251_s27 + $0x50] sm:$0x1]  ;;  %v5675_v53 = vld [vmem:[%s7251_s27 + $0x54] sm:$0xf] }
  0x41   : > { %v425_v6 = vrot.slane %v423_v56, 5  ;;  %v5483_v9 = vcombine.low %v408_v52, %v418_v4  ;;  %v2210_v17 = vrot.slane %v2209_v57, 4  ;;  %v431_v11 = vrot.slane %v429_v0, 5  ;;  %v7435_v4 = vld [vmem:[%s7251_s27 + $0x58] sm:$0xf] }
  0x42   : > { %v2220_v10 = vrot.slane %v2219_v58, 4  ;;  %v435_v13 = vrot.slane %v433_v7, 4  ;;  %v439_v14 = vshll.u32 %v285_v61, 16  ;;  %v2227_v18 = vshrl.u32 %v5672_v2, 16 }
  0x43   : > { %v426_v12 = vor.u32 %v425_v6, %v422_v5  ;;  %6340 = vmatprep.mubr.msk.bf16.mxu1 %vm733_vm3, %v5483_v9  ;;  %v2215_v19 = vsel %vm7277_vm4, %v2210_v17, %v2214_v49  ;;  %v2230_v24 = vshll.u32 %v5672_v2, 16  ;;  %v2236_v25 = vshll.u32 %v7404_v8, 16 }
  0x44   : > { %v2225_v21 = vsel %vm7277_vm4, %v2220_v10, %v2224_v59  ;;  %v436_v35 = vor.u32 %v435_v13, %v431_v11  ;;  %v441_v37 = vrot.slane %v439_v14, 5  ;;  %v2229_v38 = vrot.slane %v2227_v18, 4 }
  0x45   : > { %v5710_v29 = vcombine.low %v2215_v19, %v2225_v21  ;;  %v427_v31 = vrot.slane %v426_v12, 4  ;;  %v2232_v39 = vrot.slane %v2230_v24, 5  ;;  %v2238_v42 = vrot.slane %v2236_v25, 5  ;;  %v7441_v12 = vld [vmem:[%s7251_s27 + $0x5c] sm:$0x1] }
  0x46   : > { %v2240_v43 = vshrl.u32 %v7404_v8, 16  ;;  %v437_v45 = vrot.slane %v436_v35, 4  ;;  %v2246_v47 = vshll.u32 %v7412_v23, 16  ;;  %v444_v48 = vshrl.u32 %v7416_v27, 16  ;;  %v7445_v24 = vld [vmem:[%s7251_s27 + $0x54] sm:$0xf] }
  0x47   : > { %6476 = vmatprep.mubr.msk.bf16.mxu0 %vm733_vm3, %v5710_v29  ;;  %v432_v44 = vsel %vm7277_vm4, %v427_v31, %v431_v11  ;;  %v2233_v49 = vor.u32 %v2232_v39, %v2229_v38  ;;  %v447_v51 = vshll.u32 %v7416_v27, 16  ;;  %v453_v52 = vshll.u32 %v7419_v36, 16 }
  0x48   : > { %v2242_v50 = vrot.slane %v2240_v43, 4  ;;  %v442_v55 = vsel %vm7277_vm4, %v437_v45, %v441_v37  ;;  %v2248_v56 = vrot.slane %v2246_v47, 5  ;;  %v446_v57 = vrot.slane %v444_v48, 4  ;;  %v7451_v37 = vld [vmem:[%s7251_s27 + $0x58] sm:$0xf] }
  0x49   : > { %v457_v58 = vshrl.u32 %v7419_v36, 16  ;;  %v5484_v59 = vcombine.low %v432_v44, %v442_v55  ;;  %v2234_v61 = vrot.slane %v2233_v49, 4  ;;  %v449_v2 = vrot.slane %v447_v51, 5 }
  0x4a   : > { %v2243_v0 = vor.u32 %v2242_v50, %v2238_v42  ;;  %v455_v5 = vrot.slane %v453_v52, 5  ;;  %v463_v7 = vshll.u32 %v286_v26, 16  ;;  %v2251_v9 = vshrl.u32 %v5675_v53, 16  ;;  %v287_v26 = vld [vmem:[%s7251_s27 + $0x5c] sm:$0x1] }
  0x4b   : > { %v459_v6 = vrot.slane %v457_v58, 4  ;;  %6341 = vmatmul.mubr.msk.bf16.gmra.mrb[8].mxu1 %vm733_vm3, %v5484_v59  ;;  %v2239_v17 = vsel %vm7277_vm4, %v2234_v61, %v2238_v42  ;;  %v450_v11 = vor.u32 %v449_v2, %v446_v57  ;;  %v2254_v13 = vshll.u32 %v5675_v53, 16  ;;  %v5678_v53 = vld [vmem:[%s7251_s27 + $0x60] sm:$0xf]  ;;  %v7465_v59 = vld [vmem:[%s7251_s27 + $0x64] sm:$0xf] }
  0x4c   : > { %v2244_v10 = vrot.slane %v2243_v0, 4  ;;  %v465_v18 = vrot.slane %v463_v7, 5  ;;  %v2253_v19 = vrot.slane %v2251_v9, 4  ;;  %v2260_v21 = vshll.u32 %v7435_v4, 16  ;;  %v7472_v9 = vld [vmem:[%s7251_s27 + $0x68] sm:$0x1] }
  0x4d   : > { %v460_v14 = vor.u32 %v459_v6, %v455_v5  ;;  %v451_v29 = vrot.slane %v450_v11, 4  ;;  %v2256_v31 = vrot.slane %v2254_v13, 5  ;;  %v2264_v35 = vshrl.u32 %v7435_v4, 16 }
  0x4e   : > { %v2249_v25 = vsel %vm7277_vm4, %v2244_v10, %v2248_v56  ;;  %v2262_v42 = vrot.slane %v2260_v21, 5  ;;  %v2270_v43 = vshll.u32 %v7441_v12, 16  ;;  %v468_v48 = vshrl.u32 %v7445_v24, 16 }
  0x4f   : > { %v5711_v38 = vcombine.low %v2239_v17, %v2249_v25  ;;  %v461_v39 = vrot.slane %v460_v14, 4  ;;  %v456_v44 = vsel %vm7277_vm4, %v451_v29, %v455_v5  ;;  %v2257_v45 = vor.u32 %v2256_v31, %v2253_v19  ;;  %v7476_v19 = vld [vmem:[%s7251_s27 + $0x60] sm:$0xf] }
  0x50   : > { %v2266_v47 = vrot.slane %v2264_v35, 4  ;;  %v2272_v50 = vrot.slane %v2270_v43, 5  ;;  %v471_v51 = vshll.u32 %v7445_v24, 16  ;;  %v477_v52 = vshll.u32 %v7451_v37, 16  ;;  %v7482_v35 = vld [vmem:[%s7251_s27 + $0x64] sm:$0xf] }
  0x51   : > { %6477 = vmatmul.mubr.msk.bf16.gmra.mrb[8].mxu0 %vm733_vm3, %v5711_v38  ;;  %v466_v49 = vsel %vm7277_vm4, %v461_v39, %v465_v18  ;;  %v2258_v56 = vrot.slane %v2257_v45, 4  ;;  %v470_v58 = vrot.slane %v468_v48, 4  ;;  %v481_v2 = vshrl.u32 %v7451_v37, 16 }
  0x52   : > { %v5485_v55 = vcombine.low %v456_v44, %v466_v49  ;;  %v2267_v57 = vor.u32 %v2266_v47, %v2262_v42  ;;  %v473_v61 = vrot.slane %v471_v51, 5  ;;  %v479_v0 = vrot.slane %v477_v52, 5 }
  0x53   : > { %v487_v5 = vshll.u32 %v287_v26, 16  ;;  %v2263_v6 = vsel %vm7277_vm4, %v2258_v56, %v2262_v42  ;;  %v2275_v17 = vshrl.u32 %v5678_v53, 16  ;;  %v2278_v10 = vshll.u32 %v5678_v53, 16 }
  0x54   : > { %6344 = vmatprep.mubr.msk.bf16.mxu1 %vm733_vm3, %v5485_v55  ;;  %v2268_v7 = vrot.slane %v2267_v57, 4  ;;  %v474_v11 = vor.u32 %v473_v61, %v470_v58  ;;  %v483_v13 = vrot.slane %v481_v2, 4  ;;  %v2284_v18 = vshll.u32 %v7465_v59, 16  ;;  %v5738_v58 = vld [vmem:[%s7251_s27 + $0xc] sm:$0xe] }
  0x55   : > { %v489_v14 = vrot.slane %v487_v5, 5  ;;  %v2277_v25 = vrot.slane %v2275_v17, 4  ;;  %v2280_v29 = vrot.slane %v2278_v10, 5  ;;  %v2288_v31 = vshrl.u32 %v7465_v59, 16 }
  0x56   : > { %v2273_v21 = vsel %vm7277_vm4, %v2268_v7, %v2272_v50  ;;  %v475_v39 = vrot.slane %v474_v11, 4  ;;  %v484_v42 = vor.u32 %v483_v13, %v479_v0  ;;  %v2286_v43 = vrot.slane %v2284_v18, 5  ;;  %v288_v50 = vld [vmem:[%s7251_s27 + $0x68] sm:$0x1] }
  0x57   : > { %v5712_v38 = vcombine.low %v2263_v6, %v2273_v21  ;;  %v2281_v44 = vor.u32 %v2280_v29, %v2277_v25  ;;  %v2290_v45 = vrot.slane %v2288_v31, 4  ;;  %v2294_v47 = vshll.u32 %v7472_v9, 16  ;;  %v7510_v29 = vld [vmem:[%s7251_s27 + $0x70] sm:$0xf] }
  0x58   : > { %v492_v26 = vshrl.u32 %v7476_v19, 16  ;;  %v480_v48 = vsel %vm7277_vm4, %v475_v39, %v479_v0  ;;  %v485_v49 = vrot.slane %v484_v42, 4  ;;  %v495_v51 = vshll.u32 %v7476_v19, 16  ;;  %v7497_v0 = vld [vmem:[%s7251_s27 + $0x6c] sm:$0xf] }
  0x59   : > { %6480 = vmatprep.mubr.msk.bf16.mxu0 %vm733_vm3, %v5712_v38  ;;  %v501_v52 = vshll.u32 %v7482_v35, 16  ;;  %v2282_v53 = vrot.slane %v2281_v44, 4  ;;  %v2291_v55 = vor.u32 %v2290_v45, %v2286_v43  ;;  %v2296_v56 = vrot.slane %v2294_v47, 5 }
  0x5a   : > { %v494_v57 = vrot.slane %v492_v26, 4  ;;  %v490_v61 = vsel %vm7277_vm4, %v485_v49, %v489_v14  ;;  %v497_v2 = vrot.slane %v495_v51, 5  ;;  %v505_v6 = vshrl.u32 %v7482_v35, 16  ;;  %v289_v26 = vld [vmem:[%s7251_s27 + $0x74] sm:$0x1] }
  0x5b   : > { %v503_v5 = vrot.slane %v501_v52, 5  ;;  %v5486_v7 = vcombine.low %v480_v48, %v490_v61  ;;  %v2287_v17 = vsel %vm7277_vm4, %v2282_v53, %v2286_v43  ;;  %v2292_v10 = vrot.slane %v2291_v55, 4  ;;  %v5739_v48 = vld [vmem:[%s7251_s27 + $0x18] sm:$0xe] }
  0x5c   : > { %v511_v11 = vshll.u32 %v288_v50, 16  ;;  %v498_v14 = vor.u32 %v497_v2, %v494_v57  ;;  %v507_v18 = vrot.slane %v505_v6, 4  ;;  %v5754_v21 = vrot.slane %v5738_v58, 9  ;;  %v7529_v53 = vld [vmem:[%s7251_s27 + $0x78] sm:$0xf] }
  0x5d   : > { %v2852_v25 = vrot.slane %v2850_v62, 4  ;;  %6345 = vmatmul.mubr.msk.bf16.gmra.mrb[12].mxu1 %vm733_vm3, %v5486_v7  ;;  %v2297_v31 = vsel %vm7277_vm4, %v2292_v10, %v2296_v56  ;;  %v516_v39 = vshrl.u32 %v7497_v0, 16  ;;  %v519_v42 = vshll.u32 %v7497_v0, 16  ;;  %v290_v57 = vld [vmem:[%s7251_s27 + $0x80] sm:$0x1] }
  0x5e   : > { %v513_v38 = vrot.slane %v511_v11, 5  ;;  %v5713_v43 = vcombine.low %v2287_v17, %v2297_v31  ;;  %v499_v44 = vrot.slane %v498_v14, 4  ;;  %v508_v45 = vor.u32 %v507_v18, %v503_v5  ;;  %v5740_v10 = vld [vmem:[%s7251_s27 + $0x24] sm:$0xe] }
  0x5f   : > { %v2851_v47 = vsel %vm7503_vm7, %v5754_v21, %v2850_v62  ;;  %v2854_v49 = vsel %vm7503_vm7, %v2852_v25, %v2853_v63  ;;  %v518_v50 = vrot.slane %v516_v39, 4  ;;  %v521_v51 = vrot.slane %v519_v42, 5  ;;  %v7555_v39 = vld [vmem:[%s7251_s27 + $0x84] sm:$0xf] }
  0x60   : > { %v525_v52 = vshll.u32 %v7510_v29, 16  ;;  %6481 = vmatmul.mubr.msk.bf16.gmra.mrb[12].mxu0 %vm733_vm3, %v5713_v43  ;;  %v504_v15 = vsel %vm7277_vm4, %v499_v44, %v503_v5  ;;  %v509_v62 = vrot.slane %v508_v45, 4  ;;  %v5771_v55 = vcombine.low %v2851_v47, %v2854_v49  ;;  %v7563_v43 = vld [vmem:[%s7251_s27 + $0x88] sm:$0xf] }
  0x61   : > { %v529_v56 = vshrl.u32 %v7510_v29, 16  ;;  %v522_v63 = vor.u32 %v521_v51, %v518_v50  ;;  %v535_v61 = vshll.u32 %v289_v26, 16  ;;  %v5755_v2 = vrot.slane %v5739_v48, 9 }
  0x62   : > { %v527_v58 = vrot.slane %v525_v52, 5  ;;  %v514_v6 = vsel %vm7277_vm4, %v509_v62, %v513_v38  ;;  %6502 = vmatprep.mubr.msk.bf16.mxu0 %vm733_vm3, %v5771_v55  ;;  %v2861_v5 = vsel %vm7503_vm7, %v7320_v30, %v2860_v28  ;;  %v540_v17 = vshrl.u32 %v7529_v53, 16  ;;  %v291_v52 = vld [vmem:[%s7251_s27 + $0x8c] sm:$0x1] }
  0x63   : > { %v531_v7 = vrot.slane %v529_v56, 4  ;;  %v5487_v11 = vcombine.low %v504_v15, %v514_v6  ;;  %v523_v14 = vrot.slane %v522_v63, 4  ;;  %v537_v18 = vrot.slane %v535_v61, 5 }
  0x64   : > { %v2858_v21 = vsel %vm7503_vm7, %v5755_v2, %v2857_v22  ;;  %v542_v38 = vrot.slane %v540_v17, 4  ;;  %v543_v1 = vshll.u32 %v7529_v53, 16  ;;  %v549_v30 = vshll.u32 %v7536_v16, 16  ;;  %v7568_v22 = vld [vmem:[%s9287_s1 + $0xe] sm:$0x3] }
  0x65   : > { %v532_v25 = vor.u32 %v531_v7, %v527_v58  ;;  %v5772_v31 = vcombine.low %v2858_v21, %v2861_v5  ;;  %6348 = vmatprep.mubr.msk.bf16.mxu1 %vm733_vm3, %v5487_v11  ;;  %v528_v28 = vsel %vm7277_vm4, %v523_v14, %v527_v58  ;;  %v553_v60 = vshrl.u32 %v7536_v16, 16  ;;  %v7587_v5 = vld [vmem:[%s7251_s27 + $0x90] sm:$0xf] }
  0x66   : > { %v559_v42 = vshll.u32 %v290_v57, 16  ;;  %v545_v45 = vrot.slane %v543_v1, 5  ;;  %v5756_v47 = vrot.slane %v5740_v10, 9  ;;  %v2864_v26 = vrot.slane %v7327_v46, 5  ;;  %v5741_v57 = vld [vmem:[%s7251_s27 + $0x30] sm:$0xe] }
  0x67   : > { %v533_v44 = vrot.slane %v532_v25, 4  ;;  %v551_v48 = vrot.slane %v549_v30, 5  ;;  %v555_v49 = vrot.slane %v553_v60, 4  ;;  %v2867_v51 = vrot.slane %v7336_v54, 5  ;;  %v7599_v30 = vld [vmem:[%s7251_s27 + $0x94] sm:$0xf] }
  0x68   : > { %v561_v50 = vrot.slane %v559_v42, 5  ;;  %6503 = vmatmul.mubr.msk.bf16.vlgmr.msra.gmra.mrb[0].mxu0 %vm733_vm3, %v5772_v31  ;;  %v546_v62 = vor.u32 %v545_v45, %v542_v38  ;;  %v2865_v55 = vsel %vm7503_vm7, %v5756_v47, %v2864_v26  ;;  %v2866_v56 = vrot.slane %v2864_v26, 4  ;;  %v292_v60 = vld [vmem:[%s7251_s27 + $0x98] sm:$0x1]  ;;  %v5742_v26 = vld [vmem:[%s7251_s27 + $0x3c] sm:$0xe] }
  0x69   : > { %v538_v15 = vsel %vm7277_vm4, %v533_v44, %v537_v18  ;;  %6535 = vmatpush3.bf16.msra.mxu0 %v7287_v41  ;;  %v556_v46 = vor.u32 %v555_v49, %v551_v48  ;;  %v564_v58 = vshrl.u32 %v7555_v39, 16  ;;  %v567_v54 = vshll.u32 %v7555_v39, 16 }
  0x6a   : > { %v5488_v63 = vcombine.low %v528_v28, %v538_v15  ;;  %v547_v61 = vrot.slane %v546_v62, 4  ;;  %v2868_v2 = vsel %vm7503_vm7, %v2866_v56, %v2867_v51  ;;  %v573_v6 = vshll.u32 %v7563_v43, 16  ;;  %6902 = vmatprep.subr.msk.bf16.mxu0 %vm782_vm0, %v7568_v22 }
  0x6b   : > { %v577_v7 = vshrl.u32 %v7563_v43, 16  ;;  %v557_v41 = vrot.slane %v556_v46, 4  ;;  %v5773_v17 = vcombine.low %v2865_v55, %v2868_v2  ;;  %v566_v10 = vrot.slane %v564_v58, 4  ;;  %v7619_v46 = vld [vmem:[%s7251_s27 + $0xa0] sm:$0xf] }
  0x6c   : > { %6349 = vmatmul.mubr.msk.bf16.gmra.mrb[16].mxu1 %vm733_vm3, %v5488_v63  ;;  %v569_v11 = vrot.slane %v567_v54, 5  ;;  %v552_v14 = vsel %vm7277_vm4, %v547_v61, %v551_v48  ;;  %v575_v18 = vrot.slane %v573_v6, 5  ;;  %v583_v25 = vshll.u32 %v291_v52, 16  ;;  %v7608_v52 = vld [vmem:[%s7251_s27 + $0x9c] sm:$0xf] }
  0x6d   : > { %v579_v21 = vrot.slane %v577_v7, 4  ;;  %v562_v31 = vsel %vm7277_vm4, %v557_v41, %v561_v50  ;;  %6506 = vmatprep.mubr.msk.bf16.mxu0 %vm733_vm3, %v5773_v17  ;;  %v5757_v1 = vrot.slane %v5741_v57, 9  ;;  %v2871_v28 = vrot.slane %v7356_v33, 5 }
  0x6e   : > { %v570_v38 = vor.u32 %v569_v11, %v566_v10  ;;  %v5489_v42 = vcombine.low %v552_v14, %v562_v31  ;;  %v585_v45 = vrot.slane %v583_v25, 5  ;;  %v2874_v47 = vrot.slane %v7364_v40, 5  ;;  %v293_v10 = vld [vmem:[%s7251_s27 + $0xa4] sm:$0x1]  ;;  %v5743_v11 = vld [vmem:[%s7251_s27 + $0x48] sm:$0xe] }
  0x6f   : > { %v580_v44 = vor.u32 %v579_v21, %v575_v18  ;;  %v2872_v49 = vsel %vm7503_vm7, %v5757_v1, %v2871_v28  ;;  %v2873_v50 = vrot.slane %v2871_v28, 4  ;;  %v588_v51 = vshrl.u32 %v7587_v5, 16 }
  0x70   : > { %v571_v48 = vrot.slane %v570_v38, 4  ;;  %6352 = vmatprep.mubr.msk.bf16.mxu1 %vm733_vm3, %v5489_v42  ;;  %v591_v15 = vshll.u32 %v7587_v5, 16  ;;  %v597_v62 = vshll.u32 %v7599_v30, 16  ;;  %v601_v40 = vshrl.u32 %v7599_v30, 16 }
  0x71   : > { %v581_v33 = vrot.slane %v580_v44, 4  ;;  %v2875_v56 = vsel %vm7503_vm7, %v2873_v50, %v2874_v47  ;;  %v590_v57 = vrot.slane %v588_v51, 4  ;;  %v607_v63 = vshll.u32 %v292_v60, 16 }
  0x72   : > { %v576_v55 = vsel %vm7277_vm4, %v571_v48, %v575_v18  ;;  %v5774_v54 = vcombine.low %v2872_v49, %v2875_v56  ;;  %v593_v61 = vrot.slane %v591_v15, 5  ;;  %v599_v2 = vrot.slane %v597_v62, 5  ;;  %v7645_v56 = vld [vmem:[%s7251_s27 + $0xac] sm:$0xf] }
  0x73   : > { %v586_v58 = vsel %vm7277_vm4, %v581_v33, %v585_v45  ;;  %v603_v7 = vrot.slane %v601_v40, 4  ;;  %v609_v41 = vrot.slane %v607_v63, 5  ;;  %v5758_v17 = vrot.slane %v5742_v26, 9  ;;  %v7640_v33 = vld [vmem:[%s7251_s27 + $0xa8] sm:$0xf] }
  0x74   : > { %v5490_v6 = vcombine.low %v576_v55, %v586_v58  ;;  %6507 = vmatmul.mubr.msk.bf16.gmra.mrb[4].mxu0 %vm733_vm3, %v5774_v54  ;;  %v594_v14 = vor.u32 %v593_v61, %v590_v57  ;;  %v2878_v18 = vrot.slane %v7381_v20, 5  ;;  %v2881_v21 = vrot.slane %v7386_v34, 5  ;;  %v294_v61 = vld [vmem:[%s7251_s27 + $0xb0] sm:$0x1] }
  0x75   : > { %v612_v25 = vshrl.u32 %v7608_v52, 16  ;;  %v604_v31 = vor.u32 %v603_v7, %v599_v2  ;;  %v615_v38 = vshll.u32 %v7608_v52, 16  ;;  %v621_v1 = vshll.u32 %v7619_v46, 16 }
  0x76   : > { %6353 = vmatmul.mubr.msk.bf16.gmra.mrb[20].mxu1 %vm733_vm3, %v5490_v6  ;;  %v625_v28 = vshrl.u32 %v7619_v46, 16  ;;  %v595_v60 = vrot.slane %v594_v14, 4  ;;  %v2879_v42 = vsel %vm7503_vm7, %v5758_v17, %v2878_v18  ;;  %v2880_v20 = vrot.slane %v2878_v18, 4  ;;  %v7660_v14 = vld [vmem:[%s7251_s27 + $0xb4] sm:$0xf] }
  0x77   : > { %v614_v44 = vrot.slane %v612_v25, 4  ;;  %v605_v34 = vrot.slane %v604_v31, 4  ;;  %v617_v45 = vrot.slane %v615_v38, 5  ;;  %v623_v47 = vrot.slane %v621_v1, 5 }
  0x78   : > { %v627_v26 = vrot.slane %v625_v28, 4  ;;  %v600_v48 = vsel %vm7277_vm4, %v595_v60, %v599_v2  ;;  %v2882_v49 = vsel %vm7503_vm7, %v2880_v20, %v2881_v21  ;;  %v631_v50 = vshll.u32 %v293_v10, 16  ;;  %v5744_v2 = vld [vmem:[%s7251_s27 + $0x54] sm:$0xe] }
  0x79   : > { %v5759_v51 = vrot.slane %v5743_v11, 9  ;;  %v610_v15 = vsel %vm7277_vm4, %v605_v34, %v609_v41  ;;  %v5775_v62 = vcombine.low %v2879_v42, %v2882_v49  ;;  %v618_v40 = vor.u32 %v617_v45, %v614_v44  ;;  %v7669_v42 = vld [vmem:[%s7251_s27 + $0xb8] sm:$0xf]  ;;  %v295_v49 = vld [vmem:[%s7251_s27 + $0xbc] sm:$0x1] }
  0x7a   : > { %v628_v55 = vor.u32 %v627_v26, %v623_v47  ;;  %v5491_v57 = vcombine.low %v600_v48, %v610_v15  ;;  %v633_v63 = vrot.slane %v631_v50, 5  ;;  %v2885_v58 = vrot.slane %v7404_v8, 5 }
  0x7b   : > { %v2888_v54 = vrot.slane %v7412_v23, 5  ;;  %6510 = vmatprep.mubr.msk.bf16.mxu0 %vm733_vm3, %v5775_v62  ;;  %v619_v6 = vrot.slane %v618_v40, 4  ;;  %v636_v41 = vshrl.u32 %v7640_v33, 16  ;;  %v639_v17 = vshll.u32 %v7640_v33, 16 }
  0x7c   : > { %v629_v7 = vrot.slane %v628_v55, 4  ;;  %6356 = vmatprep.mubr.msk.bf16.mxu1 %vm733_vm3, %v5491_v57  ;;  %v2886_v10 = vsel %vm7503_vm7, %v5759_v51, %v2885_v58  ;;  %v2887_v11 = vrot.slane %v2885_v58, 4  ;;  %v645_v8 = vshll.u32 %v7645_v56, 16  ;;  %v5745_v55 = vld [vmem:[%s7251_s27 + $0x60] sm:$0xe] }
  0x7d   : > { %v649_v23 = vshrl.u32 %v7645_v56, 16  ;;  %v624_v18 = vsel %vm7277_vm4, %v619_v6, %v623_v47  ;;  %v638_v25 = vrot.slane %v636_v41, 4  ;;  %v641_v31 = vrot.slane %v639_v17, 5  ;;  %v5746_v6 = vld [vmem:[%s7251_s27 + $0x6c] sm:$0xe] }
  0x7e   : > { %v634_v21 = vsel %vm7277_vm4, %v629_v7, %v633_v63  ;;  %v2889_v1 = vsel %vm7503_vm7, %v2887_v11, %v2888_v54  ;;  %v647_v28 = vrot.slane %v645_v8, 5  ;;  %v655_v34 = vshll.u32 %v294_v61, 16  ;;  %v5682_v11 = vld [vmem:[%s7251_s27 + $0x70] sm:$0xf]  ;;  %v5683_v8 = vld [vmem:[%s7251_s27 + $0x74] sm:$0x1] }
  0x7f   : > { %v5492_v38 = vcombine.low %v624_v18, %v634_v21  ;;  %v651_v60 = vrot.slane %v649_v23, 4  ;;  %v5776_v20 = vcombine.low %v2886_v10, %v2889_v1  ;;  %v642_v44 = vor.u32 %v641_v31, %v638_v25 }
  0x80   : > { %v5760_v45 = vrot.slane %v5744_v2, 9  ;;  %v2892_v26 = vrot.slane %v7435_v4, 5  ;;  %v2895_v48 = vrot.slane %v7441_v12, 5  ;;  %v660_v50 = vshrl.u32 %v7660_v14, 16 }
  0x81   : > { %6357 = vmatmul.mubr.msk.bf16.gmra.mrb[24].mxu1 %vm733_vm3, %v5492_v38  ;;  %v652_v47 = vor.u32 %v651_v60, %v647_v28  ;;  %6511 = vmatmul.mubr.msk.bf16.gmra.mrb[8].mxu0 %vm733_vm3, %v5776_v20  ;;  %v643_v51 = vrot.slane %v642_v44, 4  ;;  %v657_v15 = vrot.slane %v655_v34, 5  ;;  %v663_v62 = vshll.u32 %v7660_v14, 16 }
  0x82   : > { %v669_v40 = vshll.u32 %v7669_v42, 16  ;;  %v2893_v4 = vsel %vm7503_vm7, %v5760_v45, %v2892_v26  ;;  %v2894_v12 = vrot.slane %v2892_v26, 4  ;;  %v662_v63 = vrot.slane %v660_v50, 4 }
  0x83   : > { %v653_v57 = vrot.slane %v652_v47, 4  ;;  %v648_v58 = vsel %vm7277_vm4, %v643_v51, %v647_v28  ;;  %v665_v54 = vrot.slane %v663_v62, 5  ;;  %v673_v2 = vshrl.u32 %v7669_v42, 16  ;;  %v5747_v47 = vld [vmem:[%s7251_s27 + $0x78] sm:$0xe] }
  0x84   : > { %v671_v61 = vrot.slane %v669_v40, 5  ;;  %v2896_v41 = vsel %vm7503_vm7, %v2894_v12, %v2895_v48  ;;  %v679_v17 = vshll.u32 %v295_v49, 16  ;;  %v5761_v10 = vrot.slane %v5745_v55, 9  ;;  %v7105_v51 = vld [vmem:[%s7251_s27] sm:$0xf] }
  0x85   : > { %v658_v7 = vsel %vm7277_vm4, %v653_v57, %v657_v15  ;;  %v5777_v18 = vcombine.low %v2893_v4, %v2896_v41  ;;  %v666_v21 = vor.u32 %v665_v54, %v662_v63  ;;  %v675_v25 = vrot.slane %v673_v2, 4  ;;  %v7707_v15 = vld [vmem:[%s7251_s27 + $0x4] sm:$0xf]  ;;  %v7711_v40 = vld [vmem:[%s7251_s27 + $0x7c] sm:$0xf] }
  0x86   : > { %v5493_v23 = vcombine.low %v648_v58, %v658_v7  ;;  %v681_v31 = vrot.slane %v679_v17, 5  ;;  %v2899_v38 = vrot.slane %v7465_v59, 5  ;;  %v2902_v1 = vrot.slane %v7472_v9, 5  ;;  %v7714_v55 = vld [vmem:[%s7251_s27 + $0x80] sm:$0x1] }
  0x87   : > { %v5762_v28 = vrot.slane %v5746_v6, 9  ;;  %6514 = vmatprep.mubr.msk.bf16.mxu0 %vm733_vm3, %v5777_v18  ;;  %v667_v60 = vrot.slane %v666_v21, 4  ;;  %v676_v20 = vor.u32 %v675_v25, %v671_v61  ;;  %v2906_v44 = vrot.slane %v5682_v11, 5  ;;  %v5688_v57 = vld [vmem:[%s7251_s27 + $0x88] sm:$0xf] }
  0x88   : > { %6360 = vmatprep.mubr.msk.bf16.mxu1 %vm733_vm3, %v5493_v23  ;;  %v2909_v34 = vrot.slane %v5683_v8, 5  ;;  %v2900_v45 = vsel %vm7503_vm7, %v5761_v10, %v2899_v38  ;;  %v2901_v59 = vrot.slane %v2899_v38, 4  ;;  %v5511_v62 = vcombine.low %v7105_v51, %v7707_v15  ;;  %v5689_v54 = vld [vmem:[%s7251_s27 + $0x8c] sm:$0x1]  ;;  %v5691_v17 = vld [vmem:[%s7251_s27 + $0x94] sm:$0xf] }
  0x89   : > { %v672_v9 = vsel %vm7277_vm4, %v667_v60, %v671_v61  ;;  %v677_v26 = vrot.slane %v676_v20, 4  ;;  %v2907_v48 = vsel %vm7503_vm7, %v5762_v28, %v2906_v44  ;;  %v2908_v49 = vrot.slane %v2906_v44, 4  ;;  %v5748_v61 = vld [vmem:[%s7251_s27 + $0x84] sm:$0xe]  ;;  %v5749_v23 = vld [vmem:[%s7251_s27 + $0x90] sm:$0xe] }
  0x8a   : > { %v2903_v50 = vsel %vm7503_vm7, %v2901_v59, %v2902_v1  ;;  %v5763_v58 = vrot.slane %v5747_v47, 9  ;;  %v2913_v7 = vrot.slane %v7711_v40, 5  ;;  %v2916_v41 = vrot.slane %v7714_v55, 5  ;;  %v5692_v25 = vld [vmem:[%s7251_s27 + $0x98] sm:$0x1] }
  0x8b   : > { %v682_v4 = vsel %vm7277_vm4, %v677_v26, %v681_v31  ;;  %v5778_v12 = vcombine.low %v2900_v45, %v2903_v50  ;;  %v2910_v63 = vsel %vm7503_vm7, %v2908_v49, %v2909_v34  ;;  %v5764_v10 = vrot.slane %v5748_v61, 9  ;;  %v5694_v31 = vld [vmem:[%s7251_s27 + $0xa0] sm:$0xf]  ;;  %v5695_v60 = vld [vmem:[%s7251_s27 + $0xa4] sm:$0x1] }
  0x8c   : > { %v5494_v2 = vcombine.low %v672_v9, %v682_v4  ;;  %v5779_v6 = vcombine.low %v2907_v48, %v2910_v63  ;;  %v2920_v11 = vrot.slane %v5688_v57, 5  ;;  %v2923_v8 = vrot.slane %v5689_v54, 5  ;;  %v5750_v20 = vld [vmem:[%s7251_s27 + $0x9c] sm:$0xe]  ;;  %v7107_v44 = vld [vmem:[%s7251_s27 + $0xc] sm:$0xf] }
  0x8d   : > { %6515 = vmatmul.mubr.msk.bf16.gmra.mrb[12].mxu0 %vm733_vm3, %v5778_v12  ;;  %v2914_v18 = vsel %vm7503_vm7, %v5763_v58, %v2913_v7  ;;  %v2915_v21 = vrot.slane %v2913_v7, 4  ;;  %v2927_v28 = vrot.slane %v5691_v17, 5  ;;  %v7741_v34 = vld [vmem:[%s7251_s27 + $0x10] sm:$0xf]  ;;  %v7109_v47 = vld [vmem:[%s7251_s27 + $0x18] sm:$0xf] }
  0x8e   : > { %6361 = vmatmul.mubr.msk.bf16.gmra.mrb[28].mxu1 %vm733_vm3, %v5494_v2  ;;  %6518 = vmatprep.mubr.msk.bf16.mxu0 %vm733_vm3, %v5779_v6  ;;  %v2921_v38 = vsel %vm7503_vm7, %v5764_v10, %v2920_v11  ;;  %v2922_v1 = vrot.slane %v2920_v11, 4  ;;  %v5512_v45 = vcombine.low %v7107_v44, %v7741_v34  ;;  %v7748_v9 = vld [vmem:[%s7251_s27 + $0x1c] sm:$0xf]  ;;  %v5765_v48 = vrot.slane %v5749_v23, 9  ;;  %v5697_v57 = vld [vmem:[%s7251_s27 + $0xac] sm:$0xf] }
  0x8f   : > { %6366 = vmatprep.mubr.msk.bf16.mxu1 %vm733_vm3, %v5511_v62  ;;  %v2917_v59 = vsel %vm7503_vm7, %v2915_v21, %v2916_v41  ;;  %v5513_v26 = vcombine.low %v7109_v47, %v7748_v9  ;;  %v2929_v51 = vrot.slane %v2927_v28, 4  ;;  %v2930_v62 = vrot.slane %v5692_v25, 5  ;;  %v7111_v54 = vld [vmem:[%s9287_s1 + $0x4] sm:$0x3]  ;;  %v5700_v2 = vld [vmem:[%s7251_s27 + $0xb8] sm:$0xf] }
  0x90   : > { %v5780_v49 = vcombine.low %v2914_v18, %v2917_v59  ;;  %v2924_v50 = vsel %vm7503_vm7, %v2922_v1, %v2923_v8  ;;  %v5766_v12 = vrot.slane %v5750_v20, 9  ;;  %v2934_v63 = vrot.slane %v5694_v31, 5  ;;  %v7763_v7 = vld [vmem:[%s9287_s1 + $0x6] sm:$0x3]  ;;  %v5698_v10 = vld [vmem:[%s7251_s27 + $0xb0] sm:$0x1] }
  0x91   : > { %v5781_v4 = vcombine.low %v2921_v38, %v2924_v50  ;;  %v2937_v58 = vrot.slane %v5695_v60, 5  ;;  %v1501_v61 = vsel %vm782_vm0, %v7111_v54, 0  ;;  %v2928_v41 = vsel %vm7503_vm7, %v5765_v48, %v2927_v28  ;;  %v5751_v11 = vld [vmem:[%s7251_s27 + $0xa8] sm:$0xe]  ;;  %v5701_v25 = vld [vmem:[%s7251_s27 + $0xbc] sm:$0x1] }
  0x92   : > { %v2936_v6 = vrot.slane %v2934_v63, 4  ;;  %v2931_v17 = vsel %vm7503_vm7, %v2929_v51, %v2930_v62  ;;  %v2941_v8 = vrot.slane %v5697_v57, 5  ;;  %v2935_v23 = vsel %vm7503_vm7, %v5766_v12, %v2934_v63  ;;  %v5752_v31 = vld [vmem:[%s7251_s27 + $0xb4] sm:$0xe]  ;;  %v7112_v38 = vld [vmem:[%s7251_s27 + $0x24] sm:$0xf] }
  0x93   : > { %v2948_v21 = vrot.slane %v5700_v2, 5  ;;  %v7784_v1 = vld [vmem:[%s7251_s27 + $0x28] sm:$0xf]  ;;  %v5782_v60 = vcombine.low %v2928_v41, %v2931_v17  ;;  %v5767_v44 = vrot.slane %v5751_v11, 9  ;;  %v2944_v59 = vrot.slane %v5698_v10, 5 }
  0x94   : > { %v2938_v18 = vsel %vm7503_vm7, %v2936_v6, %v2937_v58  ;;  %v5514_v28 = vcombine.low %v7112_v38, %v7784_v1  ;;  %v7114_v47 = vld [vmem:[%s7251_s27 + $0x30] sm:$0xf]  ;;  %v2951_v51 = vrot.slane %v5701_v25, 5  ;;  %v5703_v62 = vld [vmem:[%s7251_s27 + $0xc4] sm:$0xf]  ;;  %v2336_v25 = vshrl.u32 %v7711_v40, 16 }
  0x95   : > { %6519 = vmatmul.mubr.msk.bf16.gmra.mrb[16].mxu0 %vm733_vm3, %v5780_v49  ;;  %v5783_v20 = vcombine.low %v2935_v23, %v2938_v18  ;;  %v5768_v49 = vrot.slane %v5752_v31, 9  ;;  %v2950_v50 = vrot.slane %v2948_v21, 4  ;;  %v2942_v57 = vsel %vm7503_vm7, %v5767_v44, %v2941_v8  ;;  %v5753_v12 = vld [vmem:[%s7251_s27 + $0xc0] sm:$0xe]  ;;  %v7116_v41 = vld [vmem:[%s7251_s27 + $0x3c] sm:$0xf] }
  0x96   : > { %6367 = vmatmul.mubr.msk.bf16.vlgmr.msra.gmra.mrb[0].mxu1 %vm733_vm3, %v5512_v45  ;;  %6522 = vmatprep.mubr.msk.bf16.mxu0 %vm733_vm3, %v5781_v4  ;;  %v2943_v45 = vrot.slane %v2941_v8, 4  ;;  %v2955_v63 = vrot.slane %v5703_v62, 5  ;;  %v5769_v6 = vrot.slane %v5753_v12, 9  ;;  %v7809_v17 = vld [vmem:[%s7251_s27 + $0x40] sm:$0xf]  ;;  %v5517_v18 = vcombine.low %v7416_v27, %v7419_v36  ;;  %v6940_v62 = vld [vmem:[%s7251_s27 + $0x24] sm:$0xff]  }
  0x97   : > { %6399 = vmatpush3.bf16.msra.mxu1 %v1501_v61  ;;  %6370 = vmatprep.mubr.msk.bf16.mxu1 %vm733_vm3, %v5513_v26  ;;  %v7789_v26 = vld [vmem:[%s7251_s27 + $0x34] sm:$0xf]  ;;  %v2949_v58 = vsel %vm7503_vm7, %v5768_v49, %v2948_v21  ;;  %v2952_v54 = vsel %vm7503_vm7, %v2950_v50, %v2951_v51  ;;  %v5704_v61 = vld [vmem:[%s7251_s27 + $0xc8] sm:$0x1]  ;;  %v5516_v10 = vcombine.low %v7116_v41, %v7809_v17  ;;  %v2332_v21 = vshll.u32 %v7711_v40, 16 }
  0x98   : > { %6897 = vmatprep.subr.msk.bf16.mxu1 %vm782_vm0, %v7763_v7  ;;  %v5515_v48 = vcombine.low %v7114_v47, %v7789_v26  ;;  %v2945_v4 = vsel %vm7503_vm7, %v2943_v45, %v2944_v59  ;;  %v5785_v11 = vcombine.low %v2949_v58, %v2952_v54  ;;  %v2957_v8 = vrot.slane %v2955_v63, 4  ;;  %v1239_v45 = vld [vmem:[%s7251_s27] sm:$0xe]  ;;  %v1240_v59 = vld [vmem:[%s7251_s27 + $0xc] sm:$0xe] }
  0x99   : > { %v5784_v2 = vcombine.low %v2942_v57, %v2945_v4  ;;  %v2958_v23 = vrot.slane %v5704_v61, 5  ;;  %v2956_v31 = vsel %vm7503_vm7, %v5769_v6, %v2955_v63  ;;  %v7824_v27 = vrot.slane %v2332_v21, 5  ;;  %v1243_v41 = vld [vmem:[%s7251_s27 + $0x30] sm:$0xe] }
  0x9a   : > { %v2338_v36 = vrot.slane %v2336_v25, 4  ;;  %v5519_v44 = vcombine.low %v7476_v19, %v7482_v35  ;;  %v2342_v47 = vshll.u32 %v7714_v55, 16  ;;  %v5543_v19 = vrot.slane %v1239_v45, 9 }
  0x9b   : > { %v2959_v38 = vsel %vm7503_vm7, %v2957_v8, %v2958_v23  ;;  %9308 = vst [vmem:[#allocation3_spill] sm:$0xff] %v7824_v27  ;;  %v5544_v35 = vrot.slane %v1240_v59, 9  ;;  %v1306_v4 = vrot.slane %v7748_v9, 5  ;;  %v1313_v12 = vrot.slane %v7784_v1, 5  ;;  %v1244_v8 = vld [vmem:[%s7251_s27 + $0x3c] sm:$0xe] }
  0x9c   : > { %v5786_v40 = vcombine.low %v2956_v31, %v2959_v38  ;;  %v2339_v49 = vor.u32 %v2338_v36, %v7824_v27  ;;  %v7844_v51 = vrot.slane %v2342_v47, 5  ;;  %v5520_v58 = vcombine.low %v7497_v0, %v7510_v29  ;;  %v1245_v31 = vld [vmem:[%s7251_s27 + $0x48] sm:$0xe]  ;;  %v7122_v59 = vld [vmem:[%s7251_s27 + $0x38] sm:$0x1] }
  0x9d   : > { %6523 = vmatmul.mubr.msk.bf16.gmra.mrb[20].mxu0 %vm733_vm3, %v5782_v60  ;;  %v5518_v60 = vcombine.low %v7445_v24, %v7451_v37  ;;  %v7119_v24 = vld [vmem:[%s7251_s27 + $0x14] sm:$0x1]  ;;  %v4147_v54 = vsel %vm782_vm0, %v7568_v22, 0  ;;  %v5521_v61 = vcombine.low %v7529_v53, %v7536_v16  ;;  %v5522_v6 = vcombine.low %v7555_v39, %v7563_v43  ;;  %v7120_v16 = vld [vmem:[%s7251_s27 + $0x20] sm:$0x1] }
  0x9e   : > { %6371 = vmatmul.mubr.msk.bf16.gmra.mrb[4].mxu1 %vm733_vm3, %v5514_v28  ;;  %6526 = vmatprep.mubr.msk.bf16.mxu0 %vm733_vm3, %v5783_v20  ;;  %v1299_v28 = vrot.slane %v7741_v34, 5  ;;  %v6938_v20 = vld [vmem:[%s7251_s27 + $0x18] sm:$0xff]   ;;  %v7118_v34 = vld [vmem:[%s7251_s27 + $0x8] sm:$0x1]  ;;  %v1302_v37 = vrot.slane %v7119_v24, 5  ;;  %9309 = vst [vmem:[#allocation4_spill] sm:$0xff] %v7844_v51  ;;  %v5523_v9 = vcombine.low %v7587_v5, %v7599_v30 }
  0x9f   : > { %6374 = vmatprep.mubr.msk.bf16.mxu1 %vm733_vm3, %v5515_v48  ;;  %v1292_v48 = vrot.slane %v7707_v15, 5  ;;  %v1295_v50 = vrot.slane %v7118_v34, 5  ;;  %v1241_v15 = vld [vmem:[%s7251_s27 + $0x18] sm:$0xe]  ;;  %v7849_v63 = vrot.slane %v2339_v49, 4  ;;  %v1309_v22 = vrot.slane %v7120_v16, 5 }
  0xa0   : > { %v1301_v55 = vrot.slane %v1299_v28, 4  ;;  %v5545_v1 = vrot.slane %v1241_v15, 9  ;;  %v7871_v29 = vsel %vm7503_vm7, %v5544_v35, %v1299_v28  ;;  %v1315_v25 = vrot.slane %v1313_v12, 4  ;;  %v5868_v24 = vld [vmem:[%s7251_s27 + $0x18] sm:$0xf] }
  0xa1   : > { %v1294_v57 = vrot.slane %v1292_v48, 4  ;;  %9310 = vst [vmem:[#allocation5_spill] sm:$0xff] %v7849_v63  ;;  %v7867_v0 = vsel %vm7503_vm7, %v5543_v19, %v1292_v48  ;;  %v1323_v47 = vrot.slane %v7122_v59, 5  ;;  %v7908_v49 = vsel %vm782_vm0, %v7763_v7, 0  ;;  %v5869_v7 = vld [vmem:[%s7251_s27 + $0x1c] sm:$0xf] }
  0xa2   : > { %v7875_v53 = vsel %vm7503_vm7, %v1301_v55, %v1302_v37  ;;  %v7912_v34 = vsel %vm7503_vm7, %v5545_v1, %v1306_v4  ;;  %v6944_v37 = vld [vmem:[%s7251_s27 + $0x3c] sm:$0xff]   ;;  %v5548_v35 = vrot.slane %v1244_v8, 9  ;;  %v7123_v55 = vld [vmem:[%s7251_s27 + $0x44] sm:$0x1]  ;;  %v3668_v8 = vshll.u32 %v5868_v24, 16 }
  0xa3   : > { %v7886_v23 = vsel %vm7503_vm7, %v1294_v57, %v1295_v50  ;;  %v1246_v50 = vld [vmem:[%s7251_s27 + $0x54] sm:$0xe]  ;;  %v1330_v15 = vrot.slane %v7123_v55, 5  ;;  %v5872_v39 = vld [vmem:[%s7251_s27 + $0x28] sm:$0xf] }
  0xa4   : > { %v7130_v5 = vld [vmem:[%s7251_s27 + $0x70] sm:$0xf] }
  0xa5   : > { %6527 = vmatmul.mubr.msk.bf16.gmra.mrb[24].mxu0 %vm733_vm3, %v5784_v2  ;;  %v1242_v2 = vld [vmem:[%s7251_s27 + $0x24] sm:$0xe]  ;;  %v1355_v30 = vrot.slane %v7130_v5, 5 }
  0xa6   : > { %6375 = vmatmul.mubr.msk.bf16.gmra.mrb[8].mxu1 %vm733_vm3, %v5516_v10  ;;  %6530 = vmatprep.mubr.msk.bf16.mxu0 %vm733_vm3, %v5785_v11  ;;  %v1320_v10 = vrot.slane %v7789_v26, 5  ;;  %v6942_v11 = vld [vmem:[%s7251_s27 + $0x30] sm:$0xff]   ;;  %v5546_v21 = vrot.slane %v1242_v2, 9 }
  0xa7   : > { %6378 = vmatprep.mubr.msk.bf16.mxu1 %vm733_vm3, %v5517_v18  ;;  %v7882_v26 = vld [vmem:[%s9287_s1 + $0x10] sm:$0x3]  ;;  %v1308_v18 = vrot.slane %v1306_v4, 4  ;;  %v1357_v48 = vrot.slane %v1355_v30, 4 }
  0xa8   : > { %v1322_v45 = vrot.slane %v1320_v10, 4  ;;  %v7919_v19 = vsel %vm7503_vm7, %v5546_v21, %v1313_v12  ;;  %v3678_v21 = vshrl.u32 %v5869_v7, 16 }
  0xa9   : > { %v7928_v4 = vsel %vm7503_vm7, %v1308_v18, %v1309_v22  ;;  %v3665_v22 = vshrl.u32 %v5868_v24, 16  ;;  %v3674_v18 = vshll.u32 %v5869_v7, 16  ;;  %v5871_v24 = vld [vmem:[%s7251_s27 + $0x24] sm:$0xf] }
  0xaa   : > { %v7941_v1 = vsel %vm7503_vm7, %v1322_v45, %v1323_v47 }
  0xab   : > { %v3667_v43 = vrot.slane %v3665_v22, 4  ;;  %v7983_v7 = vrot.slane %v3674_v18, 5  ;;  %v3692_v22 = vshll.u32 %v5871_v24, 16  ;;  %v3702_v18 = vshrl.u32 %v5872_v39, 16 }
  0xad   : > { %6531 = vmatmul.mubr.msk.bf16.gmra.mrb[28].mxu0 %vm733_vm3, %v5786_v40  ;;  %v7121_v40 = vld [vmem:[%s7251_s27 + $0x2c] sm:$0x1]  ;;  %v3694_v27 = vrot.slane %v3692_v22, 5 }
  0xae   : > { %6379 = vmatmul.mubr.msk.bf16.gmra.mrb[12].mxu1 %vm733_vm3, %v5518_v60  ;;  %6536 = vmatprep.mubr.msk.bf16.mxu0 %vm733_vm3, %v6938_v20  ;;  %v1316_v28 = vrot.slane %v7121_v40, 5  ;;  %v1327_v60 = vrot.slane %v7809_v17, 5  ;;  %v7126_v40 = vld [vmem:[%s7251_s27 + $0x50] sm:$0x1]  ;;  %v7131_v17 = vld [vmem:[%s7251_s27 + $0x74] sm:$0x1] }
  0xaf   : > { %6382 = vmatprep.mubr.msk.bf16.mxu1 %vm733_vm3, %v5519_v44  ;;  %v5547_v44 = vrot.slane %v1243_v41, 9  ;;  %v5550_v41 = vrot.slane %v1246_v50, 9  ;;  %v1247_v50 = vld [vmem:[%s7251_s27 + $0x60] sm:$0xe]  ;;  %v5873_v20 = vld [vmem:[%s7251_s27 + $0x2c] sm:$0x1] }
  0xb0   : > { %v1329_v12 = vrot.slane %v1327_v60, 4  ;;  %v7954_v45 = vsel %vm7503_vm7, %v5548_v35, %v1327_v60  ;;  %v7127_v35 = vld [vmem:[%s7251_s27 + $0x5c] sm:$0x1] }
  0xb1   : > { %v7937_v2 = vsel %vm7503_vm7, %v5547_v44, %v1320_v10  ;;  %v1344_v55 = vrot.slane %v7127_v35, 5  ;;  %v1248_v35 = vld [vmem:[%s7251_s27 + $0x6c] sm:$0xe] }
  0xb2   : > { %v7958_v59 = vsel %vm7503_vm7, %v1329_v12, %v1330_v15  ;;  %v7128_v15 = vld [vmem:[%s7251_s27 + $0x64] sm:$0xf]  ;;  %v3680_v12 = vrot.slane %v3678_v21, 4  ;;  %v5552_v5 = vrot.slane %v1248_v35, 9 }
  0xb3   : > { %v6950_v21 = vld [vmem:[%s7251_s27 + $0x60] sm:$0xff]  }
  0xb5   : > { %6537 = vmatmul.mubr.msk.bf16.vlgmr.msra.gmra.mrb[0].mxu0 %vm733_vm3, %v6940_v62  ;;  %v7124_v62 = vld [vmem:[%s7251_s27 + $0x4c] sm:$0xf] }
  0xb6   : > { %6383 = vmatmul.mubr.msk.bf16.gmra.mrb[16].mxu1 %vm733_vm3, %v5520_v58  ;;  %6569 = vmatpush3.bf16.msra.mxu0 %v4147_v54  ;;  %v1334_v57 = vrot.slane %v7124_v62, 5  ;;  %v7932_v58 = vsel %vm7503_vm7, %v1315_v25, %v1316_v28  ;;  %v5549_v54 = vrot.slane %v1245_v31, 9  ;;  %v1337_v28 = vrot.slane %v7126_v40, 5 }
  0xb7   : > { %6386 = vmatprep.mubr.msk.bf16.mxu1 %vm733_vm3, %v5521_v61  ;;  %6540 = vmatprep.mubr.msk.bf16.mxu0 %vm733_vm3, %v6942_v11  ;;  %v6946_v61 = vld [vmem:[%s7251_s27 + $0x48] sm:$0xff]   ;;  %v7125_v11 = vld [vmem:[%s7251_s27 + $0x58] sm:$0xf]  ;;  %v1348_v62 = vrot.slane %v7128_v15, 5  ;;  %v5875_v15 = vld [vmem:[%s7251_s27 + $0x34] sm:$0xf] }
  0xb8   : > { %6903 = vmatprep.subr.msk.bf16.mxu0 %vm782_vm0, %v7882_v26  ;;  %v1341_v16 = vrot.slane %v7125_v11, 5  ;;  %v1336_v31 = vrot.slane %v1334_v57, 4  ;;  %v7962_v47 = vsel %vm7503_vm7, %v5549_v54, %v1334_v57  ;;  %v5870_v57 = vld [vmem:[%s7251_s27 + $0x20] sm:$0x1]  ;;  %v5874_v54 = vld [vmem:[%s7251_s27 + $0x30] sm:$0xf] }
  0xb9   : > { %v5551_v11 = vrot.slane %v1247_v50, 9  ;;  %v3716_v50 = vshll.u32 %v5874_v54, 16  ;;  %v3684_v25 = vshll.u32 %v5870_v57, 16  ;;  %v3722_v36 = vshll.u32 %v5875_v15, 16 }
  0xba   : > { %v7973_v60 = vsel %vm7503_vm7, %v5550_v41, %v1341_v16  ;;  %v7989_v41 = vsel %vm7503_vm7, %v1336_v31, %v1337_v28  ;;  %v1350_v31 = vrot.slane %v1348_v62, 4  ;;  %v3713_v28 = vshrl.u32 %v5874_v54, 16 }
  0xbb   : > { %v8031_v35 = vrot.slane %v3722_v36, 5 }
  0xbd   : > { %6541 = vmatmul.mubr.msk.bf16.gmra.mrb[4].mxu0 %vm733_vm3, %v6944_v37  ;;  %v1343_v37 = vrot.slane %v1341_v16, 4  ;;  %v7129_v16 = vld [vmem:[%s7251_s27 + $0x68] sm:$0x1] }
  0xbe   : > { %6387 = vmatmul.mubr.msk.bf16.gmra.mrb[20].mxu1 %vm733_vm3, %v5522_v6  ;;  %6544 = vmatprep.mubr.msk.bf16.mxu0 %vm733_vm3, %v6946_v61  ;;  %v3670_v6 = vrot.slane %v3668_v8, 5  ;;  %v6948_v61 = vld [vmem:[%s7251_s27 + $0x54] sm:$0xff]   ;;  %v1351_v40 = vrot.slane %v7129_v16, 5  ;;  %v3698_v8 = vshll.u32 %v5872_v39, 16  ;;  %v3681_v16 = vor.u32 %v3680_v12, %v7983_v7 }
  0xbf   : > { %6390 = vmatprep.mubr.msk.bf16.mxu1 %vm733_vm3, %v5523_v9  ;;  %v3689_v9 = vshrl.u32 %v5871_v24, 16  ;;  %v7998_v44 = vsel %vm7503_vm7, %v1343_v37, %v1344_v55  ;;  %v1358_v24 = vrot.slane %v7131_v17, 5  ;;  %v3726_v39 = vshrl.u32 %v5875_v15, 16 }
  0xc0   : > { %v3671_v10 = vor.u32 %v3670_v6, %v3667_v43  ;;  %v8004_v37 = vrot.slane %v3698_v8, 5  ;;  %v3704_v55 = vrot.slane %v3702_v18, 4  ;;  %v9311_v43 = vcombine.low %v7608_v52, %v7619_v46  ;;  %v7132_v8 = vld [vmem:[%s7251_s27 + $0x7c] sm:$0xf]  ;;  %v8040_v18 = vld [vmem:[%s7251_s27 + $0x38] sm:$0x1] }
  0xc1   : > { %v3691_v38 = vrot.slane %v3689_v9, 4  ;;  %v8013_v17 = vsel %vm7503_vm7, %v5551_v11, %v1348_v62  ;;  %v8017_v57 = vsel %vm7503_vm7, %v1350_v31, %v1351_v40  ;;  %v3715_v6 = vrot.slane %v3713_v28, 4  ;;  %9313 = vst [vmem:[#allocation6_spill] sm:$0xff] %v8040_v18 }
  0xc2   : > { %v3718_v12 = vrot.slane %v3716_v50, 5  ;;  %v9312_v52 = vcombine.low %v7640_v33, %v7645_v56  ;;  %v3672_v46 = vrot.slane %v3671_v10, 4  ;;  %v3682_v54 = vrot.slane %v3681_v16, 4  ;;  %v6952_v33 = vld [vmem:[%s7251_s27 + $0x6c] sm:$0xff]   ;;  %v1250_v16 = vld [vmem:[%s7251_s27 + $0x84] sm:$0xe] }
  0xc3   : > { %v3708_v62 = vshll.u32 %v5873_v20, 16  ;;  %v8025_v11 = vsel %vm7503_vm7, %v5552_v5, %v1355_v30  ;;  %v8029_v40 = vsel %vm7503_vm7, %v1357_v48, %v1358_v24  ;;  %v3728_v9 = vrot.slane %v3726_v39, 4  ;;  %v6953_v48 = vld [vmem:[%s7251_s27 + $0x78] sm:$0xff]  }
  0xc4   : > { %v3695_v10 = vor.u32 %v3694_v27, %v3691_v38  ;;  %v3705_v20 = vor.u32 %v3704_v55, %v8004_v37  ;;  %v1362_v30 = vrot.slane %v7132_v8, 5  ;;  %v3719_v38 = vor.u32 %v3718_v12, %v3715_v6  ;;  %v5877_v5 = vld [vmem:[%s7251_s27 + $0x3c] sm:$0xf] }
  0xc5   : > { %6545 = vmatmul.mubr.msk.bf16.gmra.mrb[8].mxu0 %vm733_vm3, %v6948_v61  ;;  %v3686_v61 = vrot.slane %v3684_v25, 5  ;;  %v1249_v25 = vld [vmem:[%s7251_s27 + $0x78] sm:$0xe]  ;;  %v8056_v50 = vrot.slane %v3708_v62, 5  ;;  %v3729_v39 = vor.u32 %v3728_v9, %v8031_v35  ;;  %v3732_v55 = vshll.u32 %v8040_v18, 16 }
  0xc6   : > { %6391 = vmatmul.mubr.msk.bf16.gmra.mrb[24].mxu1 %vm733_vm3, %v9311_v43  ;;  %6548 = vmatprep.mubr.msk.bf16.mxu0 %vm733_vm3, %v6950_v21  ;;  %v3677_v21 = vsel %vm7277_vm4, %v3672_v46, %v7983_v7  ;;  %v5553_v24 = vrot.slane %v1249_v25, 9  ;;  %v7133_v43 = vld [vmem:[%s7251_s27 + $0x88] sm:$0xf]  ;;  %v8064_v7 = vld [vmem:[%s7251_s27 + $0x40] sm:$0xf]  ;;  %v3696_v12 = vrot.slane %v3695_v10, 4  ;;  %v9315_v62 = vcombine.low %v7660_v14, %v7669_v42 }
  0xc7   : > { %6394 = vmatprep.mubr.msk.bf16.mxu1 %vm733_vm3, %v9312_v52  ;;  %v3687_v31 = vsel %vm7277_vm4, %v3682_v54, %v3686_v61  ;;  %v1369_v6 = vrot.slane %v7133_v43, 5  ;;  %9314 = vst [vmem:[#allocation7_spill] sm:$0xff] %v8064_v7  ;;  %v3706_v52 = vrot.slane %v3705_v20, 4  ;;  %v1364_v46 = vrot.slane %v1362_v30, 4  ;;  %v7134_v54 = vld [vmem:[%s7251_s27 + $0x80] sm:$0x1] }
  0xc8   : > { %v1365_v61 = vrot.slane %v7134_v54, 5  ;;  %v3720_v9 = vrot.slane %v3719_v38, 4  ;;  %v5554_v25 = vrot.slane %v1250_v16, 9  ;;  %v3737_v8 = vshrl.u32 %v5877_v5, 16  ;;  %v6954_v10 = vld [vmem:[%s7251_s27 + $0x84] sm:$0xff]  }
  0xc9   : > { %v3740_v43 = vshll.u32 %v5877_v5, 16  ;;  %v8078_v20 = vcombine.low %v3677_v21, %v3687_v31  ;;  %v8082_v14 = vsel %vm782_vm0, %v7882_v26, 0  ;;  %v3750_v38 = vshrl.u32 %v8064_v7, 16  ;;  %v6955_v21 = vld [vmem:[%s7251_s27 + $0x90] sm:$0xff]   ;;  %v7139_v18 = vld [vmem:[%s7251_s27 + $0xa0] sm:$0xf] }
  0xca   : > { %v3730_v16 = vrot.slane %v3729_v39, 4  ;;  %v3734_v5 = vrot.slane %v3732_v55, 5  ;;  %v1371_v54 = vrot.slane %v1369_v6, 4  ;;  %v3701_v31 = vsel %vm7277_vm4, %v3696_v12, %v8004_v37 }
  0xcb   : > { %v3711_v26 = vsel %vm7277_vm4, %v3706_v52, %v8056_v50  ;;  %v8097_v39 = vsel %vm7503_vm7, %v5553_v24, %v1362_v30  ;;  %v8101_v55 = vsel %vm7503_vm7, %v1364_v46, %v1365_v61  ;;  %v3725_v37 = vsel %vm7277_vm4, %v3720_v9, %v8031_v35  ;;  %v5883_v30 = vld [vmem:[%s7251_s27 + $0x54] sm:$0xf]  ;;  %v8118_v24 = vld [vmem:[%s7251_s27 + $0x58] sm:$0xf]  ;;  %v8123_v61 = vld [vmem:[%s7251_s27 + $0x90] sm:$0xe] }
  0xcc   : > { %v8114_v12 = vsel %vm7503_vm7, %v5554_v25, %v1369_v6  ;;  %v3739_v50 = vrot.slane %v3737_v8, 4  ;;  %v3742_v52 = vrot.slane %v3740_v43, 5  ;;  %v3752_v46 = vrot.slane %v3750_v38, 4 }
  0xcd   : > { %6549 = vmatmul.mubr.msk.bf16.gmra.mrb[12].mxu0 %vm733_vm3, %v6952_v33  ;;  %v9316_v33 = vcombine.low %v7867_v0, %v7886_v23  ;;  %v7135_v0 = vld [vmem:[%s7251_s27 + $0x8c] sm:$0x1]  ;;  %v3735_v36 = vsel %vm7277_vm4, %v3730_v16, %v3734_v5  ;;  %v3785_v25 = vshrl.u32 %v5883_v30, 16  ;;  %v3788_v8 = vshll.u32 %v5883_v30, 16 }
  0xce   : > { %6395 = vmatmul.mubr.msk.bf16.gmra.mrb[28].mxu1 %vm733_vm3, %v9315_v62  ;;  %6552 = vmatprep.mubr.msk.bf16.mxu0 %vm733_vm3, %v6953_v48  ;;  %v3746_v48 = vshll.u32 %v8064_v7, 16  ;;  %v1372_v23 = vrot.slane %v7135_v0, 5  ;;  %v5880_v62 = vld [vmem:[%s7251_s27 + $0x48] sm:$0xf]  ;;  %v8107_v0 = vld [vmem:[%s7251_s27 + $0x4c] sm:$0xf]  ;;  %v9318_v38 = vcombine.low %v7871_v29, %v7875_v53  ;;  %v8141_v16 = vcombine.low %v3701_v31, %v3711_v26 }
  0xcf   : > { %6400 = vmatprep.mubr.msk.bf16.mxu1 %vm733_vm3, %v9316_v33  ;;  %v8104_v33 = vld [vmem:[%s7251_s27 + $0x44] sm:$0x1]  ;;  %v3761_v27 = vshrl.u32 %v5880_v62, 16  ;;  %v3764_v15 = vshll.u32 %v5880_v62, 16  ;;  %v3770_v6 = vshll.u32 %v8107_v0, 16  ;;  %v3774_v9 = vshrl.u32 %v8107_v0, 16 }
  0xd0   : > { %9317 = vst [vmem:[#allocation8_spill] sm:$0xff] %v8104_v33  ;;  %v8120_v28 = vrot.slane %v3746_v48, 5  ;;  %v8129_v35 = vsel %vm7503_vm7, %v1371_v54, %v1372_v23  ;;  %v3794_v43 = vshll.u32 %v8118_v24, 16  ;;  %v3798_v48 = vshrl.u32 %v8118_v24, 16  ;;  %v5886_v31 = vld [vmem:[%s7251_s27 + $0x60] sm:$0xf] }
  0xd1   : > { %v3756_v5 = vshll.u32 %v8104_v33, 16  ;;  %v5555_v54 = vrot.slane %v8123_v61, 9  ;;  %v9319_v23 = vcombine.low %v7912_v34, %v7928_v4  ;;  %v8152_v29 = vcombine.low %v3725_v37, %v3735_v36  ;;  %v6956_v26 = vld [vmem:[%s7251_s27 + $0x9c] sm:$0xff]   ;;  %v6957_v30 = vld [vmem:[%s7251_s27 + $0xa8] sm:$0xff]  }
  0xd2   : > { %v3743_v53 = vor.u32 %v3742_v52, %v3739_v50  ;;  %v3763_v62 = vrot.slane %v3761_v27, 4  ;;  %v8163_v34 = vrot.slane %v3770_v6, 5  ;;  %v3776_v4 = vrot.slane %v3774_v9, 4  ;;  %v7136_v36 = vld [vmem:[%s9287_s1 + $0x8] sm:$0x3] }
  0xd3   : > { %v3787_v27 = vrot.slane %v3785_v25, 4  ;;  %v3790_v37 = vrot.slane %v3788_v8, 5  ;;  %v8172_v50 = vrot.slane %v3794_v43, 5  ;;  %v3800_v52 = vrot.slane %v3798_v48, 4  ;;  %v7137_v6 = vld [vmem:[%s7251_s27 + $0x94] sm:$0xf] }
  0xd4   : > { %v8178_v9 = vld [vmem:[%s7251_s27 + $0x64] sm:$0xf]  ;;  %v3809_v61 = vshrl.u32 %v5886_v31, 16  ;;  %v8180_v22 = vrot.slane %v3743_v53, 4  ;;  %v1383_v25 = vrot.slane %v7139_v18, 5  ;;  %v3777_v43 = vor.u32 %v3776_v4, %v8163_v34 }
  0xd5   : > { %6553 = vmatmul.mubr.msk.bf16.gmra.mrb[16].mxu0 %vm733_vm3, %v6954_v10  ;;  %9320 = vst [vmem:[#allocation9_spill] sm:$0xff] %v8178_v9  ;;  %v3812_v10 = vshll.u32 %v5886_v31, 16  ;;  %v3791_v31 = vor.u32 %v3790_v37, %v3787_v27  ;;  %v3801_v53 = vor.u32 %v3800_v52, %v8172_v50  ;;  %v9321_v18 = vcombine.low %v7919_v19, %v7932_v58  ;;  %v6958_v37 = vld [vmem:[%s7251_s27 + $0xb4] sm:$0xff]  }
  0xd6   : > { %6401 = vmatmul.mubr.msk.bf16.vlgmr.msra.gmra.mrb[0].mxu1 %vm733_vm3, %v9318_v38  ;;  %6556 = vmatprep.mubr.msk.bf16.mxu0 %vm733_vm3, %v6955_v21  ;;  %v3766_v21 = vrot.slane %v3764_v15, 5  ;;  %v8161_v38 = vld [vmem:[%s7251_s27 + $0x50] sm:$0x1]  ;;  %v8170_v15 = vld [vmem:[%s7251_s27 + $0x5c] sm:$0x1]  ;;  %v9322_v27 = vcombine.low %v7937_v2, %v7941_v1  ;;  %v1385_v52 = vrot.slane %v1383_v25, 4 }
  0xd7   : > { %6433 = vmatpush3.bf16.msra.mxu1 %v7908_v49  ;;  %6404 = vmatprep.mubr.msk.bf16.mxu1 %vm733_vm3, %v9319_v23  ;;  %v3753_v49 = vor.u32 %v3752_v46, %v8120_v28  ;;  %v8174_v46 = vrot.slane %v3756_v5, 5  ;;  %v1376_v23 = vrot.slane %v7137_v6, 5  ;;  %v3780_v48 = vshll.u32 %v8161_v38, 16  ;;  %v1252_v5 = vld [vmem:[%s7251_s27 + $0x9c] sm:$0xe] }
  0xd8   : > { %6899 = vmatprep.subr.msk.bf16.mxu1 %vm782_vm0, %v7136_v36  ;;  %v7138_v36 = vld [vmem:[%s7251_s27 + $0x98] sm:$0x1]  ;;  %v3767_v7 = vor.u32 %v3766_v21, %v3763_v62  ;;  %v3804_v6 = vshll.u32 %v8170_v15, 16  ;;  %v3822_v62 = vshrl.u32 %v8178_v9, 16  ;;  %v3814_v4 = vrot.slane %v3812_v10, 5 }
  0xd9   : > { %v1379_v33 = vrot.slane %v7138_v36, 5  ;;  %v3754_v8 = vrot.slane %v3753_v49, 4  ;;  %v3818_v36 = vshll.u32 %v8178_v9, 16  ;;  %v8199_v21 = vsel %vm7503_vm7, %v5555_v54, %v1376_v23  ;;  %v8210_v2 = vld [vmem:[%s7251_s27 + $0x68] sm:$0x1] }
  0xda   : > { %v3811_v49 = vrot.slane %v3809_v61, 4  ;;  %v3768_v19 = vrot.slane %v3767_v7, 4  ;;  %v5556_v58 = vrot.slane %v1252_v5, 9  ;;  %v3778_v3 = vrot.slane %v3777_v43, 4  ;;  %9323 = vst [vmem:[#allocation10_spill] sm:$0xff] %v8210_v2  ;;  %v6959_v5 = vld [vmem:[%s7251_s27 + $0xc0] sm:$0xff]  }
  0xdb   : > { %v3782_v54 = vrot.slane %v3780_v48, 5  ;;  %v3806_v63 = vrot.slane %v3804_v6, 5  ;;  %v1390_v61 = vrot.slane %v7645_v56, 5  ;;  %v3792_v10 = vrot.slane %v3791_v31, 4  ;;  %v1254_v31 = vld [vmem:[%s7251_s27 + $0xb4] sm:$0xe] }
  0xdc   : > { %v3802_v51 = vrot.slane %v3801_v53, 4  ;;  %v8212_v1 = vrot.slane %v3818_v36, 5  ;;  %v3824_v7 = vrot.slane %v3822_v62, 4  ;;  %v3749_v43 = vsel %vm7277_vm4, %v8180_v22, %v8120_v28  ;;  %v7141_v62 = vld [vmem:[%s7251_s27 + $0xb0] sm:$0x1] }
  0xdd   : > { %6557 = vmatmul.mubr.msk.bf16.gmra.mrb[20].mxu0 %vm733_vm3, %v6956_v26  ;;  %v1378_v26 = vrot.slane %v1376_v23, 4  ;;  %v1253_v23 = vld [vmem:[%s7251_s27 + $0xa8] sm:$0xe]  ;;  %v3759_v48 = vsel %vm7277_vm4, %v3754_v8, %v8174_v46  ;;  %v3815_v6 = vor.u32 %v3814_v4, %v3811_v49  ;;  %v3773_v53 = vsel %vm7277_vm4, %v3768_v19, %v8163_v34  ;;  %v5889_v46 = vld [vmem:[%s7251_s27 + $0x6c] sm:$0xf] }
  0xde   : > { %6405 = vmatmul.mubr.msk.bf16.gmra.mrb[4].mxu1 %vm733_vm3, %v9321_v18  ;;  %6560 = vmatprep.mubr.msk.bf16.mxu0 %vm733_vm3, %v6957_v30  ;;  %v7140_v18 = vld [vmem:[%s7251_s27 + $0xa4] sm:$0x1]  ;;  %v8232_v36 = vsel %vm7503_vm7, %v5556_v58, %v1383_v25  ;;  %v5557_v28 = vrot.slane %v1253_v23, 9  ;;  %v1392_v8 = vrot.slane %v1390_v61, 4  ;;  %v3828_v49 = vshll.u32 %v8210_v2, 16 }
  0xdf   : > { %6408 = vmatprep.mubr.msk.bf16.mxu1 %vm733_vm3, %v9322_v27  ;;  %v1386_v30 = vrot.slane %v7140_v18, 5  ;;  %v8224_v56 = vsel %vm7503_vm7, %v1378_v26, %v1379_v33  ;;  %v3783_v33 = vsel %vm7277_vm4, %v3778_v3, %v3782_v54  ;;  %v1393_v26 = vrot.slane %v7141_v62, 5  ;;  %v5892_v18 = vld [vmem:[%s7251_s27 + $0x78] sm:$0xf]  ;;  %v8287_v54 = vld [vmem:[%s7251_s27 + $0xbc] sm:$0x1] }
  0xe0   : > { %v3797_v34 = vsel %vm7277_vm4, %v3792_v10, %v8172_v50  ;;  %v3807_v25 = vsel %vm7277_vm4, %v3802_v51, %v3806_v63  ;;  %v3825_v4 = vor.u32 %v3824_v7, %v8212_v1  ;;  %v5558_v27 = vrot.slane %v1254_v31, 9  ;;  %v8261_v51 = vld [vmem:[%s7251_s27 + $0x70] sm:$0xf]  ;;  %v8291_v10 = vld [vmem:[%s7251_s27 + $0x7c] sm:$0xf] }
  0xe1   : > { %v8236_v22 = vsel %vm7503_vm7, %v1385_v52, %v1386_v30  ;;  %v9325_v3 = vcombine.low %v7954_v45, %v7958_v59  ;;  %v8257_v19 = vrot.slane %v3815_v6, 4  ;;  %v1397_v50 = vrot.slane %v7669_v42, 5  ;;  %9326 = vst [vmem:[#allocation12_spill] sm:$0xff] %v8261_v51  ;;  %9328 = vst [vmem:[#allocation13_spill] sm:$0xff] %v8291_v10  ;;  %v5895_v7 = vld [vmem:[%s7251_s27 + $0x84] sm:$0xf] }
  0xe2   : > { %9324 = vst [vmem:[#allocation11_spill] sm:$0xff] %v8236_v22  ;;  %v3833_v63 = vshrl.u32 %v5889_v46, 16  ;;  %v9327_v45 = vcombine.low %v7962_v47, %v7989_v41  ;;  %v8269_v58 = vcombine.low %v3773_v53, %v3783_v33  ;;  %v8275_v42 = vsel %vm7503_vm7, %v5557_v28, %v1390_v61  ;;  %v6960_v61 = vld [vmem:[%s7251_s27 + $0xcc] sm:$0xff]   ;;  %v8303_v31 = vld [vmem:[%s7251_s27 + $0x88] sm:$0xf] }
  0xe3   : > { %v8278_v30 = vcombine.low %v3797_v34, %v3807_v25  ;;  %v8282_v47 = vsel %vm7503_vm7, %v1392_v8, %v1393_v26  ;;  %v8284_v41 = vrot.slane %v3828_v49, 5  ;;  %v3842_v6 = vshll.u32 %v8261_v51, 16  ;;  %9329 = vst [vmem:[#allocation14_spill] sm:$0xff] %v8303_v31  ;;  %v5898_v62 = vld [vmem:[%s7251_s27 + $0x90] sm:$0xf] }
  0xe4   : > { %v8309_v28 = vrot.slane %v1397_v50, 4  ;;  %v8311_v33 = vrot.slane %v3833_v63, 4  ;;  %v3846_v8 = vshrl.u32 %v8261_v51, 16  ;;  %v3857_v26 = vshrl.u32 %v5892_v18, 16  ;;  %v8318_v25 = vld [vmem:[%s7251_s27 + $0x94] sm:$0xf] }
  0xe5   : > { %6561 = vmatmul.mubr.msk.bf16.gmra.mrb[24].mxu0 %vm733_vm3, %v6958_v37  ;;  %v8255_v37 = vcombine.low %v3749_v43, %v3759_v48  ;;  %v8299_v43 = vsel %vm7503_vm7, %v5558_v27, %v1397_v50  ;;  %v3836_v48 = vshll.u32 %v5889_v46, 16  ;;  %v3860_v49 = vshll.u32 %v5892_v18, 16  ;;  %9330 = vst [vmem:[#allocation15_spill] sm:$0xff] %v8318_v25  ;;  %v8356_v2 = vld [vmem:[%s7251_s27 + $0x8c] sm:$0x1] }
  0xe6   : > { %6409 = vmatmul.mubr.msk.bf16.gmra.mrb[8].mxu1 %vm733_vm3, %v9325_v3  ;;  %6564 = vmatprep.mubr.msk.bf16.mxu0 %vm733_vm3, %v6959_v5  ;;  %v8295_v5 = vrot.slane %v3825_v4, 4  ;;  %v3866_v46 = vshll.u32 %v8291_v10, 16  ;;  %v3870_v34 = vshrl.u32 %v8291_v10, 16  ;;  %v3881_v4 = vshrl.u32 %v5895_v7, 16 }
  0xe7   : > { %6412 = vmatprep.mubr.msk.bf16.mxu1 %vm733_vm3, %v9327_v45  ;;  %v3884_v27 = vshll.u32 %v5895_v7, 16  ;;  %v3890_v3 = vshll.u32 %v8303_v31, 16  ;;  %v3894_v50 = vshrl.u32 %v8303_v31, 16  ;;  %v8328_v45 = vld [vmem:[%s7251_s27 + $0x74] sm:$0x1]  ;;  %v3838_v18 = vrot.slane %v3836_v48, 5 }
  0xe8   : > { %v3905_v52 = vshrl.u32 %v5898_v62, 16  ;;  %v3908_v53 = vshll.u32 %v5898_v62, 16  ;;  %v9331_v7 = vcombine.low %v7973_v60, %v7998_v44  ;;  %v3848_v59 = vrot.slane %v3846_v8, 4  ;;  %v5901_v48 = vld [vmem:[%s7251_s27 + $0x9c] sm:$0xf] }
  0xe9   : > { %v3914_v63 = vshll.u32 %v8318_v25, 16  ;;  %v3918_v23 = vshrl.u32 %v8318_v25, 16  ;;  %v9332_v62 = vcombine.low %v8013_v17, %v8017_v57  ;;  %v8346_v44 = vld [vmem:[%s7251_s27 + $0x80] sm:$0x1]  ;;  %v3859_v60 = vrot.slane %v3857_v26, 4 }
  0xea   : > { %9333 = vst [vmem:[#allocation16_spill] sm:$0xff] %v8346_v44  ;;  %v3883_v31 = vrot.slane %v3881_v4, 4  ;;  %v3886_v8 = vrot.slane %v3884_v27, 5  ;;  %v8350_v10 = vrot.slane %v3890_v3, 5  ;;  %v3896_v51 = vrot.slane %v3894_v50, 4 }
  0xeb   : > { %v8353_v25 = vld [vmem:[%s7251_s27 + $0xa0] sm:$0xf]  ;;  %v3907_v17 = vrot.slane %v3905_v52, 4  ;;  %v3910_v57 = vrot.slane %v3908_v53, 5  ;;  %v3932_v9 = vshll.u32 %v5901_v48, 16  ;;  %v3839_v26 = vor.u32 %v3838_v18, %v8311_v33 }
  0xec   : > { %v3876_v27 = vshll.u32 %v8346_v44, 16  ;;  %v8365_v3 = vld [vmem:[%s7251_s27 + $0x98] sm:$0x1]  ;;  %v3938_v50 = vshll.u32 %v8353_v25, 16  ;;  %v3942_v52 = vshrl.u32 %v8353_v25, 16  ;;  %v3887_v22 = vor.u32 %v3886_v8, %v3883_v31 }
  0xed   : > { %6565 = vmatmul.mubr.msk.bf16.gmra.mrb[28].mxu0 %vm733_vm3, %v6960_v61  ;;  %v8336_v61 = vrot.slane %v3842_v6, 5  ;;  %v3872_v6 = vrot.slane %v3870_v34, 4  ;;  %v3920_v34 = vrot.slane %v3918_v23, 4  ;;  %v3900_v33 = vshll.u32 %v8356_v2, 16 }
  0xee   : > { %6413 = vmatmul.mubr.msk.bf16.gmra.mrb[12].mxu1 %vm733_vm3, %v9331_v7  ;;  %6570 = vmatprep.mubr.msk.bf16.mxu0 %vm733_vm3, %v8078_v20  ;;  %v3862_v7 = vrot.slane %v3860_v49, 5  ;;  %v8348_v20 = vrot.slane %v3866_v46, 5  ;;  %v3852_v49 = vshll.u32 %v8328_v45, 16  ;;  %v8360_v46 = vrot.slane %v3914_v63, 5 }
  0xef   : > { %6416 = vmatprep.mubr.msk.bf16.mxu1 %vm733_vm3, %v9332_v62  ;;  %v3929_v62 = vshrl.u32 %v5901_v48, 16  ;;  %v3849_v4 = vor.u32 %v3848_v59, %v8336_v61  ;;  %v3897_v23 = vor.u32 %v3896_v51, %v8350_v10  ;;  %v3911_v59 = vor.u32 %v3910_v57, %v3907_v17  ;;  %v8398_v57 = vld [vmem:[%s7251_s27 + $0xa4] sm:$0x1] }
  0xf0   : > { %v3863_v53 = vor.u32 %v3862_v7, %v3859_v60  ;;  %v3873_v48 = vor.u32 %v3872_v6, %v8348_v20  ;;  %v3934_v18 = vrot.slane %v3932_v9, 5  ;;  %v9334_v44 = vcombine.low %v8025_v11, %v8029_v40 }
  0xf1   : > { %v3931_v63 = vrot.slane %v3929_v62, 4  ;;  %v9335_v31 = vrot.slane %v8287_v54, 5  ;;  %v3854_v51 = vrot.slane %v3852_v49, 5  ;;  %v3921_v60 = vor.u32 %v3920_v34, %v8360_v46  ;;  %v8401_v34 = vld [vmem:[%s7251_s27 + $0xac] sm:$0xf] }
  0xf2   : > { %v3924_v9 = vshll.u32 %v8365_v3, 16  ;;  %v9336_v11 = vcombine.low %v8097_v39, %v8101_v55  ;;  %v3840_v40 = vrot.slane %v3839_v26, 4  ;;  %v8394_v54 = vrot.slane %v3938_v50, 5 }
  0xf3   : > { %v3864_v7 = vrot.slane %v3863_v53, 4  ;;  %v3874_v6 = vrot.slane %v3873_v48, 4  ;;  %v3878_v8 = vrot.slane %v3876_v27, 5  ;;  %v3902_v17 = vrot.slane %v3900_v33, 5  ;;  %v8411_v48 = vld [vmem:[%s7251_s27 + $0xb0] sm:$0x1] }
  0xf4   : > { %v3888_v39 = vrot.slane %v3887_v22, 4  ;;  %v3898_v55 = vrot.slane %v3897_v23, 4  ;;  %v3912_v62 = vrot.slane %v3911_v59, 4  ;;  %v3935_v49 = vor.u32 %v3934_v18, %v3931_v63 }
  0xf5   : > { %6571 = vmatmul.mubr.msk.bf16.vlgmr.msra.gmra.mrb[0].mxu0 %vm733_vm3, %v8141_v16  ;;  %v8384_v16 = vsel %vm7503_vm7, %v8309_v28, %v9335_v31  ;;  %v3944_v28 = vrot.slane %v3942_v52, 4  ;;  %v3926_v26 = vrot.slane %v3924_v9, 5  ;;  %v3845_v52 = vsel %vm7277_vm4, %v3840_v40, %v8336_v61 }
  0xf6   : > { %6417 = vmatmul.mubr.msk.bf16.gmra.mrb[16].mxu1 %vm733_vm3, %v9334_v44  ;;  %6603 = vmatpush3.bf16.msra.mxu0 %v8082_v14  ;;  %v3850_v14 = vrot.slane %v3849_v4, 4  ;;  %v5904_v44 = vld [vmem:[%s7251_s27 + $0xa8] sm:$0xf]  ;;  %v3948_v22 = vshll.u32 %v8398_v57, 16  ;;  %v3869_v33 = vsel %vm7277_vm4, %v3864_v7, %v8348_v20  ;;  %v3879_v23 = vsel %vm7277_vm4, %v3874_v6, %v3878_v8 }
  0xf7   : > { %6420 = vmatprep.mubr.msk.bf16.mxu1 %vm733_vm3, %v9336_v11  ;;  %6574 = vmatprep.mubr.msk.bf16.mxu0 %vm733_vm3, %v8152_v29  ;;  %v3922_v29 = vrot.slane %v3921_v60, 4  ;;  %v3953_v4 = vshrl.u32 %v5904_v44, 16  ;;  %v3956_v50 = vshll.u32 %v5904_v44, 16  ;;  %v3945_v53 = vor.u32 %v3944_v28, %v8394_v54  ;;  %v5953_v11 = vld [vmem:[%s7251_s27 + $0x48] sm:$0xe] }
  0xf8   : > { %v3855_v27 = vsel %vm7277_vm4, %v3850_v14, %v3854_v51  ;;  %v3962_v59 = vshll.u32 %v8401_v34, 16  ;;  %v3966_v61 = vshrl.u32 %v8401_v34, 16  ;;  %v3893_v63 = vsel %vm7277_vm4, %v3888_v39, %v8350_v10  ;;  %v8476_v39 = vld [vmem:[%s7251_s27 + $0xb8] sm:$0xf] }
  0xf9   : > { %v3903_v18 = vsel %vm7277_vm4, %v3898_v55, %v3902_v17  ;;  %v3917_v20 = vsel %vm7277_vm4, %v3912_v62, %v8360_v46  ;;  %v3936_v31 = vrot.slane %v3935_v49, 4  ;;  %v9337_v51 = vcombine.low %v8114_v12, %v8129_v35 }
  0xfa   : > { %v3955_v10 = vrot.slane %v3953_v4, 4  ;;  %v3958_v60 = vrot.slane %v3956_v50, 5  ;;  %v3972_v9 = vshll.u32 %v8411_v48, 16  ;;  %v9338_v46 = vcombine.low %v8199_v21, %v8224_v56  ;;  %v5907_v21 = vld [vmem:[%s7251_s27 + $0xb4] sm:$0xf] }
  0xfb   : > { %v5574_v12 = vcombine.low %v8275_v42, %v8282_v47  ;;  %v9339_v35 = vsel %vm7277_vm4, %v8295_v5, %v8284_v41  ;;  %v3946_v14 = vrot.slane %v3945_v53, 4  ;;  %v3950_v28 = vrot.slane %v3948_v22, 5  ;;  %v5955_v4 = vld [vmem:[%s7251_s27 + $0x60] sm:$0xe]  ;;  %v5956_v53 = vld [vmem:[%s7251_s27 + $0x6c] sm:$0xe] }
  0xfc   : > { %v5575_v56 = vcombine.low %v8299_v43, %v8384_v16  ;;  %v8459_v44 = vcombine.low %v3845_v52, %v3855_v27  ;;  %v8461_v42 = vrot.slane %v3962_v59, 5  ;;  %v3968_v47 = vrot.slane %v3966_v61, 4  ;;  %v9348_v16 = vld [vmem:[#allocation4_spill] sm:$0xff] }
  0xfd   : > { %6575 = vmatmul.mubr.msk.bf16.gmra.mrb[4].mxu0 %vm733_vm3, %v8255_v37  ;;  %v3927_v37 = vsel %vm7277_vm4, %v3922_v29, %v3926_v26  ;;  %v8463_v41 = vcombine.low %v3869_v33, %v3879_v23  ;;  %v8465_v5 = vcombine.low %v3893_v63, %v3903_v18  ;;  %v3941_v6 = vsel %vm7277_vm4, %v3936_v31, %v8394_v54  ;;  %v9341_v23 = vld [vmem:[#allocation11_spill] sm:$0xff]  ;;  %v5910_v63 = vld [vmem:[%s7251_s27 + $0xc0] sm:$0xf]  ;;  %v9343_v18 = vld [vmem:[#allocation9_spill] sm:$0xff] }
  0xfe   : > { %6421 = vmatmul.mubr.msk.bf16.gmra.mrb[20].mxu1 %vm733_vm3, %v9337_v51  ;;  %6578 = vmatprep.mubr.msk.bf16.mxu0 %vm733_vm3, %v8269_v58  ;;  %v9340_v58 = vsel %vm7277_vm4, %v8257_v19, %v8212_v1  ;;  %v8467_v7 = vcombine.low %v3917_v20, %v3927_v37  ;;  %v5969_v1 = vrot.slane %v5953_v11, 9  ;;  %v5954_v19 = vld [vmem:[%s7251_s27 + $0x54] sm:$0xe]  ;;  %v3959_v8 = vor.u32 %v3958_v60, %v3955_v10  ;;  %v9344_v31 = vld [vmem:[#allocation10_spill] sm:$0xff] }
  0xff   : > { %6424 = vmatprep.mubr.msk.bf16.mxu1 %vm733_vm3, %v9338_v46  ;;  %v5923_v40 = vcombine.low %v9340_v58, %v9339_v35  ;;  %v8473_v17 = vrot.slane %v3972_v9, 5  ;;  %v3977_v55 = vshrl.u32 %v5907_v21, 16  ;;  %v3951_v62 = vsel %vm7277_vm4, %v3946_v14, %v3950_v28  ;;  %v9345_v9 = vld [vmem:[#allocation12_spill] sm:$0xff]  ;;  %v8525_v35 = vld [vmem:[%s7251_s27 + $0xbc] sm:$0x1] }
 0x100   : > { %v3980_v49 = vshll.u32 %v5907_v21, 16  ;;  %v4436_v29 = vrot.slane %v8107_v0, 5  ;;  %v4439_v26 = vrot.slane %v8161_v38, 5  ;;  %v3969_v50 = vor.u32 %v3968_v47, %v8461_v42  ;;  %v8528_v58 = vld [vmem:[%s7251_s27 + $0xc4] sm:$0xf] }
 0x101   : > { %v5970_v52 = vrot.slane %v5954_v19, 9  ;;  %v4443_v54 = vrot.slane %v8118_v24, 5  ;;  %v4446_v27 = vrot.slane %v8170_v15, 5  ;;  %v3986_v22 = vshll.u32 %v8476_v39, 16  ;;  %v5957_v19 = vld [vmem:[%s7251_s27 + $0x78] sm:$0xe] }
 0x102   : > { %v3990_v33 = vshrl.u32 %v8476_v39, 16  ;;  %v8493_v0 = vsel %vm7503_vm7, %v5969_v1, %v4436_v29  ;;  %v4438_v38 = vrot.slane %v4436_v29, 4  ;;  %v9342_v59 = vcombine.low %v8232_v36, %v9341_v23  ;;  %v9346_v23 = vld [vmem:[#allocation13_spill] sm:$0xff] }
 0x103   : > { %v8500_v24 = vcombine.low %v3941_v6, %v3951_v62  ;;  %v8504_v15 = vsel %vm7503_vm7, %v5970_v52, %v4443_v54  ;;  %v5971_v61 = vrot.slane %v5955_v4, 9  ;;  %v4450_v20 = vrot.slane %v9343_v18, 5  ;;  %v6961_v6 = vld [vmem:[%s7251_s27 + $0xc] sm:$0xff]  }
 0x104   : > { %v8510_v36 = vsel %vm7503_vm7, %v4438_v38, %v4439_v26  ;;  %v4453_v51 = vrot.slane %v9344_v31, 5  ;;  %v5972_v37 = vrot.slane %v5956_v53, 9  ;;  %v4457_v11 = vrot.slane %v9345_v9, 5 }
 0x105   : > { %6579 = vmatmul.mubr.msk.bf16.gmra.mrb[8].mxu0 %vm733_vm3, %v8278_v30  ;;  %v4445_v30 = vrot.slane %v4443_v54, 4  ;;  %v5986_v10 = vcombine.low %v8493_v0, %v8510_v36  ;;  %v4460_v46 = vrot.slane %v8328_v45, 5  ;;  %v8534_v14 = vsel %vm7503_vm7, %v5971_v61, %v4450_v20 }
 0x106   : > { %6425 = vmatmul.mubr.msk.bf16.gmra.mrb[24].mxu1 %vm733_vm3, %v9342_v59  ;;  %6582 = vmatprep.mubr.msk.bf16.mxu0 %vm733_vm3, %v5923_v40  ;;  %v4452_v28 = vrot.slane %v4450_v20, 4  ;;  %v8536_v21 = vrot.slane %v3977_v55, 4  ;;  %v4001_v47 = vshrl.u32 %v5910_v63, 16  ;;  %v8540_v45 = vsel %vm7503_vm7, %v5972_v37, %v4457_v11  ;;  %v5684_v55 = vld [vmem:[%s7251_s27 + $0x78] sm:$0xf]  ;;  %v9347_v59 = vld [vmem:[#allocation16_spill] sm:$0xff] }
 0x107   : > { %6428 = vmatprep.mubr.msk.bf16.mxu1 %vm733_vm3, %v5574_v12  ;;  %v8518_v60 = vsel %vm7503_vm7, %v4445_v30, %v4446_v27  ;;  %v8522_v12 = vrot.slane %v3959_v8, 4  ;;  %v4459_v1 = vrot.slane %v4457_v11, 4  ;;  %v8544_v8 = vrot.slane %v3969_v50, 4 }
 0x108   : > { %v5987_v40 = vcombine.low %v8504_v15, %v8518_v60  ;;  %v8546_v62 = vrot.slane %v3980_v49, 5  ;;  %v4004_v29 = vshll.u32 %v5910_v63, 16  ;;  %v8550_v26 = vsel %vm7503_vm7, %v4452_v28, %v4453_v51  ;;  %v9350_v28 = vld [vmem:[#allocation14_spill] sm:$0xff] }
 0x109   : > { %v8553_v4 = vrot.slane %v3986_v22, 5  ;;  %v8555_v52 = vrot.slane %v3990_v33, 4  ;;  %v5988_v54 = vcombine.low %v8534_v14, %v8550_v26  ;;  %v8561_v27 = vsel %vm7503_vm7, %v4459_v1, %v4460_v46  ;;  %v5958_v33 = vld [vmem:[%s7251_s27 + $0x84] sm:$0xe]  ;;  %v6962_v1 = vld [vmem:[%s7251_s27 + $0x18] sm:$0xff]  }
 0x10a   : > { %v3996_v49 = vshll.u32 %v8525_v35, 16  ;;  %v4010_v50 = vshll.u32 %v8528_v58, 16  ;;  %v5989_v53 = vcombine.low %v8540_v45, %v8561_v27  ;;  %v5973_v22 = vrot.slane %v5957_v19, 9  ;;  %v7152_v60 = vld [vmem:[%s7251_s27 + $0xa0] sm:$0xf] }
 0x10b   : > { %v4003_v38 = vrot.slane %v4001_v47, 4  ;;  %v4467_v30 = vrot.slane %v9347_v59, 5  ;;  %v2323_v61 = vshrl.u32 %v5684_v55, 16  ;;  %v4006_v63 = vrot.slane %v4004_v29, 5  ;;  %v5913_v29 = vld [vmem:[%s7251_s27 + $0xcc] sm:$0xf] }
 0x10c   : > { %v4014_v18 = vshrl.u32 %v8528_v58, 16  ;;  %v2326_v43 = vshll.u32 %v5684_v55, 16  ;;  %v5974_v37 = vrot.slane %v5958_v33, 9  ;;  %v3965_v9 = vsel %vm7277_vm4, %v8522_v12, %v8461_v42  ;;  %v8604_v55 = vld [vmem:[%s7251_s27 + $0xd0] sm:$0xf] }
 0x10d   : > { %6583 = vmatmul.mubr.msk.bf16.gmra.mrb[12].mxu0 %vm733_vm3, %v8459_v44  ;;  %v4464_v44 = vrot.slane %v9346_v23, 5  ;;  %v2325_v51 = vrot.slane %v2323_v61, 4  ;;  %v3983_v11 = vor.u32 %v8546_v62, %v8536_v21  ;;  %v4471_v47 = vrot.slane %v9350_v28, 5  ;;  %v6963_v21 = vld [vmem:[%s7251_s27 + $0x24] sm:$0xff]   ;;  %v7156_v27 = vld [vmem:[%s7251_s27 + $0xac] sm:$0xf] }
 0x10e   : > { %6429 = vmatmul.mubr.msk.bf16.gmra.mrb[28].mxu1 %vm733_vm3, %v5575_v56  ;;  %6586 = vmatprep.mubr.msk.bf16.mxu0 %vm733_vm3, %v8463_v41  ;;  %v9349_v56 = vld [vmem:[#allocation5_spill] sm:$0xff]  ;;  %v2328_v46 = vrot.slane %v2326_v43, 5  ;;  %v3975_v19 = vsel %vm7277_vm4, %v8544_v8, %v8473_v17  ;;  %v4474_v12 = vrot.slane %v8356_v2, 5  ;;  %v8612_v62 = vrot.slane %v4010_v50, 5  ;;  %v5959_v8 = vld [vmem:[%s7251_s27 + $0x90] sm:$0xe] }
 0x10f   : > { %6434 = vmatprep.mubr.msk.bf16.mxu1 %vm733_vm3, %v6961_v6  ;;  %v2345_v41 = vsel %vm7277_vm4, %v9349_v56, %v9348_v16  ;;  %v8586_v20 = vsel %vm7503_vm7, %v5973_v22, %v4464_v44  ;;  %v4466_v31 = vrot.slane %v4464_v44, 4  ;;  %v3993_v6 = vor.u32 %v8555_v52, %v8553_v4  ;;  %v8618_v52 = vld [vmem:[%s7251_s27 + $0xc8] sm:$0x1]  ;;  %v9352_v16 = vld [vmem:[#allocation2_spill] sm:$0xff] }
 0x110   : > { %v4016_v22 = vrot.slane %v4014_v18, 4  ;;  %v2329_v17 = vor.u32 %v2328_v46, %v2325_v51  ;;  %v3998_v23 = vrot.slane %v3996_v49, 5  ;;  %v4007_v44 = vor.u32 %v4006_v63, %v4003_v38  ;;  %v9353_v51 = vld [vmem:[#allocation3_spill] sm:$0xff] }
 0x111   : > { %v8608_v42 = vsel %vm7503_vm7, %v4466_v31, %v4467_v30  ;;  %v8622_v59 = vsel %vm7503_vm7, %v5974_v37, %v4471_v47  ;;  %v4473_v30 = vrot.slane %v4471_v47, 4  ;;  %v4025_v2 = vshrl.u32 %v5913_v29, 16 }
 0x112   : > { %v5990_v33 = vcombine.low %v8586_v20, %v8608_v42  ;;  %v4028_v50 = vshll.u32 %v5913_v29, 16  ;;  %v4034_v61 = vshll.u32 %v8604_v55, 16  ;;  %v2330_v18 = vrot.slane %v2329_v17, 4  ;;  %v6964_v29 = vld [vmem:[%s7251_s27 + $0x30] sm:$0xff]  }
 0x113   : > { %v4038_v49 = vshrl.u32 %v8604_v55, 16  ;;  %v8633_v38 = vsel %vm7503_vm7, %v4473_v30, %v4474_v12  ;;  %v5975_v63 = vrot.slane %v5959_v8, 9  ;;  %v4017_v56 = vor.u32 %v4016_v22, %v8612_v62 }
 0x114   : > { %v4020_v31 = vshll.u32 %v8618_v52, 16  ;;  %v5991_v37 = vcombine.low %v8622_v59, %v8633_v38  ;;  %v5929_v46 = vcombine.low %v3965_v9, %v3975_v19  ;;  %v3984_v28 = vrot.slane %v3983_v11, 4  ;;  %v5960_v11 = vld [vmem:[%s7251_s27 + $0x9c] sm:$0xe] }
 0x115   : > { %6587 = vmatmul.mubr.msk.bf16.gmra.mrb[16].mxu0 %vm733_vm3, %v8465_v5  ;;  %v9351_v5 = vld [vmem:[#allocation15_spill] sm:$0xff]  ;;  %v3994_v47 = vrot.slane %v3993_v6, 4  ;;  %v4008_v12 = vrot.slane %v4007_v44, 4  ;;  %v4481_v8 = vrot.slane %v8365_v3, 5  ;;  %v4027_v30 = vrot.slane %v4025_v2, 4  ;;  %v6965_v19 = vld [vmem:[%s7251_s27 + $0x3c] sm:$0xff]  }
 0x116   : > { %6435 = vmatmul.mubr.msk.bf16.vlgmr.msra.gmra.mrb[0].mxu1 %vm733_vm3, %v6962_v1  ;;  %6590 = vmatprep.mubr.msk.bf16.mxu0 %vm733_vm3, %v8467_v7  ;;  %v4478_v43 = vrot.slane %v9351_v5, 5  ;;  %v2335_v7 = vsel %vm7277_vm4, %v2330_v18, %v9353_v51  ;;  %v4030_v18 = vrot.slane %v4028_v50, 5  ;;  %v8656_v5 = vrot.slane %v4034_v61, 5 }
 0x117   : > { %6637 = vmatpush3.bf16.msra.mxu1 %v9352_v16  ;;  %6438 = vmatprep.mubr.msk.bf16.mxu1 %vm733_vm3, %v6963_v21  ;;  %v8645_v1 = vcombine.low %v2335_v7, %v2345_v41  ;;  %v8649_v21 = vld [vmem:[%s7251_s27 + $0xd4] sm:$0x1]  ;;  %v4040_v9 = vrot.slane %v4038_v49, 4  ;;  %v4018_v41 = vrot.slane %v4017_v56, 4  ;;  %v4022_v6 = vrot.slane %v4020_v31, 5 }
 0x118   : > { %v8653_v22 = vsel %vm7503_vm7, %v5975_v63, %v4478_v43  ;;  %v4480_v17 = vrot.slane %v4478_v43, 4  ;;  %v3989_v63 = vsel %vm7277_vm4, %v3984_v28, %v8553_v4  ;;  %v3999_v2 = vsel %vm7277_vm4, %v3994_v47, %v3998_v23  ;;  %v7143_v16 = vld [vmem:[%s7251_s27 + $0x1c] sm:$0xf]  ;;  %v5961_v28 = vld [vmem:[%s7251_s27 + $0xa8] sm:$0xe] }
 0x119   : > { %v4044_v50 = vshll.u32 %v8649_v21, 16  ;;  %v5976_v61 = vrot.slane %v5960_v11, 9  ;;  %v4485_v49 = vrot.slane %v8353_v25, 5  ;;  %v4013_v4 = vsel %vm7277_vm4, %v4008_v12, %v8612_v62  ;;  %v5949_v62 = vld [vmem:[%s7251_s27 + $0x18] sm:$0xe]  ;;  %v6966_v47 = vld [vmem:[%s7251_s27 + $0x48] sm:$0xff]  }
 0x11a   : > { %v8662_v44 = vsel %vm7503_vm7, %v4480_v17, %v4481_v8  ;;  %v4041_v43 = vor.u32 %v4040_v9, %v8656_v5  ;;  %v4488_v23 = vrot.slane %v8398_v57, 5  ;;  %v4023_v25 = vsel %vm7277_vm4, %v4018_v41, %v4022_v6  ;;  %v7144_v11 = vld [vmem:[%s7251_s27 + $0x20] sm:$0x1] }
 0x11b   : > { %v5992_v3 = vcombine.low %v8653_v22, %v8662_v44  ;;  %v4408_v56 = vrot.slane %v7143_v16, 5  ;;  %v8688_v31 = vsel %vm7503_vm7, %v5976_v61, %v4485_v49  ;;  %v4487_v51 = vrot.slane %v4485_v49, 4  ;;  %v5962_v49 = vld [vmem:[%s7251_s27 + $0xb4] sm:$0xe] }
 0x11c   : > { %v5930_v7 = vcombine.low %v3989_v63, %v3999_v2  ;;  %v4042_v17 = vrot.slane %v4041_v43, 4  ;;  %v5977_v41 = vrot.slane %v5961_v28, 9  ;;  %v4492_v6 = vrot.slane %v8401_v34, 5  ;;  %v5950_v2 = vld [vmem:[%s7251_s27 + $0x24] sm:$0xe] }
 0x11d   : > { %6591 = vmatmul.mubr.msk.bf16.gmra.mrb[20].mxu0 %vm733_vm3, %v8500_v24  ;;  %v4031_v24 = vor.u32 %v4030_v18, %v4027_v30  ;;  %v8693_v57 = vsel %vm7503_vm7, %v4487_v51, %v4488_v23  ;;  %v6967_v30 = vld [vmem:[%s7251_s27 + $0x54] sm:$0xff]   ;;  %v5965_v18 = vrot.slane %v5949_v62, 9  ;;  %v4410_v9 = vrot.slane %v4408_v56, 4  ;;  %v7147_v28 = vld [vmem:[%s7251_s27 + $0x2c] sm:$0x1] }
 0x11e   : > { %6439 = vmatmul.mubr.msk.bf16.gmra.mrb[4].mxu1 %vm733_vm3, %v6964_v29  ;;  %6594 = vmatprep.mubr.msk.bf16.mxu0 %vm733_vm3, %v5929_v46  ;;  %v4046_v46 = vrot.slane %v4044_v50, 5  ;;  %v5931_v29 = vcombine.low %v4013_v4, %v4023_v25  ;;  %v5993_v8 = vcombine.low %v8688_v31, %v8693_v57  ;;  %v4495_v63 = vrot.slane %v8411_v48, 5  ;;  %v7145_v50 = vld [vmem:[%s7251_s27 + $0x28] sm:$0xf]  ;;  %v5951_v25 = vld [vmem:[%s7251_s27 + $0x30] sm:$0xe] }
 0x11f   : > { %6442 = vmatprep.mubr.msk.bf16.mxu1 %vm733_vm3, %v6965_v19  ;;  %v4032_v12 = vrot.slane %v4031_v24, 4  ;;  %v4411_v19 = vrot.slane %v7144_v11, 5  ;;  %v4415_v61 = vrot.slane %v7145_v50, 5  ;;  %v8716_v48 = vsel %vm7503_vm7, %v5977_v41, %v4492_v6  ;;  %v6969_v11 = vld [vmem:[%s7251_s27 + $0x6c] sm:$0xff]   ;;  %v9354_v41 = vld [vmem:[#allocation6_spill] sm:$0xff] }
 0x120   : > { %v4047_v34 = vsel %vm7277_vm4, %v4042_v17, %v4046_v46  ;;  %v4494_v24 = vrot.slane %v4492_v6, 4  ;;  %v4409_v43 = vsel %vm7503_vm7, %v5965_v18, %v4408_v56  ;;  %v5966_v51 = vrot.slane %v5950_v2, 9  ;;  %v5963_v50 = vld [vmem:[%s7251_s27 + $0xc0] sm:$0xe]  ;;  %v7161_v31 = vld [vmem:[%s7251_s27 + $0xc8] sm:$0x1] }
 0x121   : > { %v4037_v4 = vsel %vm7277_vm4, %v4032_v12, %v8656_v5  ;;  %v4412_v23 = vsel %vm7503_vm7, %v4410_v9, %v4411_v19  ;;  %v7146_v5 = vld [vmem:[%s7251_s27 + $0x34] sm:$0xf]  ;;  %v6968_v12 = vld [vmem:[%s7251_s27 + $0x60] sm:$0xff]   ;;  %v5967_v18 = vrot.slane %v5951_v25, 9  ;;  %v4502_v9 = vrot.slane %v8525_v35, 5 }
 0x122   : > { %v4422_v16 = vrot.slane %v7146_v5, 5  ;;  %v8727_v62 = vsel %vm7503_vm7, %v4494_v24, %v4495_v63  ;;  %v5932_v46 = vcombine.low %v4037_v4, %v4047_v34  ;;  %v5982_v17 = vcombine.low %v4409_v43, %v4412_v23  ;;  %v5952_v24 = vld [vmem:[%s7251_s27 + $0x3c] sm:$0xe] }
 0x123   : > { %v5994_v56 = vcombine.low %v8716_v48, %v8727_v62  ;;  %v4425_v6 = vrot.slane %v9354_v41, 5  ;;  %v4416_v35 = vsel %vm7503_vm7, %v5966_v51, %v4415_v61  ;;  %v5979_v5 = vrot.slane %v5963_v50, 9 }
 0x124   : > { %v4424_v19 = vrot.slane %v4422_v16, 4  ;;  %v4423_v23 = vsel %vm7503_vm7, %v5967_v18, %v4422_v16  ;;  %v4509_v51 = vrot.slane %v8618_v52, 5  ;;  %v2486_v57 = vshll.u32 %v7161_v31, 16 }
 0x125   : > { %6595 = vmatmul.mubr.msk.bf16.gmra.mrb[24].mxu0 %vm733_vm3, %v5930_v7  ;;  %v5978_v7 = vrot.slane %v5962_v49, 9 }
 0x126   : > { %6443 = vmatmul.mubr.msk.bf16.gmra.mrb[8].mxu1 %vm733_vm3, %v6966_v47  ;;  %6598 = vmatprep.mubr.msk.bf16.mxu0 %vm733_vm3, %v5931_v29  ;;  %v4418_v47 = vrot.slane %v7147_v28, 5  ;;  %v4499_v29 = vrot.slane %v8476_v39, 5  ;;  %v9355_v39 = vld [vmem:[#allocation7_spill] sm:$0xff]  ;;  %v4426_v25 = vsel %vm7503_vm7, %v4424_v19, %v4425_v6  ;;  %v5968_v28 = vrot.slane %v5952_v24, 9 }
 0x127   : > { %6446 = vmatprep.mubr.msk.bf16.mxu1 %vm733_vm3, %v6967_v30  ;;  %v4417_v30 = vrot.slane %v4415_v61, 4  ;;  %v4429_v49 = vrot.slane %v9355_v39, 5  ;;  %v4506_v61 = vrot.slane %v8528_v58, 5  ;;  %v7148_v39 = vld [vmem:[%s7251_s27 + $0x70] sm:$0xf]  ;;  %v4513_v24 = vrot.slane %v8604_v55, 5 }
 0x128   : > { %v8739_v63 = vsel %vm7503_vm7, %v5978_v7, %v4499_v29  ;;  %v4501_v2 = vrot.slane %v4499_v29, 4  ;;  %v5681_v7 = vld [vmem:[%s7251_s27 + $0x6c] sm:$0xf]  ;;  %v9356_v29 = vld [vmem:[#allocation8_spill] sm:$0xff] }
 0x129   : > { %v4419_v34 = vsel %vm7503_vm7, %v4417_v30, %v4418_v47  ;;  %v4431_v47 = vrot.slane %v4429_v49, 4  ;;  %v6970_v30 = vld [vmem:[%s7251_s27 + $0x78] sm:$0xff]   ;;  %v8770_v16 = vsel %vm7503_vm7, %v5979_v5, %v4506_v61  ;;  %v4508_v18 = vrot.slane %v4506_v61, 4 }
 0x12a   : > { %v8746_v4 = vsel %vm7503_vm7, %v4501_v2, %v4502_v9  ;;  %v5984_v9 = vcombine.low %v4423_v23, %v4426_v25  ;;  %v2299_v19 = vshrl.u32 %v5681_v7, 16  ;;  %v2302_v41 = vshll.u32 %v5681_v7, 16 }
 0x12b   : > { %v5995_v43 = vcombine.low %v8739_v63, %v8746_v4  ;;  %v8775_v58 = vsel %vm7503_vm7, %v4508_v18, %v4509_v51  ;;  %v4430_v6 = vsel %vm7503_vm7, %v5968_v28, %v4429_v49  ;;  %v4516_v49 = vrot.slane %v8649_v21, 5  ;;  %v6972_v51 = vld [vmem:[%s7251_s27 + $0x90] sm:$0xff]   ;;  %v6973_v21 = vld [vmem:[%s7251_s27 + $0x9c] sm:$0xff]  }
 0x12c   : > { %v5996_v50 = vcombine.low %v8770_v16, %v8775_v58  ;;  %v2301_v23 = vrot.slane %v2299_v19, 4  ;;  %v2304_v25 = vrot.slane %v2302_v41, 5  ;;  %v4515_v7 = vrot.slane %v4513_v24, 4 }
 0x12d   : > { %6599 = vmatmul.mubr.msk.bf16.gmra.mrb[28].mxu0 %vm733_vm3, %v5932_v46  ;;  %v5983_v46 = vcombine.low %v4416_v35, %v4419_v34  ;;  %v2308_v35 = vshll.u32 %v7148_v39, 16  ;;  %v2312_v34 = vshrl.u32 %v7148_v39, 16 }
 0x12e   : > { %6447 = vmatmul.mubr.msk.bf16.gmra.mrb[12].mxu1 %vm733_vm3, %v6968_v12  ;;  %6604 = vmatprep.mubr.msk.bf16.mxu0 %vm733_vm3, %v5982_v17  ;;  %v4432_v12 = vrot.slane %v9356_v29, 5  ;;  %v5964_v17 = vld [vmem:[%s7251_s27 + $0xcc] sm:$0xe]  ;;  %v8797_v55 = vsel %vm7503_vm7, %v4515_v7, %v4516_v49 }
 0x12f   : > { %6450 = vmatprep.mubr.msk.bf16.mxu1 %vm733_vm3, %v6969_v11  ;;  %v6971_v11 = vld [vmem:[%s7251_s27 + $0x84] sm:$0xff]   ;;  %v5980_v52 = vrot.slane %v5964_v17, 9  ;;  %v2314_v28 = vrot.slane %v2312_v34, 4  ;;  %v7149_v17 = vld [vmem:[%s7251_s27 + $0x74] sm:$0x1] }
 0x130   : > { %v4433_v2 = vsel %vm7503_vm7, %v4431_v47, %v4432_v12  ;;  %v5687_v47 = vld [vmem:[%s7251_s27 + $0x84] sm:$0xf]  ;;  %v2305_v12 = vor.u32 %v2304_v25, %v2301_v23  ;;  %v6975_v34 = vld [vmem:[%s7251_s27 + $0xb4] sm:$0xff]  }
 0x131   : > { %v8792_v5 = vsel %vm7503_vm7, %v5980_v52, %v4513_v24  ;;  %v5985_v61 = vcombine.low %v4430_v6, %v4433_v2  ;;  %v2350_v18 = vshll.u32 %v5687_v47, 16  ;;  %v5690_v6 = vld [vmem:[%s7251_s27 + $0x90] sm:$0xf]  ;;  %v6974_v2 = vld [vmem:[%s7251_s27 + $0xa8] sm:$0xff]  }
 0x132   : > { %v5997_v29 = vcombine.low %v8792_v5, %v8797_v55  ;;  %v2306_v52 = vrot.slane %v2305_v12, 4  ;;  %v2371_v23 = vshrl.u32 %v5690_v6, 16  ;;  %v2374_v25 = vshll.u32 %v5690_v6, 16 }
 0x133   : > { %v2404_v12 = vshll.u32 %v7152_v60, 16 }
 0x134   : > { %v2376_v14 = vrot.slane %v2374_v25, 5  ;;  %v7155_v25 = vld [vmem:[%s7251_s27 + $0xa4] sm:$0x1] }
 0x135   : > { %6605 = vmatmul.mubr.msk.bf16.vlgmr.msra.gmra.mrb[0].mxu0 %vm733_vm3, %v5983_v46  ;;  %v2310_v46 = vrot.slane %v2308_v35, 5  ;;  %v5693_v35 = vld [vmem:[%s7251_s27 + $0x9c] sm:$0xf]  ;;  %v8839_v6 = vrot.slane %v2404_v12, 5 }
 0x136   : > { %6451 = vmatmul.mubr.msk.bf16.gmra.mrb[16].mxu1 %vm733_vm3, %v6970_v30  ;;  %6608 = vmatprep.mubr.msk.bf16.mxu0 %vm733_vm3, %v5984_v9  ;;  %v2318_v30 = vshll.u32 %v7149_v17, 16  ;;  %v2347_v9 = vshrl.u32 %v5687_v47, 16  ;;  %v2398_v47 = vshll.u32 %v5693_v35, 16  ;;  %v7153_v17 = vld [vmem:[%s7251_s27 + $0x8c] sm:$0x1] }
 0x137   : > { %6454 = vmatprep.mubr.msk.bf16.mxu1 %vm733_vm3, %v6971_v11  ;;  %v2315_v13 = vor.u32 %v2314_v28, %v2310_v46  ;;  %v7150_v11 = vld [vmem:[%s7251_s27 + $0x88] sm:$0xf]  ;;  %v2311_v7 = vsel %vm7277_vm4, %v2306_v52, %v2310_v46 }
 0x138   : > { %v2356_v19 = vshll.u32 %v7150_v11, 16  ;;  %v2360_v41 = vshrl.u32 %v7150_v11, 16  ;;  %v2320_v0 = vrot.slane %v2318_v30, 5  ;;  %v2349_v36 = vrot.slane %v2347_v9, 4 }
 0x139   : > { %v2316_v39 = vrot.slane %v2315_v13, 4  ;;  %v2366_v30 = vshll.u32 %v7153_v17, 16  ;;  %v2373_v9 = vrot.slane %v2371_v23, 4  ;;  %v2400_v11 = vrot.slane %v2398_v47, 5 }
 0x13a   : > { %v8816_v24 = vrot.slane %v2356_v19, 5  ;;  %v2362_v49 = vrot.slane %v2360_v41, 4  ;;  %v6976_v19 = vld [vmem:[%s7251_s27 + $0xc0] sm:$0xff]  }
 0x13b   : > { %v2321_v46 = vsel %vm7277_vm4, %v2316_v39, %v2320_v0  ;;  %v5696_v39 = vld [vmem:[%s7251_s27 + $0xa8] sm:$0xf] }
 0x13c   : > { %v2363_v13 = vor.u32 %v2362_v49, %v8816_v24  ;;  %v5714_v41 = vcombine.low %v2311_v7, %v2321_v46  ;;  %v2414_v7 = vshll.u32 %v7155_v25, 16  ;;  %v2422_v45 = vshll.u32 %v5696_v39, 16 }
 0x13d   : > { %6609 = vmatmul.mubr.msk.bf16.gmra.mrb[4].mxu0 %vm733_vm3, %v5985_v61  ;;  %v7151_v61 = vld [vmem:[%s7251_s27 + $0x94] sm:$0xf] }
 0x13e   : > { %6455 = vmatmul.mubr.msk.bf16.gmra.mrb[20].mxu1 %vm733_vm3, %v6972_v51  ;;  %6612 = vmatprep.mubr.msk.bf16.mxu0 %vm733_vm3, %v5986_v10  ;;  %v2352_v10 = vrot.slane %v2350_v18, 5  ;;  %v2380_v51 = vshll.u32 %v7151_v61, 16  ;;  %v2384_v28 = vshrl.u32 %v7151_v61, 16  ;;  %v2364_v0 = vrot.slane %v2363_v13, 4 }
 0x13f   : > { %6458 = vmatprep.mubr.msk.bf16.mxu1 %vm733_vm3, %v6973_v21  ;;  %v2395_v21 = vshrl.u32 %v5693_v35, 16  ;;  %v7154_v35 = vld [vmem:[%s7251_s27 + $0x98] sm:$0x1]  ;;  %v2419_v61 = vshrl.u32 %v5696_v39, 16  ;;  %v5702_v39 = vld [vmem:[%s7251_s27 + $0xc0] sm:$0xf] }
 0x140   : > { %v2353_v15 = vor.u32 %v2352_v10, %v2349_v36  ;;  %v8836_v26 = vrot.slane %v2380_v51, 5  ;;  %v2368_v36 = vrot.slane %v2366_v30, 5  ;;  %v2377_v10 = vor.u32 %v2376_v14, %v2373_v9  ;;  %v5699_v51 = vld [vmem:[%s7251_s27 + $0xb4] sm:$0xf] }
 0x141   : > { %v2397_v18 = vrot.slane %v2395_v21, 4  ;;  %v2432_v21 = vshrl.u32 %v7156_v27, 16  ;;  %v2443_v20 = vshrl.u32 %v5699_v51, 16  ;;  %v2446_v42 = vshll.u32 %v5699_v51, 16 }
 0x142   : > { %v2354_v52 = vrot.slane %v2353_v15, 4  ;;  %v2369_v46 = vsel %vm7277_vm4, %v2364_v0, %v2368_v36  ;;  %v2378_v15 = vrot.slane %v2377_v10, 4  ;;  %v2416_v30 = vrot.slane %v2414_v7, 5 }
 0x143   : > { %v2401_v23 = vor.u32 %v2400_v11, %v2397_v18  ;;  %v2421_v9 = vrot.slane %v2419_v61, 4  ;;  %v2434_v11 = vrot.slane %v2432_v21, 4  ;;  %v7160_v61 = vld [vmem:[%s7251_s27 + $0xbc] sm:$0x1] }
 0x144   : > { %v2359_v47 = vsel %vm7277_vm4, %v2354_v52, %v8816_v24  ;;  %v2383_v0 = vsel %vm7277_vm4, %v2378_v15, %v8836_v26  ;;  %v2462_v22 = vshll.u32 %v7160_v61, 16 }
 0x145   : > { %6613 = vmatmul.mubr.msk.bf16.gmra.mrb[8].mxu0 %vm733_vm3, %v5987_v40  ;;  %v2408_v40 = vshrl.u32 %v7152_v60, 16  ;;  %v2402_v17 = vrot.slane %v2401_v23, 4  ;;  %v5716_v24 = vcombine.low %v2359_v47, %v2369_v46 }
 0x146   : > { %6459 = vmatmul.mubr.msk.bf16.gmra.mrb[24].mxu1 %vm733_vm3, %v6974_v2  ;;  %6616 = vmatprep.mubr.msk.bf16.mxu0 %vm733_vm3, %v5988_v54  ;;  %v2386_v54 = vrot.slane %v2384_v28, 4 }
 0x147   : > { %6462 = vmatprep.mubr.msk.bf16.mxu1 %vm733_vm3, %v6975_v34  ;;  %v2410_v2 = vrot.slane %v2408_v40, 4  ;;  %v2390_v34 = vshll.u32 %v7154_v35, 16  ;;  %v2407_v10 = vsel %vm7277_vm4, %v2402_v17, %v8839_v6  ;;  %v2488_v17 = vrot.slane %v2486_v57, 5 }
 0x148   : > { %v2387_v49 = vor.u32 %v2386_v54, %v8836_v26  ;;  %v2424_v54 = vrot.slane %v2422_v45, 5  ;;  %v7158_v26 = vld [vmem:[%s7251_s27 + $0xb0] sm:$0x1] }
 0x149   : > { %v2411_v28 = vor.u32 %v2410_v2, %v8839_v6  ;;  %v2392_v60 = vrot.slane %v2390_v34, 5  ;;  %v2438_v35 = vshll.u32 %v7158_v26, 16  ;;  %v2467_v34 = vshrl.u32 %v5702_v39, 16 }
 0x14a   : > { %v2388_v13 = vrot.slane %v2387_v49, 4  ;;  %v2425_v38 = vor.u32 %v2424_v54, %v2421_v9  ;;  %v2470_v6 = vshll.u32 %v5702_v39, 16  ;;  %v7159_v49 = vld [vmem:[%s7251_s27 + $0xc4] sm:$0xf] }
 0x14b   : > { %v2412_v14 = vrot.slane %v2411_v28, 4  ;;  %v2476_v23 = vshll.u32 %v7159_v49, 16  ;;  %v2480_v25 = vshrl.u32 %v7159_v49, 16  ;;  %v2440_v45 = vrot.slane %v2438_v35, 5 }
 0x14c   : > { %v2393_v36 = vsel %vm7277_vm4, %v2388_v13, %v2392_v60  ;;  %v2426_v51 = vrot.slane %v2425_v38, 4  ;;  %v2464_v60 = vrot.slane %v2462_v22, 5 }
 0x14d   : > { %6617 = vmatmul.mubr.msk.bf16.gmra.mrb[12].mxu0 %vm733_vm3, %v5989_v53  ;;  %v2428_v53 = vshll.u32 %v7156_v27, 16  ;;  %v2417_v59 = vsel %vm7277_vm4, %v2412_v14, %v2416_v30  ;;  %v5717_v44 = vcombine.low %v2383_v0, %v2393_v36  ;;  %v2469_v27 = vrot.slane %v2467_v34, 4 }
 0x14e   : > { %6463 = vmatmul.mubr.msk.bf16.gmra.mrb[28].mxu1 %vm733_vm3, %v6976_v19  ;;  %6620 = vmatprep.mubr.msk.bf16.mxu0 %vm733_vm3, %v5990_v33  ;;  %v7157_v33 = vld [vmem:[%s7251_s27 + $0xb8] sm:$0xf]  ;;  %v2445_v19 = vrot.slane %v2443_v20, 4  ;;  %v2478_v21 = vrot.slane %v2476_v23, 5  ;;  %v2482_v47 = vrot.slane %v2480_v25, 4 }
 0x14f   : > { %6484 = vmatprep.mubr.msk.bf16.mxu1 %vm733_vm3, %v5714_v41  ;;  %v2452_v12 = vshll.u32 %v7157_v33, 16  ;;  %v2456_v40 = vshrl.u32 %v7157_v33, 16  ;;  %v2430_v18 = vrot.slane %v2428_v53, 5  ;;  %v2448_v41 = vrot.slane %v2446_v42, 5 }
 0x150   : > { %v2472_v53 = vrot.slane %v2470_v6, 5 }
 0x151   : > { %v2454_v52 = vrot.slane %v2452_v12, 5  ;;  %v2458_v2 = vrot.slane %v2456_v40, 4  ;;  %v2431_v20 = vsel %vm7277_vm4, %v2426_v51, %v2430_v18  ;;  %v2483_v12 = vor.u32 %v2482_v47, %v2478_v21 }
 0x152   : > { %v2473_v33 = vor.u32 %v2472_v53, %v2469_v27 }
 0x153   : > { %v2459_v7 = vor.u32 %v2458_v2, %v2454_v52  ;;  %v2484_v13 = vrot.slane %v2483_v12, 4  ;;  %v8942_v2 = vld [vmem:[%s9288_s2] ss:$0 sm:$0xff] }
 0x154   : > { %v2474_v40 = vrot.slane %v2473_v33, 4 }
 0x155   : > { %6621 = vmatmul.mubr.msk.bf16.gmra.mrb[16].mxu0 %vm733_vm3, %v5991_v37  ;;  %v2435_v37 = vor.u32 %v2434_v11, %v2430_v18  ;;  %v2460_v15 = vrot.slane %v2459_v7, 4  ;;  %v2489_v9 = vsel %vm7277_vm4, %v2484_v13, %v2488_v17 }
 0x156   : > { %6485 = vmatmul.mubr.msk.bf16.vlgmr.msra.gmra.mrb[16].mxu1 %vm733_vm3, %v8645_v1  ;;  %6624 = vmatprep.mubr.msk.bf16.mxu0 %vm733_vm3, %v5992_v3  ;;  %v2449_v1 = vor.u32 %v2448_v41, %v2445_v19  ;;  %v5718_v3 = vcombine.low %v2407_v10, %v2417_v59  ;;  %v2479_v30 = vsel %vm7277_vm4, %v2474_v40, %v2478_v21 }
 0x157   : > { %6488 = vmatprep.mubr.msk.bf16.mxu1 %vm733_vm3, %v5716_v24  ;;  %v2436_v28 = vrot.slane %v2435_v37, 4  ;;  %v2465_v48 = vsel %vm7277_vm4, %v2460_v15, %v2464_v60  ;;  %v5721_v14 = vcombine.low %v2479_v30, %v2489_v9 }
 0x158   : > { %v2450_v46 = vrot.slane %v2449_v1, 4 }
 0x159   : > { %v2441_v42 = vsel %vm7277_vm4, %v2436_v28, %v2440_v45 }
 0x15a   : > { %v5719_v62 = vcombine.low %v2431_v20, %v2441_v42 }
 0x15d   : > { %6625 = vmatmul.mubr.msk.bf16.gmra.mrb[20].mxu0 %vm733_vm3, %v5993_v8  ;;  %v2455_v8 = vsel %vm7277_vm4, %v2450_v46, %v2454_v52 }
 0x15e   : > { %6489 = vmatmul.mubr.msk.bf16.gmra.mrb[20].mxu1 %vm733_vm3, %v5717_v44  ;;  %6628 = vmatprep.mubr.msk.bf16.mxu0 %vm733_vm3, %v5994_v56  ;;  %v5720_v56 = vcombine.low %v2455_v8, %v2465_v48 }
 0x15f   : > { %6492 = vmatprep.mubr.msk.bf16.mxu1 %vm733_vm3, %v5718_v3 }
 0x165   : > { %6629 = vmatmul.mubr.msk.bf16.gmra.mrb[24].mxu0 %vm733_vm3, %v5995_v43 }
 0x166   : > { %6493 = vmatmul.mubr.msk.bf16.gmra.mrb[24].mxu1 %vm733_vm3, %v5719_v62  ;;  %6632 = vmatprep.mubr.msk.bf16.mxu0 %vm733_vm3, %v5996_v50 }
 0x167   : > { %6496 = vmatprep.mubr.msk.bf16.mxu1 %vm733_vm3, %v5720_v56 }
 0x16d   : > { %6633 = vmatmul.mubr.msk.bf16.gmra.mrb[28].mxu0 %vm733_vm3, %v5997_v29 }
 0x16e   : > { %6497 = vmatmul.mubr.msk.bf16.gmra.mrb[28].mxu1 %vm733_vm3, %v5721_v14 }
 0x1e9   : > { %v6436_v63 = vpop.f32.mrb[0].mxu1 }
 0x1ea   : > { %v1899_v4 = vpop.f32.mrb[1].mxu1 }
 0x1eb   : > { %v6437_v43 = vpop.f32.mrb[2].mxu1 }
 0x1ec   : > { %v1902_v16 = vpop.f32.mrb[3].mxu1 }
 0x1f1   : > { %v6440_v58 = vpop.f32.mrb[4].mxu1 }
 0x1f2   : > { %v1915_v50 = vpop.f32.mrb[5].mxu1 }
 0x1f3   : > { %v6441_v54 = vpop.f32.mrb[6].mxu1 }
 0x1f4   : > { %v1918_v18 = vpop.f32.mrb[7].mxu1 }
 0x1f9   : > { %v6444_v11 = vpop.f32.mrb[8].mxu1 }
 0x1fa   : > { %v1931_v24 = vpop.f32.mrb[9].mxu1 }
 0x1fb   : > { %v8927_v32 = vpop.f32.mrb[10].mxu1 }
 0x1fc   : > { %v8929_v19 = vpop.f32.mrb[11].mxu1 }
 0x201   : > { %v8931_v41 = vpop.f32.mrb[12].mxu1 }
 0x202   : > { %v8933_v5 = vpop.f32.mrb[13].mxu1 }
 0x203   : > { %v8935_v55 = vpop.f32.mrb[14].mxu1 }
 0x204   : > { %v8937_v29 = vpop.f32.mrb[15].mxu1 }
 0x208   : > { %v6606_v52 = vpop.f32.mrb[0].mxu0 }
 0x209   : > { %v6638_v39 = vadd.f32 %v6606_v52, %v6436_v63  ;;  %v4653_v0 = vpop.f32.mrb[1].mxu0 }
 0x20a   : > { %v6639_v36 = vadd.f32 %v4653_v0, %v1899_v4  ;;  %v6607_v10 = vpop.f32.mrb[2].mxu0 }
 0x20b   : > { %v8945_v59 = vadd.f32 %v6638_v39, %v8942_v2  ;;  %v6640_v38 = vadd.f32 %v6607_v10, %v6437_v43  ;;  %v4656_v37 = vpop.f32.mrb[3].mxu0 }
 0x20c   : > { %v8948_v26 = vadd.f32 %v6639_v36, %v8942_v2  ;;  %v6641_v35 = vadd.f32 %v4656_v37, %v1902_v16 }
 0x20d   : > { %v4853_v34 = vand.u32 2147483647, %v8945_v59  ;;  %v8952_v6 = vadd.f32 %v6640_v38, %v8942_v2  ;;  %vm5045_vm8 = vcmp.ge.f32.partialorder %v8945_v59, 0.0 }
 0x20e   : > { %v4851_v49 = vand.u32 2147483647, %v8948_v26  ;;  %v8956_v23 = vadd.f32 %v6641_v35, %v8942_v2  ;;  %vm5043_vm9 = vcmp.ge.f32.partialorder %v8948_v26, 0.0 }
 0x20f   : > { %v4885_v25 = vsub.f32 0.0, %v4853_v34  ;;  %v4854_v1 = vand.u32 2147483647, %v8952_v6  ;;  %vm5046_vm10 = vcmp.ge.f32.partialorder %v8952_v6, 0.0 }
 0x210   : > { %v4883_v7 = vsub.f32 0.0, %v4851_v49  ;;  %v4852_v61 = vand.u32 2147483647, %v8956_v23  ;;  %v6610_v22 = vpop.f32.mrb[4].mxu0  ;;  %vm5044_vm11 = vcmp.ge.f32.partialorder %v8956_v23, 0.0 }
 0x211   : > { %v4919_v44 = vmul.f32 1.442695, %v4885_v25  ;;  %v4886_v3 = vsub.f32 0.0, %v4854_v1  ;;  %v6642_v51 = vadd.f32 %v6610_v22, %v6440_v58  ;;  %v4669_v28 = vpop.f32.mrb[5].mxu0 }
 0x212   : > { %v4915_v45 = vmul.f32 1.442695, %v4883_v7  ;;  %v4884_v27 = vsub.f32 0.0, %v4852_v61  ;;  %v6643_v53 = vadd.f32 %v4669_v28, %v1915_v50  ;;  %v6611_v21 = vpop.f32.mrb[6].mxu0 }
 0x213   : > { %6977 = vpow2.f32 %v4919_v44  ;;  %v4921_v47 = vmul.f32 1.442695, %v4886_v3  ;;  %v8961_v46 = vadd.f32 %v6642_v51, %v8942_v2  ;;  %v6644_v15 = vadd.f32 %v6611_v21, %v6441_v54  ;;  %v4672_v60 = vpop.f32.mrb[7].mxu0 }
 0x214   : > { %6979 = vpow2.f32 %v4915_v45  ;;  %v4917_v20 = vmul.f32 1.442695, %v4884_v27  ;;  %v8964_v42 = vadd.f32 %v6643_v53, %v8942_v2  ;;  %v6645_v33 = vadd.f32 %v4672_v60, %v1918_v18 }
 0x215   : > { %6981 = vpow2.f32 %v4921_v47  ;;  %v4857_v12 = vand.u32 2147483647, %v8961_v46  ;;  %v8968_v31 = vadd.f32 %v6644_v15, %v8942_v2  ;;  %vm5049_vm12 = vcmp.ge.f32.partialorder %v8961_v46, 0.0 }
 0x216   : > { %6983 = vpow2.f32 %v4917_v20  ;;  %v4855_v57 = vand.u32 2147483647, %v8964_v42  ;;  %v8972_v8 = vadd.f32 %v6645_v33, %v8942_v2  ;;  %vm5047_vm13 = vcmp.ge.f32.partialorder %v8964_v42, 0.0 }
 0x217   : > { %v4889_v48 = vsub.f32 0.0, %v4857_v12  ;;  %v4858_v62 = vand.u32 2147483647, %v8968_v31  ;;  %vm5050_vm14 = vcmp.ge.f32.partialorder %v8968_v31, 0.0 }
 0x218   : > { %v4887_v56 = vsub.f32 0.0, %v4855_v57  ;;  %v4856_v40 = vand.u32 2147483647, %v8972_v8  ;;  %v6614_v13 = vpop.f32.mrb[8].mxu0  ;;  %vm5048_vm15 = vcmp.ge.f32.partialorder %v8972_v8, 0.0 }
 0x219   : > { %v4927_v17 = vmul.f32 1.442695, %v4889_v48  ;;  %v4890_v30 = vsub.f32 0.0, %v4858_v62  ;;  %v6646_v9 = vadd.f32 %v6614_v13, %v6444_v11  ;;  %v4685_v14 = vpop.f32.mrb[9].mxu0 }
 0x21a   : > { %v4923_v63 = vmul.f32 1.442695, %v4887_v56  ;;  %v4888_v4 = vsub.f32 0.0, %v4856_v40  ;;  %v6647_v43 = vadd.f32 %v4685_v14, %v1931_v24  ;;  %v6615_v16 = vpop.f32.mrb[10].mxu0 }
 0x21b   : > { %6985 = vpow2.f32 %v4927_v17  ;;  %v4929_v58 = vmul.f32 1.442695, %v4890_v30  ;;  %v8977_v50 = vadd.f32 %v6646_v9, %v8942_v2  ;;  %v6648_v54 = vadd.f32 %v6615_v16, %v8927_v32  ;;  %v4688_v18 = vpop.f32.mrb[11].mxu0 }
 0x21c   : > { %6987 = vpow2.f32 %v4923_v63  ;;  %v4925_v52 = vmul.f32 1.442695, %v4888_v4  ;;  %v8981_v39 = vadd.f32 %v6647_v43, %v8942_v2  ;;  %v6649_v11 = vadd.f32 %v4688_v18, %v8929_v19 }
 0x21d   : > { %v6978_v0 = vpop.eup %6977  ;;  %6989 = vpow2.f32 %v4929_v58  ;;  %v4861_v24 = vand.u32 2147483647, %v8977_v50  ;;  %v8986_v36 = vadd.f32 %v6648_v54, %v8942_v2  ;;  %vm5053_vm0 = vcmp.ge.f32.partialorder %v8977_v50, 0.0 }
 0x21e   : > { %v6980_v10 = vpop.eup %6979  ;;  %v4981_v38 = vadd.f32 1.0, %v6978_v0  ;;  %6991 = vpow2.f32 %v4925_v52  ;;  %v4859_v32 = vand.u32 2147483647, %v8981_v39  ;;  %v8991_v7 = vadd.f32 %v6649_v11, %v8942_v2 }
 0x21f   : > { %v6982_v37 = vpop.eup %6981  ;;  %v4979_v35 = vadd.f32 1.0, %v6980_v10  ;;  %v4893_v34 = vsub.f32 0.0, %v4861_v24  ;;  %v4862_v49 = vand.u32 2147483647, %v8986_v36  ;;  %vm5051_vm1 = vcmp.ge.f32.partialorder %v8981_v39, 0.0 }
 0x220   : > { %v6984_v25 = vpop.eup %6983  ;;  %6993 = vrcp.f32 %v4981_v38  ;;  %v4982_v19 = vadd.f32 1.0, %v6982_v37  ;;  %v4891_v1 = vsub.f32 0.0, %v4859_v32  ;;  %v6618_v61 = vpop.f32.mrb[12].mxu0  ;;  %v4860_v45 = vand.u32 2147483647, %v8991_v7 }
 0x221   : > { %6995 = vrcp.f32 %v4979_v35  ;;  %v4980_v22 = vadd.f32 1.0, %v6984_v25  ;;  %v4935_v44 = vmul.f32 1.442695, %v4893_v34  ;;  %v4894_v3 = vsub.f32 0.0, %v4862_v49  ;;  %v4701_v51 = vpop.f32.mrb[13].mxu0 }
 0x222   : > { %6997 = vrcp.f32 %v4982_v19  ;;  %v4931_v28 = vmul.f32 1.442695, %v4891_v1  ;;  %v6619_v27 = vpop.f32.mrb[14].mxu0  ;;  %v6650_v21 = vadd.f32 %v6618_v61, %v8931_v41  ;;  %v6651_v47 = vadd.f32 %v4701_v51, %v8933_v5 }
 0x223   : > { %6999 = vrcp.f32 %v4980_v22  ;;  %v4937_v53 = vmul.f32 1.442695, %v4894_v3  ;;  %v4704_v15 = vpop.f32.mrb[15].mxu0  ;;  %v4892_v60 = vsub.f32 0.0, %v4860_v45  ;;  %v6652_v20 = vadd.f32 %v6619_v27, %v8935_v55 }
 0x224   : > { %7001 = vpow2.f32 %v4935_v44  ;;  %v6653_v33 = vadd.f32 %v4704_v15, %v8937_v29  ;;  %v9000_v57 = vadd.f32 %v6650_v21, %v8942_v2  ;;  %v9003_v48 = vadd.f32 %v6651_v47, %v8942_v2 }
 0x225   : > { %v6986_v12 = vpop.eup %6985  ;;  %7003 = vpow2.f32 %v4931_v28  ;;  %v9007_v62 = vadd.f32 %v6652_v20, %v8942_v2  ;;  %v4933_v30 = vmul.f32 1.442695, %v4892_v60  ;;  %vm5054_vm2 = vcmp.ge.f32.partialorder %v8986_v36, 0.0 }
 0x226   : > { %v6988_v41 = vpop.eup %6987  ;;  %v4985_v5 = vadd.f32 1.0, %v6986_v12  ;;  %7005 = vpow2.f32 %v4937_v53  ;;  %v4865_v56 = vand.u32 2147483647, %v9000_v57  ;;  %v4863_v40 = vand.u32 2147483647, %v9003_v48 }
 0x227   : > { %v6990_v55 = vpop.eup %6989  ;;  %v4983_v29 = vadd.f32 1.0, %v6988_v41  ;;  %v4866_v9 = vand.u32 2147483647, %v9007_v62  ;;  %v9015_v52 = vadd.f32 %v6653_v33, %v8942_v2  ;;  %vm5052_vm3 = vcmp.ge.f32.partialorder %v8991_v7, 0.0 }
 0x228   : > { %v6992_v13 = vpop.eup %6991  ;;  %7007 = vrcp.f32 %v4985_v5  ;;  %v4986_v17 = vadd.f32 1.0, %v6990_v55  ;;  %v6622_v14 = vpop.f32.mrb[16].mxu0  ;;  %v4897_v4 = vsub.f32 0.0, %v4865_v56  ;;  %v4895_v43 = vsub.f32 0.0, %v4863_v40 }
 0x229   : > { %7009 = vrcp.f32 %v4983_v29  ;;  %v4984_v63 = vadd.f32 1.0, %v6992_v13  ;;  %v6486_v16 = vpop.f32.mrb[16].mxu1  ;;  %v4717_v58 = vpop.f32.mrb[17].mxu0  ;;  %v4898_v18 = vsub.f32 0.0, %v4866_v9  ;;  %v4864_v25 = vand.u32 2147483647, %v9015_v52 }
 0x22a   : > { %v6994_v54 = vpop.eup %6993  ;;  %7011 = vrcp.f32 %v4986_v17  ;;  %v2689_v11 = vpop.f32.mrb[17].mxu1  ;;  %v4943_v38 = vmul.f32 1.442695, %v4897_v4  ;;  %v4939_v32 = vmul.f32 1.442695, %v4895_v43  ;;  %v6654_v5 = vadd.f32 %v6622_v14, %v6486_v16 }
 0x22b   : > { %v9017_v0 = vpop.f32.mrb[18].mxu0  ;;  %v6996_v24 = vpop.eup %6995  ;;  %v5077_v10 = vsub.f32 1.0, %v6994_v54  ;;  %7013 = vrcp.f32 %v4984_v63  ;;  %v4945_v49 = vmul.f32 1.442695, %v4898_v18  ;;  %v4896_v33 = vsub.f32 0.0, %v4864_v25 }
 0x22c   : > { %v6487_v37 = vpop.f32.mrb[18].mxu1  ;;  %v6998_v35 = vpop.eup %6997  ;;  %v5075_v34 = vsub.f32 1.0, %v6996_v24  ;;  %7015 = vpow2.f32 %v4933_v30  ;;  %v6655_v13 = vadd.f32 %v4717_v58, %v2689_v11  ;;  %v9057_v14 = vadd.f32 %v6654_v5, %v8942_v2 }
 0x22d   : > { %v9021_v19 = vpop.f32.mrb[19].mxu1  ;;  %v7000_v1 = vpop.eup %6999  ;;  %v5109_v61 = vsel %vm5045_vm8, %v6994_v54, %v5077_v10  ;;  %v5078_v22 = vsub.f32 1.0, %v6998_v35  ;;  %7017 = vpow2.f32 %v4943_v38  ;;  %v4941_v40 = vmul.f32 1.442695, %v4896_v33 }
 0x22e   : > { %v9026_v44 = vpop.f32.mrb[19].mxu0  ;;  %v7002_v3 = vpop.eup %7001  ;;  %v5141_v51 = vmul.f32 %v5109_v61, %v8945_v59  ;;  %v5107_v28 = vsel %vm5043_vm9, %v6996_v24, %v5075_v34  ;;  %v5076_v45 = vsub.f32 1.0, %v7000_v1  ;;  %7019 = vpow2.f32 %v4939_v32 }
 0x22f   : > { %v7004_v27 = vpop.eup %7003  ;;  %v5139_v53 = vmul.f32 %v5107_v28, %v8948_v26  ;;  %v5110_v21 = vsel %vm5046_vm10, %v6998_v35, %v5078_v22  ;;  %v4989_v47 = vadd.f32 1.0, %v7002_v3  ;;  %7021 = vpow2.f32 %v4945_v49 }
 0x230   : > { %v7006_v15 = vpop.eup %7005  ;;  %v5142_v59 = vmul.f32 %v5110_v21, %v8952_v6  ;;  %v5108_v60 = vsel %vm5044_vm11, %v7000_v1, %v5076_v45  ;;  %v4987_v20 = vadd.f32 1.0, %v7004_v27  ;;  %v9040_v12 = vpop.f32.mrb[20].mxu0  ;;  %v9065_v58 = vadd.f32 %v6655_v13, %v8942_v2 }
 0x231   : > { %v5140_v26 = vmul.f32 %v5108_v60, %v8956_v23  ;;  %7023 = vrcp.f32 %v4989_v47  ;;  %v4990_v41 = vadd.f32 1.0, %v7006_v15  ;;  %v9048_v55 = vpop.f32.mrb[20].mxu1  ;;  %v9050_v6 = vpop.f32.mrb[21].mxu0  ;;  %v6656_v18 = vadd.f32 %v9017_v0, %v6487_v37 }
 0x232   : > { %v7008_v29 = vpop.eup %7007  ;;  %v6090_v56 = vpack.c.bf16 %v5142_v59, %v5141_v51  ;;  %7025 = vrcp.f32 %v4987_v20  ;;  %v9052_v17 = vpop.f32.mrb[21].mxu1  ;;  %v4869_v32 = vand.u32 2147483647, %v9057_v14  ;;  %v4867_v0 = vand.u32 2147483647, %v9065_v58 }
 0x233   : > { %v9054_v30 = vpop.f32.mrb[22].mxu0  ;;  %v7010_v9 = vpop.eup %7009  ;;  %v6085_v23 = vpack.c.bf16 %v5140_v26, %v5139_v53  ;;  %v5081_v63 = vsub.f32 1.0, %v7008_v29  ;;  %7027 = vrcp.f32 %v4990_v41  ;;  %vm5057_vm4 = vcmp.ge.f32.partialorder %v9000_v57, 0.0 }
 0x234   : > { %v9059_v4 = vpop.f32.mrb[22].mxu1  ;;  %v9061_v43 = vpop.f32.mrb[23].mxu0  ;;  %6162 = vst [vmem:[%s9045_s23 + $0x8] sm:$0xff] %v6090_v56   ;;  %v5079_v54 = vsub.f32 1.0, %v7010_v9  ;;  %7029 = vpow2.f32 %v4941_v40  ;;  %v4901_v3 = vsub.f32 0.0, %v4869_v32  ;;  %v4899_v27 = vsub.f32 0.0, %v4867_v0 }
 0x235   : > { %v7012_v16 = vpop.eup %7011  ;;  %v9068_v11 = vpop.f32.mrb[23].mxu1  ;;  %6086 = vst [vmem:[%s9045_s23] sm:$0xff] %v6085_v23   ;;  %v5113_v10 = vsel %vm5049_vm12, %v7008_v29, %v5081_v63  ;;  %v6657_v23 = vadd.f32 %v9026_v44, %v9021_v19  ;;  %v6658_v63 = vadd.f32 %v9040_v12, %v9048_v55  ;;  %vm5055_vm5 = vcmp.ge.f32.partialorder %v9003_v48, 0.0 }
 0x236   : > { %v7014_v24 = vpop.eup %7013  ;;  %v5082_v38 = vsub.f32 1.0, %v7012_v16  ;;  %v5145_v34 = vmul.f32 %v5113_v10, %v8961_v46  ;;  %v5111_v49 = vsel %vm5047_vm13, %v7010_v9, %v5079_v54  ;;  %v4951_v15 = vmul.f32 1.442695, %v4901_v3 }
 0x237   : > { %v7016_v35 = vpop.eup %7015  ;;  %v5080_v25 = vsub.f32 1.0, %v7014_v24  ;;  %v5143_v1 = vmul.f32 %v5111_v49, %v8964_v42  ;;  %v4947_v33 = vmul.f32 1.442695, %v4899_v27  ;;  %v9117_v19 = vadd.f32 %v6657_v23, %v8942_v2 }
 0x238   : > { %v7018_v37 = vpop.eup %7017  ;;  %v5114_v61 = vsel %vm5050_vm14, %v7012_v16, %v5082_v38  ;;  %v4988_v22 = vadd.f32 1.0, %v7016_v35  ;;  %v9085_v53 = vpop.f32.mrb[24].mxu0  ;;  %v6659_v3 = vadd.f32 %v9050_v6, %v9052_v17  ;;  %vm5058_vm6 = vcmp.ge.f32.partialorder %v9007_v62, 0.0 }
 0x239   : > { %v7020_v51 = vpop.eup %7019  ;;  %v5146_v28 = vmul.f32 %v5114_v61, %v8968_v31  ;;  %v5112_v46 = vsel %vm5048_vm15, %v7014_v24, %v5080_v25  ;;  %v4993_v45 = vadd.f32 1.0, %v7018_v37  ;;  %v9088_v59 = vpop.f32.mrb[24].mxu1  ;;  %v4868_v49 = vand.u32 2147483647, %v9117_v19 }
 0x23a   : > { %v7022_v21 = vpop.eup %7021  ;;  %v5144_v47 = vmul.f32 %v5112_v46, %v8972_v8  ;;  %7031 = vrcp.f32 %v4988_v22  ;;  %v4991_v42 = vadd.f32 1.0, %v7020_v51  ;;  %v9090_v60 = vpop.f32.mrb[25].mxu0  ;;  %v9098_v8 = vadd.f32 %v6656_v18, %v8942_v2 }
 0x23b   : > { %v6100_v20 = vpack.c.bf16 %v5146_v28, %v5145_v34  ;;  %7033 = vrcp.f32 %v4993_v45  ;;  %v4994_v31 = vadd.f32 1.0, %v7022_v21  ;;  %v9092_v26 = vpop.f32.mrb[25].mxu1  ;;  %v9094_v41 = vpop.f32.mrb[26].mxu0  ;;  %v6660_v51 = vadd.f32 %v9054_v30, %v9059_v4 }
 0x23c   : > { %v7024_v5 = vpop.eup %7023  ;;  %v6095_v29 = vpack.c.bf16 %v5144_v47, %v5143_v1  ;;  %7035 = vrcp.f32 %v4991_v42  ;;  %v9100_v56 = vpop.f32.mrb[26].mxu1  ;;  %v4870_v24 = vand.u32 2147483647, %v9098_v8  ;;  %v9129_v1 = vadd.f32 %v6658_v63, %v8942_v2 }
 0x23d   : > { %v9102_v40 = vpop.f32.mrb[27].mxu0  ;;  %v7026_v13 = vpop.eup %7025  ;;  %6164 = vst [vmem:[%s9045_s23 + $0x18] sm:$0xff] %v6100_v20   ;;  %v5085_v9 = vsub.f32 1.0, %v7024_v5  ;;  %7037 = vrcp.f32 %v4994_v31  ;;  %v6661_v28 = vadd.f32 %v9061_v43, %v9068_v11  ;;  %v9153_v11 = vadd.f32 %v6659_v3, %v8942_v2 }
 0x23e   : > { %v9109_v16 = vpop.f32.mrb[27].mxu1  ;;  %v7028_v54 = vpop.eup %7027  ;;  %6163 = vst [vmem:[%s9045_s23 + $0x10] sm:$0xff] %v6095_v29   ;;  %v5083_v18 = vsub.f32 1.0, %v7026_v13  ;;  %7039 = vpow2.f32 %v4951_v15  ;;  %v4902_v12 = vsub.f32 0.0, %v4870_v24  ;;  %v4873_v21 = vand.u32 2147483647, %v9129_v1 }
 0x23f   : > { %v7030_v10 = vpop.eup %7029  ;;  %v5117_v38 = vsel %vm5053_vm0, %v7024_v5, %v5085_v9  ;;  %v5086_v32 = vsub.f32 1.0, %v7028_v54  ;;  %7041 = vpow2.f32 %v4947_v33  ;;  %v9159_v33 = vadd.f32 %v6660_v51, %v8942_v2 }
 0x240   : > { %v4992_v44 = vadd.f32 1.0, %v7030_v10  ;;  %v5149_v55 = vmul.f32 %v5117_v38, %v8977_v50  ;;  %v5115_v35 = vsel %vm5051_vm1, %v7026_v13, %v5083_v18  ;;  %v9125_v25 = vpop.f32.mrb[28].mxu0  ;;  %v4953_v37 = vmul.f32 1.442695, %v4902_v12 }
 0x241   : > { %v5118_v34 = vsel %vm5054_vm2, %v7028_v54, %v5086_v32  ;;  %v9131_v61 = vpop.f32.mrb[28].mxu1  ;;  %v9133_v22 = vpop.f32.mrb[29].mxu0  ;;  %v4900_v50 = vsub.f32 0.0, %v4868_v49  ;;  %v5147_v30 = vmul.f32 %v5115_v35, %v8981_v39  ;;  %v4905_v31 = vsub.f32 0.0, %v4873_v21 }
 0x242   : > { %v5150_v0 = vmul.f32 %v5118_v34, %v8986_v36  ;;  %7043 = vrcp.f32 %v4992_v44  ;;  %v9141_v36 = vpop.f32.mrb[29].mxu1  ;;  %v9143_v46 = vpop.f32.mrb[30].mxu0  ;;  %v6662_v5 = vadd.f32 %v9085_v53, %v9088_v59  ;;  %v4871_v9 = vand.u32 2147483647, %v9153_v11 }
 0x243   : > { %7045 = vpow2.f32 %v4953_v37  ;;  %v9147_v47 = vpop.f32.mrb[30].mxu1  ;;  %v9149_v6 = vpop.f32.mrb[31].mxu0  ;;  %v4949_v43 = vmul.f32 1.442695, %v4900_v50  ;;  %v9170_v24 = vadd.f32 %v6661_v28, %v8942_v2  ;;  %v4959_v10 = vmul.f32 1.442695, %v4905_v31 }
 0x244   : > { %v7032_v45 = vpop.eup %7031  ;;  %v6110_v27 = vpack.c.bf16 %v5150_v0, %v5149_v55  ;;  %v9155_v42 = vpop.f32.mrb[31].mxu1  ;;  %v4903_v38 = vsub.f32 0.0, %v4871_v9  ;;  %vm5056_vm7 = vcmp.ge.f32.partialorder %v9015_v52, 0.0  ;;  %v4874_v0 = vand.u32 2147483647, %v9159_v33 }
 0x245   : > { %v7034_v17 = vpop.eup %7033  ;;  %v5084_v4 = vsub.f32 1.0, %v7032_v45  ;;  %7047 = vpow2.f32 %v4949_v43  ;;  %v4872_v37 = vand.u32 2147483647, %v9170_v24  ;;  %vm5061_vm8 = vcmp.ge.f32.partialorder %v9057_v14, 0.0 }
 0x246   : > { %v7036_v15 = vpop.eup %7035  ;;  %6166 = vst [vmem:[%s9045_s23 + $0x28] sm:$0xff] %v6110_v27   ;;  %v5089_v20 = vsub.f32 1.0, %v7034_v17  ;;  %v4955_v34 = vmul.f32 1.442695, %v4903_v38  ;;  %vm5059_vm9 = vcmp.ge.f32.partialorder %v9065_v58, 0.0  ;;  %vm5062_vm10 = vcmp.ge.f32.partialorder %v9098_v8, 0.0 }
 0x247   : > { %v7038_v29 = vpop.eup %7037  ;;  %v5116_v39 = vsel %vm5052_vm3, %v7032_v45, %v5084_v4  ;;  %v5087_v13 = vsub.f32 1.0, %v7036_v15  ;;  %v4904_v28 = vsub.f32 0.0, %v4872_v37  ;;  %v9183_v45 = vadd.f32 %v6662_v5, %v8942_v2 }
 0x248   : > { %v7040_v23 = vpop.eup %7039  ;;  %v5148_v63 = vmul.f32 %v5116_v39, %v8991_v7  ;;  %v5121_v54 = vsel %vm5057_vm4, %v7034_v17, %v5089_v20  ;;  %v5090_v18 = vsub.f32 1.0, %v7038_v29  ;;  %v6663_v17 = vadd.f32 %v9090_v60, %v9092_v26 }
 0x249   : > { %v7042_v53 = vpop.eup %7041  ;;  %v4997_v59 = vadd.f32 1.0, %v7040_v23  ;;  %v5119_v44 = vsel %vm5055_vm5, %v7036_v15, %v5087_v13  ;;  %v5153_v55 = vmul.f32 %v5121_v54, %v9000_v57  ;;  %v4957_v43 = vmul.f32 1.442695, %v4904_v28 }
 0x24a   : > { %v6105_v32 = vpack.c.bf16 %v5148_v63, %v5147_v30  ;;  %v5122_v12 = vsel %vm5058_vm6, %v7038_v29, %v5090_v18  ;;  %v4995_v7 = vadd.f32 1.0, %v7042_v53  ;;  %v5151_v50 = vmul.f32 %v5119_v44, %v9003_v48 }
 0x24b   : > { %v5154_v35 = vmul.f32 %v5122_v12, %v9007_v62  ;;  %7049 = vrcp.f32 %v4997_v59  ;;  %v4906_v62 = vsub.f32 0.0, %v4874_v0  ;;  %v6664_v30 = vadd.f32 %v9094_v41, %v9100_v56 }
 0x24c   : > { %v7044_v49 = vpop.eup %7043  ;;  %6165 = vst [vmem:[%s9045_s23 + $0x20] sm:$0xff] %v6105_v32   ;;  %7051 = vrcp.f32 %v4995_v7  ;;  %v4877_v15 = vand.u32 2147483647, %v9183_v45  ;;  %v9193_v31 = vadd.f32 %v6663_v17, %v8942_v2  ;;  %v6665_v39 = vadd.f32 %v9102_v40, %v9109_v16 }
 0x24d   : > { %v6120_v3 = vpack.c.bf16 %v5154_v35, %v5153_v55  ;;  %v5088_v51 = vsub.f32 1.0, %v7044_v49  ;;  %7053 = vpow2.f32 %v4959_v10  ;;  %v7046_v57 = vpop.eup %7045  ;;  %v4961_v4 = vmul.f32 1.442695, %v4906_v62 }
 0x24e   : > { %7055 = vpow2.f32 %v4955_v34  ;;  %v4998_v21 = vadd.f32 1.0, %v7046_v57  ;;  %v9196_v5 = vadd.f32 %v6664_v30, %v8942_v2  ;;  %v4909_v26 = vsub.f32 0.0, %v4877_v15 }
 0x24f   : > { %6168 = vst [vmem:[%s9045_s23 + $0x38] sm:$0xff] %v6120_v3   ;;  %v5120_v27 = vsel %vm5056_vm7, %v7044_v49, %v5088_v51  ;;  %v7048_v20 = vpop.eup %7047  ;;  %v4875_v41 = vand.u32 2147483647, %v9193_v31  ;;  %v6666_v63 = vadd.f32 %v9125_v25, %v9131_v61  ;;  %v6667_v54 = vadd.f32 %v9133_v22, %v9141_v36 }
 0x250   : > { %v5152_v48 = vmul.f32 %v5120_v27, %v9015_v52  ;;  %7057 = vrcp.f32 %v4998_v21  ;;  %v4996_v60 = vadd.f32 1.0, %v7048_v20  ;;  %v4878_v52 = vand.u32 2147483647, %v9196_v5 }
 0x251   : > { %7059 = vpow2.f32 %v4961_v4  ;;  %v4967_v56 = vmul.f32 1.442695, %v4909_v26  ;;  %v4907_v9 = vsub.f32 0.0, %v4875_v41  ;;  %v9208_v59 = vadd.f32 %v6665_v39, %v8942_v2 }
 0x252   : > { %v6115_v29 = vpack.c.bf16 %v5152_v48, %v5151_v50  ;;  %7061 = vpow2.f32 %v4957_v43  ;;  %v4910_v23 = vsub.f32 0.0, %v4878_v52  ;;  %v6668_v10 = vadd.f32 %v9143_v46, %v9147_v47 }
 0x253   : > { %7063 = vrcp.f32 %v4996_v60  ;;  %v4963_v40 = vmul.f32 1.442695, %v4907_v9  ;;  %v9215_v16 = vadd.f32 %v6666_v63, %v8942_v2  ;;  %v4876_v32 = vand.u32 2147483647, %v9208_v59 }
 0x254   : > { %6167 = vst [vmem:[%s9045_s23 + $0x30] sm:$0xff] %v6115_v29   ;;  %7065 = vpow2.f32 %v4967_v56  ;;  %v4969_v36 = vmul.f32 1.442695, %v4910_v23  ;;  %vm5060_vm11 = vcmp.ge.f32.partialorder %v9117_v19, 0.0  ;;  %v9223_v35 = vadd.f32 %v6667_v54, %v8942_v2 }
 0x255   : > { %v7050_v13 = vpop.eup %7049  ;;  %7067 = vpow2.f32 %v4963_v40  ;;  %v4908_v46 = vsub.f32 0.0, %v4876_v32  ;;  %v4881_v47 = vand.u32 2147483647, %v9215_v16  ;;  %v9226_v34 = vadd.f32 %v6668_v10, %v8942_v2 }
 0x256   : > { %v7052_v18 = vpop.eup %7051  ;;  %v5093_v53 = vsub.f32 1.0, %v7050_v13  ;;  %v4879_v62 = vand.u32 2147483647, %v9223_v35  ;;  %v6669_v29 = vadd.f32 %v9149_v6, %v9155_v42  ;;  %vm5065_vm12 = vcmp.ge.f32.partialorder %v9129_v1, 0.0 }
 0x257   : > { %v7054_v38 = vpop.eup %7053  ;;  %v5091_v44 = vsub.f32 1.0, %v7052_v18  ;;  %v4965_v37 = vmul.f32 1.442695, %v4908_v46  ;;  %v4913_v50 = vsub.f32 0.0, %v4881_v47  ;;  %vm5063_vm13 = vcmp.ge.f32.partialorder %v9153_v11, 0.0 }
 0x258   : > { %v7056_v25 = vpop.eup %7055  ;;  %v5125_v61 = vsel %vm5061_vm8, %v7050_v13, %v5093_v53  ;;  %v5001_v22 = vadd.f32 1.0, %v7054_v38  ;;  %v4911_v4 = vsub.f32 0.0, %v4879_v62  ;;  %v9242_v39 = vadd.f32 %v6669_v29, %v8942_v2 }
 0x259   : > { %v4999_v12 = vadd.f32 1.0, %v7056_v25  ;;  %v5157_v55 = vmul.f32 %v5125_v61, %v9057_v14  ;;  %v5123_v51 = vsel %vm5059_vm9, %v7052_v18, %v5091_v44  ;;  %v4882_v14 = vand.u32 2147483647, %v9226_v34 }
 0x25a   : > { %7069 = vrcp.f32 %v5001_v22  ;;  %v7058_v7 = vpop.eup %7057  ;;  %v4975_v17 = vmul.f32 1.442695, %v4913_v50  ;;  %v5155_v15 = vmul.f32 %v5123_v51, %v9065_v58  ;;  %v4971_v52 = vmul.f32 1.442695, %v4911_v4 }
 0x25b   : > { %7071 = vrcp.f32 %v4999_v12  ;;  %v7060_v49 = vpop.eup %7059  ;;  %v5094_v0 = vsub.f32 1.0, %v7058_v7  ;;  %v4914_v20 = vsub.f32 0.0, %v4882_v14  ;;  %v4880_v42 = vand.u32 2147483647, %v9242_v39 }
 0x25c   : > { %7073 = vpow2.f32 %v4969_v36  ;;  %v7062_v3 = vpop.eup %7061  ;;  %v5002_v57 = vadd.f32 1.0, %v7060_v49  ;;  %vm5066_vm14 = vcmp.ge.f32.partialorder %v9159_v33, 0.0  ;;  %vm5064_vm15 = vcmp.ge.f32.partialorder %v9170_v24, 0.0 }
 0x25d   : > { %v7064_v28 = vpop.eup %7063  ;;  %v5126_v27 = vsel %vm5062_vm10, %v7058_v7, %v5094_v0  ;;  %v5000_v21 = vadd.f32 1.0, %v7062_v3  ;;  %7075 = vpow2.f32 %v4965_v37  ;;  %v4977_v56 = vmul.f32 1.442695, %v4914_v20 }
 0x25e   : > { %v5158_v30 = vmul.f32 %v5126_v27, %v9098_v8  ;;  %v5092_v48 = vsub.f32 1.0, %v7064_v28  ;;  %7077 = vrcp.f32 %v5002_v57  ;;  %v7066_v43 = vpop.eup %7065  ;;  %vm5069_vm0 = vcmp.ge.f32.partialorder %v9183_v45, 0.0 }
 0x25f   : > { %7079 = vrcp.f32 %v5000_v21  ;;  %v5005_v41 = vadd.f32 1.0, %v7066_v43  ;;  %v7068_v58 = vpop.eup %7067  ;;  %vm5067_vm1 = vcmp.ge.f32.partialorder %v9193_v31, 0.0  ;;  %vm5070_vm2 = vcmp.ge.f32.partialorder %v9196_v5, 0.0 }
 0x260   : > { %v6130_v60 = vpack.c.bf16 %v5158_v30, %v5157_v55  ;;  %v5124_v26 = vsel %vm5060_vm11, %v7064_v28, %v5092_v48  ;;  %7081 = vpow2.f32 %v4975_v17  ;;  %v5003_v6 = vadd.f32 1.0, %v7068_v58 }
 0x261   : > { %v5156_v8 = vmul.f32 %v5124_v26, %v9117_v19  ;;  %7083 = vrcp.f32 %v5005_v41  ;;  %v4912_v19 = vsub.f32 0.0, %v4880_v42  ;;  %vm5068_vm3 = vcmp.ge.f32.partialorder %v9208_v59, 0.0 }
 0x262   : > { %6170 = vst [vmem:[%s9045_s23 + $0x48] sm:$0xff] %v6130_v60   ;;  %7085 = vpow2.f32 %v4971_v52  ;;  %vm5073_vm4 = vcmp.ge.f32.partialorder %v9215_v16, 0.0  ;;  %vm5074_vm5 = vcmp.ge.f32.partialorder %v9226_v34, 0.0  ;;  %vm5071_vm6 = vcmp.ge.f32.partialorder %v9223_v35, 0.0 }
 0x263   : > { %v6125_v9 = vpack.c.bf16 %v5156_v8, %v5155_v15  ;;  %7087 = vpow2.f32 %v4977_v56  ;;  %v4973_v10 = vmul.f32 1.442695, %v4912_v19  ;;  %vm5072_vm7 = vcmp.ge.f32.partialorder %v9242_v39, 0.0 }
 0x264   : > { %v7070_v13 = vpop.eup %7069  ;;  %7089 = vrcp.f32 %v5003_v6 }
 0x265   : > { %v7072_v23 = vpop.eup %7071  ;;  %6169 = vst [vmem:[%s9045_s23 + $0x40] sm:$0xff] %v6125_v9   ;;  %v5097_v54 = vsub.f32 1.0, %v7070_v13 }
 0x266   : > { %v7074_v63 = vpop.eup %7073  ;;  %v5095_v18 = vsub.f32 1.0, %v7072_v23 }
 0x267   : > { %v5006_v53 = vadd.f32 1.0, %v7074_v63  ;;  %v7076_v2 = vpop.eup %7075  ;;  %v5129_v61 = vsel %vm5065_vm12, %v7070_v13, %v5097_v54 }
 0x268   : > { %v7078_v38 = vpop.eup %7077  ;;  %v5004_v40 = vadd.f32 1.0, %v7076_v2  ;;  %v5127_v32 = vsel %vm5063_vm13, %v7072_v23, %v5095_v18  ;;  %v5161_v7 = vmul.f32 %v5129_v61, %v9129_v1 }
 0x269   : > { %7091 = vrcp.f32 %v5006_v53  ;;  %v7080_v25 = vpop.eup %7079  ;;  %v5098_v22 = vsub.f32 1.0, %v7078_v38  ;;  %v5159_v37 = vmul.f32 %v5127_v32, %v9153_v11 }
 0x26a   : > { %7093 = vpow2.f32 %v4973_v10  ;;  %v7082_v36 = vpop.eup %7081  ;;  %v5096_v44 = vsub.f32 1.0, %v7080_v25 }
 0x26b   : > { %7095 = vrcp.f32 %v5004_v40  ;;  %v5130_v12 = vsel %vm5066_vm14, %v7078_v38, %v5098_v22  ;;  %v5009_v46 = vadd.f32 1.0, %v7082_v36  ;;  %v7084_v47 = vpop.eup %7083 }
 0x26c   : > { %v5162_v55 = vmul.f32 %v5130_v12, %v9159_v33  ;;  %v5128_v49 = vsel %vm5064_vm15, %v7080_v25, %v5096_v44  ;;  %v7086_v0 = vpop.eup %7085  ;;  %v5101_v28 = vsub.f32 1.0, %v7084_v47 }
 0x26d   : > { %v5160_v50 = vmul.f32 %v5128_v49, %v9170_v24  ;;  %7097 = vrcp.f32 %v5009_v46  ;;  %v7088_v3 = vpop.eup %7087  ;;  %v5007_v57 = vadd.f32 1.0, %v7086_v0 }
 0x26e   : > { %v6140_v51 = vpack.c.bf16 %v5162_v55, %v5161_v7  ;;  %v7090_v62 = vpop.eup %7089  ;;  %v5010_v27 = vadd.f32 1.0, %v7088_v3  ;;  %v5133_v11 = vsel %vm5069_vm0, %v7084_v47, %v5101_v28 }
 0x26f   : > { %v6135_v14 = vpack.c.bf16 %v5160_v50, %v5159_v37  ;;  %7099 = vrcp.f32 %v5007_v57  ;;  %v5099_v1 = vsub.f32 1.0, %v7090_v62  ;;  %v5165_v15 = vmul.f32 %v5133_v11, %v9183_v45 }
 0x270   : > { %6172 = vst [vmem:[%s9045_s23 + $0x58] sm:$0xff] %v6140_v51   ;;  %7101 = vrcp.f32 %v5010_v27 }
 0x271   : > { %6171 = vst [vmem:[%s9045_s23 + $0x50] sm:$0xff] %v6135_v14   ;;  %v5131_v48 = vsel %vm5067_vm1, %v7090_v62, %v5099_v1 }
 0x272   : > { %v5163_v26 = vmul.f32 %v5131_v48, %v9193_v31 }
 0x273   : > { %v7092_v33 = vpop.eup %7091 }
 0x274   : > { %v7094_v21 = vpop.eup %7093  ;;  %v5102_v17 = vsub.f32 1.0, %v7092_v33 }
 0x275   : > { %v7096_v24 = vpop.eup %7095  ;;  %v5008_v30 = vadd.f32 1.0, %v7094_v21 }
 0x276   : > { %v5134_v4 = vsel %vm5070_vm2, %v7092_v33, %v5102_v17  ;;  %v5100_v43 = vsub.f32 1.0, %v7096_v24 }
 0x277   : > { %v5166_v20 = vmul.f32 %v5134_v4, %v9196_v5  ;;  %7103 = vrcp.f32 %v5008_v30  ;;  %v7098_v29 = vpop.eup %7097 }
 0x278   : > { %v5132_v60 = vsel %vm5068_vm3, %v7096_v24, %v5100_v43  ;;  %v5105_v52 = vsub.f32 1.0, %v7098_v29 }
 0x279   : > { %v6150_v41 = vpack.c.bf16 %v5166_v20, %v5165_v15  ;;  %v5164_v8 = vmul.f32 %v5132_v60, %v9208_v59  ;;  %v7100_v56 = vpop.eup %7099 }
 0x27a   : > { %v7102_v13 = vpop.eup %7101  ;;  %v5137_v45 = vsel %vm5073_vm4, %v7098_v29, %v5105_v52  ;;  %v5103_v9 = vsub.f32 1.0, %v7100_v56 }
 0x27b   : > { %6174 = vst [vmem:[%s9045_s23 + $0x68] sm:$0xff] %v6150_v41   ;;  %v6145_v58 = vpack.c.bf16 %v5164_v8, %v5163_v26  ;;  %v5106_v5 = vsub.f32 1.0, %v7102_v13  ;;  %v5169_v31 = vmul.f32 %v5137_v45, %v9215_v16 }
 0x27c   : > { %v5135_v23 = vsel %vm5071_vm6, %v7100_v56, %v5103_v9 }
 0x27d   : > { %6173 = vst [vmem:[%s9045_s23 + $0x60] sm:$0xff] %v6145_v58   ;;  %v5138_v6 = vsel %vm5074_vm5, %v7102_v13, %v5106_v5  ;;  %v5167_v18 = vmul.f32 %v5135_v23, %v9223_v35 }
 0x27e   : > { %v5170_v59 = vmul.f32 %v5138_v6, %v9226_v34 }
 0x280   : > { %v6160_v63 = vpack.c.bf16 %v5170_v59, %v5169_v31 }
 0x281   : > { %v7104_v42 = vpop.eup %7103 }
 0x282   : > { %v5104_v54 = vsub.f32 1.0, %v7104_v42  ;;  %6176 = vst [vmem:[%s9045_s23 + $0x78] sm:$0xff] %v6160_v63  }
 0x284   : > { %v5136_v19 = vsel %vm5072_vm7, %v7104_v42, %v5104_v54 }
 0x285   : > { %v5168_v53 = vmul.f32 %v5136_v19, %v9242_v39 }
 0x287   : > { %v6155_v2 = vpack.c.bf16 %v5168_v53, %v5167_v18 }
 0x289   : > { %6175 = vst [vmem:[%s9045_s23 + $0x70] sm:$0xff] %v6155_v2  }
 0x28a PF: > { %s13_s14 = sadd.s32 1, %s7184_s14   ;;  %s9357_s12 = smov %s7180_s13 }
 0x28b   : > { %p10_p5 = scmp.ge.s32.totalorder %s13_s14, 4   ;;  %s9358_s13 = smov %s9360_s15 }
 0x28d   :  { %12 = sbr.rel (!%p10_p5) target bundleno = 2 (0x2), region = 79 }

</bundles_post_ra>
